<compile_context>
chip_gen: v6e
topology: v6e:2x2x1
jax: 0.10.0
libtpu: 0.0.40
codegen_flags: <defaults>
</compile_context>

<pallas_src>
import math
from functools import partial

import numpy as np
import jax
import jax.numpy as jnp
from jax import lax
from jax.experimental import pallas as pl
from jax.experimental.pallas import tpu as pltpu

KSIZE = 3
BN_EPS = 1e-5
CPAD = 8                                   # channels padded to one full sublane tile
K_ROWS = KSIZE ** 3 * CPAD                 # 216 im2col rows, order (kd, kh, kw, ci)
K_PAD = ((K_ROWS + 127) // 128) * 128      # contraction dim padded to whole lane tiles


def _activation(name):
    if name == "relu":
        return lambda y: jnp.maximum(y, 0.0)
    if name == "leaky_relu":
        return lambda y: jnp.where(y >= 0.0, y, 0.01 * y)
    if name == "gelu":
        inv_sqrt2 = 1.0 / math.sqrt(2.0)
        return lambda y: 0.5 * y * (1.0 + lax.erf(y * inv_sqrt2))   # exact GELU (nn.GELU default)
    raise ValueError(f"unknown activation {name}")


def _conv_out_depth(d_in, stride):
    return (d_in + 2 - KSIZE) // stride + 1


def _depth_plan(d_in, strides):
    """Per layer: output-depth count and the output-depth slices actually consumed
    downstream (working backwards from the final depth mean)."""
    d_outs, d = [], d_in
    for s in strides:
        d = _conv_out_depth(d, s)
        d_outs.append(d)
    needed = [None] * len(strides)
    needed[-1] = list(range(d_outs[-1]))               # every last-layer slice feeds the mean
    for l in range(len(strides) - 1, 0, -1):
        req = set()
        for dd in needed[l]:
            for kd in range(KSIZE):
                di = dd * strides[l] + kd - 1
                if 0 <= di < d_outs[l - 1]:
                    req.add(di)
        needed[l - 1] = sorted(req)
    return d_outs, needed


def _build_kernel(cpad, H, W, d_in, strides, act_name, d_outs, needed, in_index, max_cols):
    act = _activation(act_name)
    nl = len(strides)
    HW = H * W
    tap_rows = KSIZE * KSIZE * cpad        # 72 rows per kd block

    def kernel(*refs):
        w_refs = refs[0:2 * nl:2]          # per layer: (cpad, K_PAD) VMEM (BN-folded weights)
        b_refs = refs[1:2 * nl:2]          # per layer: (cpad, 1)    VMEM (BN+bias folded)
        x_ref = refs[2 * nl]               # (Dg, cpad, HW) VMEM (pre-gathered depth slices)
        o_ref = refs[2 * nl + 1]           # (cpad, HW)     VMEM
        rhs_ref = refs[2 * nl + 2]         # (K_PAD, max_cols) VMEM scratch (im2col RHS)

        # Boundary masks, built once from iota (compile-time-constant vregs).
        col = lax.broadcasted_iota(jnp.int32, (cpad, HW), 1)
        if W & (W - 1) == 0:
            wcol = col & (W - 1)
        else:
            wcol = lax.rem(col, W)
        mask_w = {-1: wcol != 0, 1: wcol != W - 1}      # (w-1)/(w+1) stay inside the row
        mask_h = {-1: col >= W, 1: col < HW - W}        # (h-1)/(h+1) stay inside the image

        def shift(a, off, mask):
            """out[:, i] = a[:, i + off], zero outside the image; `off` is static."""
            if off == 0:
                return a
            rolled = pltpu.roll(a, (-off) % HW, axis=1)   # XLU rotate; wraps land on masked lanes
            return jnp.where(mask, rolled, 0.0)

        def taps_of(xs):
            """9 spatial (kh, kw) taps of one (cpad, HW) depth slice."""
            xw = {dw: shift(xs, dw, mask_w.get(dw)) for dw in (-1, 0, 1)}
            out = []
            for kh in range(KSIZE):
                dh = kh - 1
                for kw in range(KSIZE):
                    out.append(shift(xw[kw - 1], dh * W, mask_h.get(dh)))
            return out

        zero_tap = jnp.zeros((tap_rows, HW), jnp.float32)

        # K padding rows must be zero: the weight pad columns are zero, but
        # 0 * uninitialized-VMEM could be NaN, so clear them every invocation.
        if K_PAD > K_ROWS:
            rhs_ref[K_ROWS:K_PAD, :] = jnp.zeros((K_PAD - K_ROWS, max_cols), jnp.float32)

        prev, d_prev = None, d_in
        for l in range(nl):
            s = strides[l]
            ncols = len(needed[l]) * HW

            # Which (kd, output-depth column slot) pairs consume each input depth;
            # taps falling into the depth zero-padding get an explicit zero block.
            consumers = {}
            for j, d in enumerate(needed[l]):
                for kd in range(KSIZE):
                    di = d * s + kd - 1
                    if 0 <= di < d_prev:
                        consumers.setdefault(di, []).append((kd, j))
                    else:
                        rhs_ref[kd * tap_rows:(kd + 1) * tap_rows,
                                j * HW:(j + 1) * HW] = zero_tap

            # Build each distinct input depth's 9 taps once and scatter them via
            # static, tile-aligned stores to every (kd, slot) that consumes them.
            for di in sorted(consumers):
                xs = x_ref[in_index[di]] if l == 0 else prev[di]
                taps = taps_of(xs)
                for kd, j in consumers[di]:
                    c0 = j * HW
                    for t in range(KSIZE * KSIZE):
                        r0 = kd * tap_rows + t * cpad
                        rhs_ref[r0:r0 + cpad, c0:c0 + HW] = taps[t]

            # One wide MXU matmul for the whole layer: (cpad, K_PAD) x (K_PAD, nd*HW).
            res = jnp.dot(w_refs[l][...], rhs_ref[:, :ncols],
                          preferred_element_type=jnp.float32)
            res = act(res + b_refs[l][...])
            prev = {d: res[:, j * HW:(j + 1) * HW] for j, d in enumerate(needed[l])}
            d_prev = d_outs[l]

        # AdaptiveAvgPool3d((1, H, W)) + squeeze(2): mean over the final depth axis.
        total = prev[needed[-1][0]]
        for d in needed[-1][1:]:
            total = total + prev[d]
        o_ref[...] = (total * (1.0 / d_outs[-1])).astype(o_ref.dtype)

    return kernel


@partial(jax.jit, static_argnames=("stride", "act_name"))
def feat_ex_z_forward(x, params, *, stride, act_name):
    """FeatExZ forward (inference). x: (N, C, D, H, W) float32."""
    N, C, D, H, W = x.shape
    assert C <= CPAD, "raise CPAD (in multiples of 8) for more channels"
    HW = H * W
    nl = len(params)
    strides = (stride,) * nl

    d_outs, needed = _depth_plan(D, strides)
    # Only the input depth slices the static depth plan actually reads get DMA'd.
    needed_in = sorted({d * strides[0] + kd - 1
                        for d in needed[0] for kd in range(KSIZE)
                        if 0 <= d * strides[0] + kd - 1 < D})
    in_index = {di: i for i, di in enumerate(needed_in)}
    Dg = len(needed_in)

    # NCDHW -> gather needed depths -> (N, Dg, Cpad, H*W): lane-dense spatial axis,
    # channel axis padded to a whole 8-row sublane tile (whole vregs, unmasked stores).
    xr = jnp.transpose(x, (0, 2, 1, 3, 4))                       # (N, D, C, H, W)
    xr = jnp.take(xr, jnp.asarray(needed_in, jnp.int32), axis=1)  # (N, Dg, C, H, W)
    xr = xr.reshape(N, Dg, C, HW)
    xr = jnp.pad(xr, ((0, 0), (0, 0), (0, CPAD - C), (0, 0)))

    # Fold conv bias + BatchNorm (eval) into the conv: one (CPAD, K_PAD) weight slab
    # per layer, column order (kd, kh, kw, ci), plus a single per-channel bias column.
    w_mats, b_cols = [], []
    for p in params:
        scale = p["gamma"] / jnp.sqrt(p["rvar"] + BN_EPS)                    # (C,)
        w_s = p["w"] * scale[:, None, None, None, None]                      # (Co,Ci,kd,kh,kw)
        w_t = jnp.transpose(w_s, (0, 2, 3, 4, 1))                            # (co,kd,kh,kw,ci)
        w_t = jnp.pad(w_t, ((0, CPAD - C), (0, 0), (0, 0), (0, 0), (0, CPAD - C)))
        w_flat = w_t.reshape(CPAD, K_ROWS)
        w_mats.append(jnp.pad(w_flat, ((0, 0), (0, K_PAD - K_ROWS))))        # (8, 256)
        b = p["beta"] + scale * (p["b"] - p["rmean"])
        b_cols.append(jnp.pad(b, (0, CPAD - C)).reshape(CPAD, 1))

    max_cols = max(len(lst) for lst in needed) * HW
    kernel = _build_kernel(CPAD, H, W, D, strides, act_name, d_outs, needed,
                           in_index, max_cols)

    def whole(shape):
        ndim = len(shape)
        return pl.BlockSpec(shape, lambda *_: (0,) * ndim)

    in_specs, args = [], []
    for wm, bc in zip(w_mats, b_cols):
        in_specs += [whole((CPAD, K_PAD)), whole((CPAD, 1))]
        args += [wm, bc]
    in_specs.append(pl.BlockSpec((None, Dg, CPAD, HW), lambda n: (n, 0, 0, 0)))
    args.append(xr)

    n_slices = sum(len(lst) for lst in needed)
    cost = pl.CostEstimate(
        flops=int(2 * CPAD * K_PAD * HW * n_slices * N),
        transcendentals=int(CPAD * HW * n_slices * N) if act_name == "gelu" else 0,
        bytes_accessed=int(4 * (xr.size + sum(w.size for w in w_mats)
                                + sum(b.size for b in b_cols) + N * CPAD * HW)),
    )

    out = pl.pallas_call(
        kernel,
        out_shape=jax.ShapeDtypeStruct((N, CPAD, HW), x.dtype),
        grid=(N,),
        in_specs=in_specs,
        out_specs=pl.BlockSpec((None, CPAD, HW), lambda n: (n, 0, 0)),
        scratch_shapes=[pltpu.VMEM((K_PAD, max_cols), jnp.float32)],
        compiler_params=pltpu.CompilerParams(dimension_semantics=("parallel",)),
        cost_estimate=cost,
    )(*args)
    return out[:, :C, :].reshape(N, C, H, W)


def init_params(key, channels, depth):
    """Deterministic init mirroring the PyTorch module __init__ (he-normal conv weights,
    default conv bias, identity BatchNorm running stats)."""
    fan_in = channels * KSIZE ** 3
    std = math.sqrt(2.0 / fan_in)        # kaiming_normal_(mode='fan_in', nonlinearity='relu')
    bound = 1.0 / math.sqrt(fan_in)      # PyTorch Conv3d default bias init
    params = []
    for _ in range(depth):
        key, kw, kb = jax.random.split(key, 3)
        params.append(dict(
            w=jax.random.normal(kw, (channels, channels, KSIZE, KSIZE, KSIZE), jnp.float32) * std,
            b=jax.random.uniform(kb, (channels,), jnp.float32, -bound, bound),
            gamma=jnp.ones((channels,), jnp.float32),
            beta=jnp.zeros((channels,), jnp.float32),
            rmean=jnp.zeros((channels,), jnp.float32),
            rvar=jnp.ones((channels,), jnp.float32),
        ))
    return params


def reference_forward(x, params, *, stride, act_name):
    """Pure-JAX (XLA) reference of FeatExZ.forward for validation."""
    act = _activation(act_name)
    for p in params:
        x = lax.conv_general_dilated(
            x, p["w"], window_strides=(stride, 1, 1), padding=[(1, 1)] * 3,
            dimension_numbers=("NCDHW", "OIDHW", "NCDHW"),
            precision=lax.Precision.HIGHEST)
        x = x + p["b"][None, :, None, None, None]
        x = (x - p["rmean"][None, :, None, None, None]) / jnp.sqrt(
            p["rvar"][None, :, None, None, None] + BN_EPS)
        x = x * p["gamma"][None, :, None, None, None] + p["beta"][None, :, None, None, None]
        x = act(x)
    return jnp.mean(x, axis=2)


if __name__ == "__main__":
    config = {"activation": "relu", "fe1_depth": 2, "image_size": 16}
    channels = 4
    N, D = 2, 40
    stride = int(np.clip(math.floor(math.log2(200 / config["fe1_depth"])),
                         a_max=6, a_min=2))   # == 6 for fe1_depth == 2

    key = jax.random.PRNGKey(0)
    key, kx = jax.random.split(key)
    x = jax.random.normal(
        kx, (N, channels, D, config["image_size"], config["image_size"]), jnp.float32)
    params = init_params(key, channels, config["fe1_depth"])

    out = feat_ex_z_forward(x, params, stride=stride, act_name=config["activation"])
    out = jax.block_until_ready(out)

    ref = jax.block_until_ready(
        reference_forward(x, params, stride=stride, act_name=config["activation"]))

    assert out.shape == (N, channels, config["image_size"], config["image_size"]), out.shape
    # Kernel matmuls use the MXU's native f32 path; the reference uses Precision.HIGHEST,
    # so allow a slightly looser tolerance. Indexing/shift/layout bugs would be O(1) errors.
    np.testing.assert_allclose(np.asarray(out), np.asarray(ref), rtol=2e-2, atol=2e-2)
    print("KERNEL_OK")
</pallas_src>

<mosaic_0001>
module attributes {stable_mosaic.version = 11 : i64} {
  func.func @kernel(%arg0: i32, %arg1: memref<8x256xf32, #tpu.memory_space<vmem>>, %arg2: memref<8x1xf32, #tpu.memory_space<vmem>>, %arg3: memref<8x256xf32, #tpu.memory_space<vmem>>, %arg4: memref<8x1xf32, #tpu.memory_space<vmem>>, %arg5: memref<1x11x8x256xf32, #tpu.memory_space<vmem>>, %arg6: memref<1x8x256xf32, #tpu.memory_space<vmem>>, %arg7: memref<256x1024xf32, #tpu.memory_space<vmem>>) attributes {dimension_semantics = [#tpu.dimension_semantics<parallel>], iteration_bounds = array<i64: 2>, scalar_prefetch = 0 : i64, scratch_operands = 1 : i64, tpu.core_type = #tpu.core_type<tc>, window_params = [{pipeline_mode = #tpu.pipeline_mode<synchronous>, transform_indices = @transform_0, window_bounds = array<i64: 8, 256>}, {pipeline_mode = #tpu.pipeline_mode<synchronous>, transform_indices = @transform_1, window_bounds = array<i64: 8, 1>}, {pipeline_mode = #tpu.pipeline_mode<synchronous>, transform_indices = @transform_2, window_bounds = array<i64: 8, 256>}, {pipeline_mode = #tpu.pipeline_mode<synchronous>, transform_indices = @transform_3, window_bounds = array<i64: 8, 1>}, {transform_indices = @transform_4, window_bounds = array<i64: 1, 11, 8, 256>}, {transform_indices = @transform_5, window_bounds = array<i64: 1, 8, 256>}]} {
    %0 = tpu.iota {dimensions = array<i32: 1>} : vector<8x256xi32>
    %c15_i32 = arith.constant 15 : i32
    %1 = vector.broadcast %c15_i32 : i32 to vector<8x256xi32>
    %2 = arith.andi %0, %1 : vector<8x256xi32>
    %c0_i32 = arith.constant 0 : i32
    %3 = vector.broadcast %c0_i32 : i32 to vector<8x256xi32>
    %4 = arith.cmpi ne, %2, %3 : vector<8x256xi32>
    %c15_i32_0 = arith.constant 15 : i32
    %5 = vector.broadcast %c15_i32_0 : i32 to vector<8x256xi32>
    %6 = arith.cmpi ne, %2, %5 : vector<8x256xi32>
    %c16_i32 = arith.constant 16 : i32
    %7 = vector.broadcast %c16_i32 : i32 to vector<8x256xi32>
    %8 = arith.cmpi sge, %0, %7 : vector<8x256xi32>
    %c240_i32 = arith.constant 240 : i32
    %9 = vector.broadcast %c240_i32 : i32 to vector<8x256xi32>
    %10 = arith.cmpi slt, %0, %9 : vector<8x256xi32>
    %cst = arith.constant 0.000000e+00 : f32
    %11 = vector.broadcast %cst : f32 to vector<72x256xf32>
    %cst_1 = arith.constant 0.000000e+00 : f32
    %12 = vector.broadcast %cst_1 : f32 to vector<40x1024xf32>
    %c216 = arith.constant 216 : index
    %c0 = arith.constant 0 : index
    %13 = vector.load %arg7[%c216, %c0] : memref<256x1024xf32, #tpu.memory_space<vmem>>, vector<40x1024xf32>
    tpu.vector_store %arg7[%c216, %c0], %12 {strides = array<i32>} : memref<256x1024xf32, #tpu.memory_space<vmem>>, vector<40x1024xf32>,
    %c0_2 = arith.constant 0 : index
    %c0_3 = arith.constant 0 : index
    %14 = vector.load %arg7[%c0_2, %c0_3] : memref<256x1024xf32, #tpu.memory_space<vmem>>, vector<72x256xf32>
    tpu.vector_store %arg7[%c0_2, %c0_3], %11 {strides = array<i32>} : memref<256x1024xf32, #tpu.memory_space<vmem>>, vector<72x256xf32>,
    %c0_4 = arith.constant 0 : index
    %c0_5 = arith.constant 0 : index
    %c0_6 = arith.constant 0 : index
    %c0_7 = arith.constant 0 : index
    %15 = vector.load %arg5[%c0_4, %c0_5, %c0_6, %c0_7] : memref<1x11x8x256xf32, #tpu.memory_space<vmem>>, vector<1x1x8x256xf32>
    %16 = vector.shape_cast %15 : vector<1x1x8x256xf32> to vector<8x256xf32>
    %c1_i32 = arith.constant 1 : i32
    %17 = tpu.dynamic_rotate %16 by %c1_i32 dim 1 : vector<8x256xf32>, i32 -> vector<8x256xf32>
    %cst_8 = arith.constant 0.000000e+00 : f32
    %18 = vector.broadcast %cst_8 : f32 to vector<8x256xf32>
    %19 = arith.select %4, %17, %18 : vector<8x256xi1>, vector<8x256xf32>
    %c255_i32 = arith.constant 255 : i32
    %20 = tpu.dynamic_rotate %16 by %c255_i32 dim 1 : vector<8x256xf32>, i32 -> vector<8x256xf32>
    %cst_9 = arith.constant 0.000000e+00 : f32
    %21 = vector.broadcast %cst_9 : f32 to vector<8x256xf32>
    %22 = arith.select %6, %20, %21 : vector<8x256xi1>, vector<8x256xf32>
    %c16_i32_10 = arith.constant 16 : i32
    %23 = tpu.dynamic_rotate %19 by %c16_i32_10 dim 1 : vector<8x256xf32>, i32 -> vector<8x256xf32>
    %cst_11 = arith.constant 0.000000e+00 : f32
    %24 = vector.broadcast %cst_11 : f32 to vector<8x256xf32>
    %25 = arith.select %8, %23, %24 : vector<8x256xi1>, vector<8x256xf32>
    %c16_i32_12 = arith.constant 16 : i32
    %26 = tpu.dynamic_rotate %16 by %c16_i32_12 dim 1 : vector<8x256xf32>, i32 -> vector<8x256xf32>
    %cst_13 = arith.constant 0.000000e+00 : f32
    %27 = vector.broadcast %cst_13 : f32 to vector<8x256xf32>
    %28 = arith.select %8, %26, %27 : vector<8x256xi1>, vector<8x256xf32>
    %c16_i32_14 = arith.constant 16 : i32
    %29 = tpu.dynamic_rotate %22 by %c16_i32_14 dim 1 : vector<8x256xf32>, i32 -> vector<8x256xf32>
    %cst_15 = arith.constant 0.000000e+00 : f32
    %30 = vector.broadcast %cst_15 : f32 to vector<8x256xf32>
    %31 = arith.select %8, %29, %30 : vector<8x256xi1>, vector<8x256xf32>
    %c240_i32_16 = arith.constant 240 : i32
    %32 = tpu.dynamic_rotate %19 by %c240_i32_16 dim 1 : vector<8x256xf32>, i32 -> vector<8x256xf32>
    %cst_17 = arith.constant 0.000000e+00 : f32
    %33 = vector.broadcast %cst_17 : f32 to vector<8x256xf32>
    %34 = arith.select %10, %32, %33 : vector<8x256xi1>, vector<8x256xf32>
    %c240_i32_18 = arith.constant 240 : i32
    %35 = tpu.dynamic_rotate %16 by %c240_i32_18 dim 1 : vector<8x256xf32>, i32 -> vector<8x256xf32>
    %cst_19 = arith.constant 0.000000e+00 : f32
    %36 = vector.broadcast %cst_19 : f32 to vector<8x256xf32>
    %37 = arith.select %10, %35, %36 : vector<8x256xi1>, vector<8x256xf32>
    %c240_i32_20 = arith.constant 240 : i32
    %38 = tpu.dynamic_rotate %22 by %c240_i32_20 dim 1 : vector<8x256xf32>, i32 -> vector<8x256xf32>
    %cst_21 = arith.constant 0.000000e+00 : f32
    %39 = vector.broadcast %cst_21 : f32 to vector<8x256xf32>
    %40 = arith.select %10, %38, %39 : vector<8x256xi1>, vector<8x256xf32>
    %c72 = arith.constant 72 : index
    %c0_22 = arith.constant 0 : index
    %41 = vector.load %arg7[%c72, %c0_22] : memref<256x1024xf32, #tpu.memory_space<vmem>>, vector<8x256xf32>
    tpu.vector_store %arg7[%c72, %c0_22], %25 {strides = array<i32>} : memref<256x1024xf32, #tpu.memory_space<vmem>>, vector<8x256xf32>,
    %c80 = arith.constant 80 : index
    %c0_23 = arith.constant 0 : index
    %42 = vector.load %arg7[%c80, %c0_23] : memref<256x1024xf32, #tpu.memory_space<vmem>>, vector<8x256xf32>
    tpu.vector_store %arg7[%c80, %c0_23], %28 {strides = array<i32>} : memref<256x1024xf32, #tpu.memory_space<vmem>>, vector<8x256xf32>,
    %c88 = arith.constant 88 : index
    %c0_24 = arith.constant 0 : index
    %43 = vector.load %arg7[%c88, %c0_24] : memref<256x1024xf32, #tpu.memory_space<vmem>>, vector<8x256xf32>
    tpu.vector_store %arg7[%c88, %c0_24], %31 {strides = array<i32>} : memref<256x1024xf32, #tpu.memory_space<vmem>>, vector<8x256xf32>,
    %c96 = arith.constant 96 : index
    %c0_25 = arith.constant 0 : index
    %44 = vector.load %arg7[%c96, %c0_25] : memref<256x1024xf32, #tpu.memory_space<vmem>>, vector<8x256xf32>
    tpu.vector_store %arg7[%c96, %c0_25], %19 {strides = array<i32>} : memref<256x1024xf32, #tpu.memory_space<vmem>>, vector<8x256xf32>,
    %c104 = arith.constant 104 : index
    %c0_26 = arith.constant 0 : index
    %45 = vector.load %arg7[%c104, %c0_26] : memref<256x1024xf32, #tpu.memory_space<vmem>>, vector<8x256xf32>
    tpu.vector_store %arg7[%c104, %c0_26], %16 {strides = array<i32>} : memref<256x1024xf32, #tpu.memory_space<vmem>>, vector<8x256xf32>,
    %c112 = arith.constant 112 : index
    %c0_27 = arith.constant 0 : index
    %46 = vector.load %arg7[%c112, %c0_27] : memref<256x1024xf32, #tpu.memory_space<vmem>>, vector<8x256xf32>
    tpu.vector_store %arg7[%c112, %c0_27], %22 {strides = array<i32>} : memref<256x1024xf32, #tpu.memory_space<vmem>>, vector<8x256xf32>,
    %c120 = arith.constant 120 : index
    %c0_28 = arith.constant 0 : index
    %47 = vector.load %arg7[%c120, %c0_28] : memref<256x1024xf32, #tpu.memory_space<vmem>>, vector<8x256xf32>
    tpu.vector_store %arg7[%c120, %c0_28], %34 {strides = array<i32>} : memref<256x1024xf32, #tpu.memory_space<vmem>>, vector<8x256xf32>,
    %c128 = arith.constant 128 : index
    %c0_29 = arith.constant 0 : index
    %48 = vector.load %arg7[%c128, %c0_29] : memref<256x1024xf32, #tpu.memory_space<vmem>>, vector<8x256xf32>
    tpu.vector_store %arg7[%c128, %c0_29], %37 {strides = array<i32>} : memref<256x1024xf32, #tpu.memory_space<vmem>>, vector<8x256xf32>,
    %c136 = arith.constant 136 : index
    %c0_30 = arith.constant 0 : index
    %49 = vector.load %arg7[%c136, %c0_30] : memref<256x1024xf32, #tpu.memory_space<vmem>>, vector<8x256xf32>
    tpu.vector_store %arg7[%c136, %c0_30], %40 {strides = array<i32>} : memref<256x1024xf32, #tpu.memory_space<vmem>>, vector<8x256xf32>,
    %c0_31 = arith.constant 0 : index
    %c1 = arith.constant 1 : index
    %c0_32 = arith.constant 0 : index
    %c0_33 = arith.constant 0 : index
    %50 = vector.load %arg5[%c0_31, %c1, %c0_32, %c0_33] : memref<1x11x8x256xf32, #tpu.memory_space<vmem>>, vector<1x1x8x256xf32>
    %51 = vector.shape_cast %50 : vector<1x1x8x256xf32> to vector<8x256xf32>
    %c1_i32_34 = arith.constant 1 : i32
    %52 = tpu.dynamic_rotate %51 by %c1_i32_34 dim 1 : vector<8x256xf32>, i32 -> vector<8x256xf32>
    %cst_35 = arith.constant 0.000000e+00 : f32
    %53 = vector.broadcast %cst_35 : f32 to vector<8x256xf32>
    %54 = arith.select %4, %52, %53 : vector<8x256xi1>, vector<8x256xf32>
    %c255_i32_36 = arith.constant 255 : i32
    %55 = tpu.dynamic_rotate %51 by %c255_i32_36 dim 1 : vector<8x256xf32>, i32 -> vector<8x256xf32>
    %cst_37 = arith.constant 0.000000e+00 : f32
    %56 = vector.broadcast %cst_37 : f32 to vector<8x256xf32>
    %57 = arith.select %6, %55, %56 : vector<8x256xi1>, vector<8x256xf32>
    %c16_i32_38 = arith.constant 16 : i32
    %58 = tpu.dynamic_rotate %54 by %c16_i32_38 dim 1 : vector<8x256xf32>, i32 -> vector<8x256xf32>
    %cst_39 = arith.constant 0.000000e+00 : f32
    %59 = vector.broadcast %cst_39 : f32 to vector<8x256xf32>
    %60 = arith.select %8, %58, %59 : vector<8x256xi1>, vector<8x256xf32>
    %c16_i32_40 = arith.constant 16 : i32
    %61 = tpu.dynamic_rotate %51 by %c16_i32_40 dim 1 : vector<8x256xf32>, i32 -> vector<8x256xf32>
    %cst_41 = arith.constant 0.000000e+00 : f32
    %62 = vector.broadcast %cst_41 : f32 to vector<8x256xf32>
    %63 = arith.select %8, %61, %62 : vector<8x256xi1>, vector<8x256xf32>
    %c16_i32_42 = arith.constant 16 : i32
    %64 = tpu.dynamic_rotate %57 by %c16_i32_42 dim 1 : vector<8x256xf32>, i32 -> vector<8x256xf32>
    %cst_43 = arith.constant 0.000000e+00 : f32
    %65 = vector.broadcast %cst_43 : f32 to vector<8x256xf32>
    %66 = arith.select %8, %64, %65 : vector<8x256xi1>, vector<8x256xf32>
    %c240_i32_44 = arith.constant 240 : i32
    %67 = tpu.dynamic_rotate %54 by %c240_i32_44 dim 1 : vector<8x256xf32>, i32 -> vector<8x256xf32>
    %cst_45 = arith.constant 0.000000e+00 : f32
    %68 = vector.broadcast %cst_45 : f32 to vector<8x256xf32>
    %69 = arith.select %10, %67, %68 : vector<8x256xi1>, vector<8x256xf32>
    %c240_i32_46 = arith.constant 240 : i32
    %70 = tpu.dynamic_rotate %51 by %c240_i32_46 dim 1 : vector<8x256xf32>, i32 -> vector<8x256xf32>
    %cst_47 = arith.constant 0.000000e+00 : f32
    %71 = vector.broadcast %cst_47 : f32 to vector<8x256xf32>
    %72 = arith.select %10, %70, %71 : vector<8x256xi1>, vector<8x256xf32>
    %c240_i32_48 = arith.constant 240 : i32
    %73 = tpu.dynamic_rotate %57 by %c240_i32_48 dim 1 : vector<8x256xf32>, i32 -> vector<8x256xf32>
    %cst_49 = arith.constant 0.000000e+00 : f32
    %74 = vector.broadcast %cst_49 : f32 to vector<8x256xf32>
    %75 = arith.select %10, %73, %74 : vector<8x256xi1>, vector<8x256xf32>
    %c144 = arith.constant 144 : index
    %c0_50 = arith.constant 0 : index
    %76 = vector.load %arg7[%c144, %c0_50] : memref<256x1024xf32, #tpu.memory_space<vmem>>, vector<8x256xf32>
    tpu.vector_store %arg7[%c144, %c0_50], %60 {strides = array<i32>} : memref<256x1024xf32, #tpu.memory_space<vmem>>, vector<8x256xf32>,
    %c152 = arith.constant 152 : index
    %c0_51 = arith.constant 0 : index
    %77 = vector.load %arg7[%c152, %c0_51] : memref<256x1024xf32, #tpu.memory_space<vmem>>, vector<8x256xf32>
    tpu.vector_store %arg7[%c152, %c0_51], %63 {strides = array<i32>} : memref<256x1024xf32, #tpu.memory_space<vmem>>, vector<8x256xf32>,
    %c160 = arith.constant 160 : index
    %c0_52 = arith.constant 0 : index
    %78 = vector.load %arg7[%c160, %c0_52] : memref<256x1024xf32, #tpu.memory_space<vmem>>, vector<8x256xf32>
    tpu.vector_store %arg7[%c160, %c0_52], %66 {strides = array<i32>} : memref<256x1024xf32, #tpu.memory_space<vmem>>, vector<8x256xf32>,
    %c168 = arith.constant 168 : index
    %c0_53 = arith.constant 0 : index
    %79 = vector.load %arg7[%c168, %c0_53] : memref<256x1024xf32, #tpu.memory_space<vmem>>, vector<8x256xf32>
    tpu.vector_store %arg7[%c168, %c0_53], %54 {strides = array<i32>} : memref<256x1024xf32, #tpu.memory_space<vmem>>, vector<8x256xf32>,
    %c176 = arith.constant 176 : index
    %c0_54 = arith.constant 0 : index
    %80 = vector.load %arg7[%c176, %c0_54] : memref<256x1024xf32, #tpu.memory_space<vmem>>, vector<8x256xf32>
    tpu.vector_store %arg7[%c176, %c0_54], %51 {strides = array<i32>} : memref<256x1024xf32, #tpu.memory_space<vmem>>, vector<8x256xf32>,
    %c184 = arith.constant 184 : index
    %c0_55 = arith.constant 0 : index
    %81 = vector.load %arg7[%c184, %c0_55] : memref<256x1024xf32, #tpu.memory_space<vmem>>, vector<8x256xf32>
    tpu.vector_store %arg7[%c184, %c0_55], %57 {strides = array<i32>} : memref<256x1024xf32, #tpu.memory_space<vmem>>, vector<8x256xf32>,
    %c192 = arith.constant 192 : index
    %c0_56 = arith.constant 0 : index
    %82 = vector.load %arg7[%c192, %c0_56] : memref<256x1024xf32, #tpu.memory_space<vmem>>, vector<8x256xf32>
    tpu.vector_store %arg7[%c192, %c0_56], %69 {strides = array<i32>} : memref<256x1024xf32, #tpu.memory_space<vmem>>, vector<8x256xf32>,
    %c200 = arith.constant 200 : index
    %c0_57 = arith.constant 0 : index
    %83 = vector.load %arg7[%c200, %c0_57] : memref<256x1024xf32, #tpu.memory_space<vmem>>, vector<8x256xf32>
    tpu.vector_store %arg7[%c200, %c0_57], %72 {strides = array<i32>} : memref<256x1024xf32, #tpu.memory_space<vmem>>, vector<8x256xf32>,
    %c208 = arith.constant 208 : index
    %c0_58 = arith.constant 0 : index
    %84 = vector.load %arg7[%c208, %c0_58] : memref<256x1024xf32, #tpu.memory_space<vmem>>, vector<8x256xf32>
    tpu.vector_store %arg7[%c208, %c0_58], %75 {strides = array<i32>} : memref<256x1024xf32, #tpu.memory_space<vmem>>, vector<8x256xf32>,
    %c0_59 = arith.constant 0 : index
    %c2 = arith.constant 2 : index
    %c0_60 = arith.constant 0 : index
    %c0_61 = arith.constant 0 : index
    %85 = vector.load %arg5[%c0_59, %c2, %c0_60, %c0_61] : memref<1x11x8x256xf32, #tpu.memory_space<vmem>>, vector<1x1x8x256xf32>
    %86 = vector.shape_cast %85 : vector<1x1x8x256xf32> to vector<8x256xf32>
    %c1_i32_62 = arith.constant 1 : i32
    %87 = tpu.dynamic_rotate %86 by %c1_i32_62 dim 1 : vector<8x256xf32>, i32 -> vector<8x256xf32>
    %cst_63 = arith.constant 0.000000e+00 : f32
    %88 = vector.broadcast %cst_63 : f32 to vector<8x256xf32>
    %89 = arith.select %4, %87, %88 : vector<8x256xi1>, vector<8x256xf32>
    %c255_i32_64 = arith.constant 255 : i32
    %90 = tpu.dynamic_rotate %86 by %c255_i32_64 dim 1 : vector<8x256xf32>, i32 -> vector<8x256xf32>
    %cst_65 = arith.constant 0.000000e+00 : f32
    %91 = vector.broadcast %cst_65 : f32 to vector<8x256xf32>
    %92 = arith.select %6, %90, %91 : vector<8x256xi1>, vector<8x256xf32>
    %c16_i32_66 = arith.constant 16 : i32
    %93 = tpu.dynamic_rotate %89 by %c16_i32_66 dim 1 : vector<8x256xf32>, i32 -> vector<8x256xf32>
    %cst_67 = arith.constant 0.000000e+00 : f32
    %94 = vector.broadcast %cst_67 : f32 to vector<8x256xf32>
    %95 = arith.select %8, %93, %94 : vector<8x256xi1>, vector<8x256xf32>
    %c16_i32_68 = arith.constant 16 : i32
    %96 = tpu.dynamic_rotate %86 by %c16_i32_68 dim 1 : vector<8x256xf32>, i32 -> vector<8x256xf32>
    %cst_69 = arith.constant 0.000000e+00 : f32
    %97 = vector.broadcast %cst_69 : f32 to vector<8x256xf32>
    %98 = arith.select %8, %96, %97 : vector<8x256xi1>, vector<8x256xf32>
    %c16_i32_70 = arith.constant 16 : i32
    %99 = tpu.dynamic_rotate %92 by %c16_i32_70 dim 1 : vector<8x256xf32>, i32 -> vector<8x256xf32>
    %cst_71 = arith.constant 0.000000e+00 : f32
    %100 = vector.broadcast %cst_71 : f32 to vector<8x256xf32>
    %101 = arith.select %8, %99, %100 : vector<8x256xi1>, vector<8x256xf32>
    %c240_i32_72 = arith.constant 240 : i32
    %102 = tpu.dynamic_rotate %89 by %c240_i32_72 dim 1 : vector<8x256xf32>, i32 -> vector<8x256xf32>
    %cst_73 = arith.constant 0.000000e+00 : f32
    %103 = vector.broadcast %cst_73 : f32 to vector<8x256xf32>
    %104 = arith.select %10, %102, %103 : vector<8x256xi1>, vector<8x256xf32>
    %c240_i32_74 = arith.constant 240 : i32
    %105 = tpu.dynamic_rotate %86 by %c240_i32_74 dim 1 : vector<8x256xf32>, i32 -> vector<8x256xf32>
    %cst_75 = arith.constant 0.000000e+00 : f32
    %106 = vector.broadcast %cst_75 : f32 to vector<8x256xf32>
    %107 = arith.select %10, %105, %106 : vector<8x256xi1>, vector<8x256xf32>
    %c240_i32_76 = arith.constant 240 : i32
    %108 = tpu.dynamic_rotate %92 by %c240_i32_76 dim 1 : vector<8x256xf32>, i32 -> vector<8x256xf32>
    %cst_77 = arith.constant 0.000000e+00 : f32
    %109 = vector.broadcast %cst_77 : f32 to vector<8x256xf32>
    %110 = arith.select %10, %108, %109 : vector<8x256xi1>, vector<8x256xf32>
    %c0_78 = arith.constant 0 : index
    %c256 = arith.constant 256 : index
    %111 = vector.load %arg7[%c0_78, %c256] : memref<256x1024xf32, #tpu.memory_space<vmem>>, vector<8x256xf32>
    tpu.vector_store %arg7[%c0_78, %c256], %95 {strides = array<i32>} : memref<256x1024xf32, #tpu.memory_space<vmem>>, vector<8x256xf32>,
    %c8 = arith.constant 8 : index
    %c256_79 = arith.constant 256 : index
    %112 = vector.load %arg7[%c8, %c256_79] : memref<256x1024xf32, #tpu.memory_space<vmem>>, vector<8x256xf32>
    tpu.vector_store %arg7[%c8, %c256_79], %98 {strides = array<i32>} : memref<256x1024xf32, #tpu.memory_space<vmem>>, vector<8x256xf32>,
    %c16 = arith.constant 16 : index
    %c256_80 = arith.constant 256 : index
    %113 = vector.load %arg7[%c16, %c256_80] : memref<256x1024xf32, #tpu.memory_space<vmem>>, vector<8x256xf32>
    tpu.vector_store %arg7[%c16, %c256_80], %101 {strides = array<i32>} : memref<256x1024xf32, #tpu.memory_space<vmem>>, vector<8x256xf32>,
    %c24 = arith.constant 24 : index
    %c256_81 = arith.constant 256 : index
    %114 = vector.load %arg7[%c24, %c256_81] : memref<256x1024xf32, #tpu.memory_space<vmem>>, vector<8x256xf32>
    tpu.vector_store %arg7[%c24, %c256_81], %89 {strides = array<i32>} : memref<256x1024xf32, #tpu.memory_space<vmem>>, vector<8x256xf32>,
    %c32 = arith.constant 32 : index
    %c256_82 = arith.constant 256 : index
    %115 = vector.load %arg7[%c32, %c256_82] : memref<256x1024xf32, #tpu.memory_space<vmem>>, vector<8x256xf32>
    tpu.vector_store %arg7[%c32, %c256_82], %86 {strides = array<i32>} : memref<256x1024xf32, #tpu.memory_space<vmem>>, vector<8x256xf32>,
    %c40 = arith.constant 40 : index
    %c256_83 = arith.constant 256 : index
    %116 = vector.load %arg7[%c40, %c256_83] : memref<256x1024xf32, #tpu.memory_space<vmem>>, vector<8x256xf32>
    tpu.vector_store %arg7[%c40, %c256_83], %92 {strides = array<i32>} : memref<256x1024xf32, #tpu.memory_space<vmem>>, vector<8x256xf32>,
    %c48 = arith.constant 48 : index
    %c256_84 = arith.constant 256 : index
    %117 = vector.load %arg7[%c48, %c256_84] : memref<256x1024xf32, #tpu.memory_space<vmem>>, vector<8x256xf32>
    tpu.vector_store %arg7[%c48, %c256_84], %104 {strides = array<i32>} : memref<256x1024xf32, #tpu.memory_space<vmem>>, vector<8x256xf32>,
    %c56 = arith.constant 56 : index
    %c256_85 = arith.constant 256 : index
    %118 = vector.load %arg7[%c56, %c256_85] : memref<256x1024xf32, #tpu.memory_space<vmem>>, vector<8x256xf32>
    tpu.vector_store %arg7[%c56, %c256_85], %107 {strides = array<i32>} : memref<256x1024xf32, #tpu.memory_space<vmem>>, vector<8x256xf32>,
    %c64 = arith.constant 64 : index
    %c256_86 = arith.constant 256 : index
    %119 = vector.load %arg7[%c64, %c256_86] : memref<256x1024xf32, #tpu.memory_space<vmem>>, vector<8x256xf32>
    tpu.vector_store %arg7[%c64, %c256_86], %110 {strides = array<i32>} : memref<256x1024xf32, #tpu.memory_space<vmem>>, vector<8x256xf32>,
    %c0_87 = arith.constant 0 : index
    %c3 = arith.constant 3 : index
    %c0_88 = arith.constant 0 : index
    %c0_89 = arith.constant 0 : index
    %120 = vector.load %arg5[%c0_87, %c3, %c0_88, %c0_89] : memref<1x11x8x256xf32, #tpu.memory_space<vmem>>, vector<1x1x8x256xf32>
    %121 = vector.shape_cast %120 : vector<1x1x8x256xf32> to vector<8x256xf32>
    %c1_i32_90 = arith.constant 1 : i32
    %122 = tpu.dynamic_rotate %121 by %c1_i32_90 dim 1 : vector<8x256xf32>, i32 -> vector<8x256xf32>
    %cst_91 = arith.constant 0.000000e+00 : f32
    %123 = vector.broadcast %cst_91 : f32 to vector<8x256xf32>
    %124 = arith.select %4, %122, %123 : vector<8x256xi1>, vector<8x256xf32>
    %c255_i32_92 = arith.constant 255 : i32
    %125 = tpu.dynamic_rotate %121 by %c255_i32_92 dim 1 : vector<8x256xf32>, i32 -> vector<8x256xf32>
    %cst_93 = arith.constant 0.000000e+00 : f32
    %126 = vector.broadcast %cst_93 : f32 to vector<8x256xf32>
    %127 = arith.select %6, %125, %126 : vector<8x256xi1>, vector<8x256xf32>
    %c16_i32_94 = arith.constant 16 : i32
    %128 = tpu.dynamic_rotate %124 by %c16_i32_94 dim 1 : vector<8x256xf32>, i32 -> vector<8x256xf32>
    %cst_95 = arith.constant 0.000000e+00 : f32
    %129 = vector.broadcast %cst_95 : f32 to vector<8x256xf32>
    %130 = arith.select %8, %128, %129 : vector<8x256xi1>, vector<8x256xf32>
    %c16_i32_96 = arith.constant 16 : i32
    %131 = tpu.dynamic_rotate %121 by %c16_i32_96 dim 1 : vector<8x256xf32>, i32 -> vector<8x256xf32>
    %cst_97 = arith.constant 0.000000e+00 : f32
    %132 = vector.broadcast %cst_97 : f32 to vector<8x256xf32>
    %133 = arith.select %8, %131, %132 : vector<8x256xi1>, vector<8x256xf32>
    %c16_i32_98 = arith.constant 16 : i32
    %134 = tpu.dynamic_rotate %127 by %c16_i32_98 dim 1 : vector<8x256xf32>, i32 -> vector<8x256xf32>
    %cst_99 = arith.constant 0.000000e+00 : f32
    %135 = vector.broadcast %cst_99 : f32 to vector<8x256xf32>
    %136 = arith.select %8, %134, %135 : vector<8x256xi1>, vector<8x256xf32>
    %c240_i32_100 = arith.constant 240 : i32
    %137 = tpu.dynamic_rotate %124 by %c240_i32_100 dim 1 : vector<8x256xf32>, i32 -> vector<8x256xf32>
    %cst_101 = arith.constant 0.000000e+00 : f32
    %138 = vector.broadcast %cst_101 : f32 to vector<8x256xf32>
    %139 = arith.select %10, %137, %138 : vector<8x256xi1>, vector<8x256xf32>
    %c240_i32_102 = arith.constant 240 : i32
    %140 = tpu.dynamic_rotate %121 by %c240_i32_102 dim 1 : vector<8x256xf32>, i32 -> vector<8x256xf32>
    %cst_103 = arith.constant 0.000000e+00 : f32
    %141 = vector.broadcast %cst_103 : f32 to vector<8x256xf32>
    %142 = arith.select %10, %140, %141 : vector<8x256xi1>, vector<8x256xf32>
    %c240_i32_104 = arith.constant 240 : i32
    %143 = tpu.dynamic_rotate %127 by %c240_i32_104 dim 1 : vector<8x256xf32>, i32 -> vector<8x256xf32>
    %cst_105 = arith.constant 0.000000e+00 : f32
    %144 = vector.broadcast %cst_105 : f32 to vector<8x256xf32>
    %145 = arith.select %10, %143, %144 : vector<8x256xi1>, vector<8x256xf32>
    %c72_106 = arith.constant 72 : index
    %c256_107 = arith.constant 256 : index
    %146 = vector.load %arg7[%c72_106, %c256_107] : memref<256x1024xf32, #tpu.memory_space<vmem>>, vector<8x256xf32>
    tpu.vector_store %arg7[%c72_106, %c256_107], %130 {strides = array<i32>} : memref<256x1024xf32, #tpu.memory_space<vmem>>, vector<8x256xf32>,
    %c80_108 = arith.constant 80 : index
    %c256_109 = arith.constant 256 : index
    %147 = vector.load %arg7[%c80_108, %c256_109] : memref<256x1024xf32, #tpu.memory_space<vmem>>, vector<8x256xf32>
    tpu.vector_store %arg7[%c80_108, %c256_109], %133 {strides = array<i32>} : memref<256x1024xf32, #tpu.memory_space<vmem>>, vector<8x256xf32>,
    %c88_110 = arith.constant 88 : index
    %c256_111 = arith.constant 256 : index
    %148 = vector.load %arg7[%c88_110, %c256_111] : memref<256x1024xf32, #tpu.memory_space<vmem>>, vector<8x256xf32>
    tpu.vector_store %arg7[%c88_110, %c256_111], %136 {strides = array<i32>} : memref<256x1024xf32, #tpu.memory_space<vmem>>, vector<8x256xf32>,
    %c96_112 = arith.constant 96 : index
    %c256_113 = arith.constant 256 : index
    %149 = vector.load %arg7[%c96_112, %c256_113] : memref<256x1024xf32, #tpu.memory_space<vmem>>, vector<8x256xf32>
    tpu.vector_store %arg7[%c96_112, %c256_113], %124 {strides = array<i32>} : memref<256x1024xf32, #tpu.memory_space<vmem>>, vector<8x256xf32>,
    %c104_114 = arith.constant 104 : index
    %c256_115 = arith.constant 256 : index
    %150 = vector.load %arg7[%c104_114, %c256_115] : memref<256x1024xf32, #tpu.memory_space<vmem>>, vector<8x256xf32>
    tpu.vector_store %arg7[%c104_114, %c256_115], %121 {strides = array<i32>} : memref<256x1024xf32, #tpu.memory_space<vmem>>, vector<8x256xf32>,
    %c112_116 = arith.constant 112 : index
    %c256_117 = arith.constant 256 : index
    %151 = vector.load %arg7[%c112_116, %c256_117] : memref<256x1024xf32, #tpu.memory_space<vmem>>, vector<8x256xf32>
    tpu.vector_store %arg7[%c112_116, %c256_117], %127 {strides = array<i32>} : memref<256x1024xf32, #tpu.memory_space<vmem>>, vector<8x256xf32>,
    %c120_118 = arith.constant 120 : index
    %c256_119 = arith.constant 256 : index
    %152 = vector.load %arg7[%c120_118, %c256_119] : memref<256x1024xf32, #tpu.memory_space<vmem>>, vector<8x256xf32>
    tpu.vector_store %arg7[%c120_118, %c256_119], %139 {strides = array<i32>} : memref<256x1024xf32, #tpu.memory_space<vmem>>, vector<8x256xf32>,
    %c128_120 = arith.constant 128 : index
    %c256_121 = arith.constant 256 : index
    %153 = vector.load %arg7[%c128_120, %c256_121] : memref<256x1024xf32, #tpu.memory_space<vmem>>, vector<8x256xf32>
    tpu.vector_store %arg7[%c128_120, %c256_121], %142 {strides = array<i32>} : memref<256x1024xf32, #tpu.memory_space<vmem>>, vector<8x256xf32>,
    %c136_122 = arith.constant 136 : index
    %c256_123 = arith.constant 256 : index
    %154 = vector.load %arg7[%c136_122, %c256_123] : memref<256x1024xf32, #tpu.memory_space<vmem>>, vector<8x256xf32>
    tpu.vector_store %arg7[%c136_122, %c256_123], %145 {strides = array<i32>} : memref<256x1024xf32, #tpu.memory_space<vmem>>, vector<8x256xf32>,
    %c0_124 = arith.constant 0 : index
    %c4 = arith.constant 4 : index
    %c0_125 = arith.constant 0 : index
    %c0_126 = arith.constant 0 : index
    %155 = vector.load %arg5[%c0_124, %c4, %c0_125, %c0_126] : memref<1x11x8x256xf32, #tpu.memory_space<vmem>>, vector<1x1x8x256xf32>
    %156 = vector.shape_cast %155 : vector<1x1x8x256xf32> to vector<8x256xf32>
    %c1_i32_127 = arith.constant 1 : i32
    %157 = tpu.dynamic_rotate %156 by %c1_i32_127 dim 1 : vector<8x256xf32>, i32 -> vector<8x256xf32>
    %cst_128 = arith.constant 0.000000e+00 : f32
    %158 = vector.broadcast %cst_128 : f32 to vector<8x256xf32>
    %159 = arith.select %4, %157, %158 : vector<8x256xi1>, vector<8x256xf32>
    %c255_i32_129 = arith.constant 255 : i32
    %160 = tpu.dynamic_rotate %156 by %c255_i32_129 dim 1 : vector<8x256xf32>, i32 -> vector<8x256xf32>
    %cst_130 = arith.constant 0.000000e+00 : f32
    %161 = vector.broadcast %cst_130 : f32 to vector<8x256xf32>
    %162 = arith.select %6, %160, %161 : vector<8x256xi1>, vector<8x256xf32>
    %c16_i32_131 = arith.constant 16 : i32
    %163 = tpu.dynamic_rotate %159 by %c16_i32_131 dim 1 : vector<8x256xf32>, i32 -> vector<8x256xf32>
    %cst_132 = arith.constant 0.000000e+00 : f32
    %164 = vector.broadcast %cst_132 : f32 to vector<8x256xf32>
    %165 = arith.select %8, %163, %164 : vector<8x256xi1>, vector<8x256xf32>
    %c16_i32_133 = arith.constant 16 : i32
    %166 = tpu.dynamic_rotate %156 by %c16_i32_133 dim 1 : vector<8x256xf32>, i32 -> vector<8x256xf32>
    %cst_134 = arith.constant 0.000000e+00 : f32
    %167 = vector.broadcast %cst_134 : f32 to vector<8x256xf32>
    %168 = arith.select %8, %166, %167 : vector<8x256xi1>, vector<8x256xf32>
    %c16_i32_135 = arith.constant 16 : i32
    %169 = tpu.dynamic_rotate %162 by %c16_i32_135 dim 1 : vector<8x256xf32>, i32 -> vector<8x256xf32>
    %cst_136 = arith.constant 0.000000e+00 : f32
    %170 = vector.broadcast %cst_136 : f32 to vector<8x256xf32>
    %171 = arith.select %8, %169, %170 : vector<8x256xi1>, vector<8x256xf32>
    %c240_i32_137 = arith.constant 240 : i32
    %172 = tpu.dynamic_rotate %159 by %c240_i32_137 dim 1 : vector<8x256xf32>, i32 -> vector<8x256xf32>
    %cst_138 = arith.constant 0.000000e+00 : f32
    %173 = vector.broadcast %cst_138 : f32 to vector<8x256xf32>
    %174 = arith.select %10, %172, %173 : vector<8x256xi1>, vector<8x256xf32>
    %c240_i32_139 = arith.constant 240 : i32
    %175 = tpu.dynamic_rotate %156 by %c240_i32_139 dim 1 : vector<8x256xf32>, i32 -> vector<8x256xf32>
    %cst_140 = arith.constant 0.000000e+00 : f32
    %176 = vector.broadcast %cst_140 : f32 to vector<8x256xf32>
    %177 = arith.select %10, %175, %176 : vector<8x256xi1>, vector<8x256xf32>
    %c240_i32_141 = arith.constant 240 : i32
    %178 = tpu.dynamic_rotate %162 by %c240_i32_141 dim 1 : vector<8x256xf32>, i32 -> vector<8x256xf32>
    %cst_142 = arith.constant 0.000000e+00 : f32
    %179 = vector.broadcast %cst_142 : f32 to vector<8x256xf32>
    %180 = arith.select %10, %178, %179 : vector<8x256xi1>, vector<8x256xf32>
    %c144_143 = arith.constant 144 : index
    %c256_144 = arith.constant 256 : index
    %181 = vector.load %arg7[%c144_143, %c256_144] : memref<256x1024xf32, #tpu.memory_space<vmem>>, vector<8x256xf32>
    tpu.vector_store %arg7[%c144_143, %c256_144], %165 {strides = array<i32>} : memref<256x1024xf32, #tpu.memory_space<vmem>>, vector<8x256xf32>,
    %c152_145 = arith.constant 152 : index
    %c256_146 = arith.constant 256 : index
    %182 = vector.load %arg7[%c152_145, %c256_146] : memref<256x1024xf32, #tpu.memory_space<vmem>>, vector<8x256xf32>
    tpu.vector_store %arg7[%c152_145, %c256_146], %168 {strides = array<i32>} : memref<256x1024xf32, #tpu.memory_space<vmem>>, vector<8x256xf32>,
    %c160_147 = arith.constant 160 : index
    %c256_148 = arith.constant 256 : index
    %183 = vector.load %arg7[%c160_147, %c256_148] : memref<256x1024xf32, #tpu.memory_space<vmem>>, vector<8x256xf32>
    tpu.vector_store %arg7[%c160_147, %c256_148], %171 {strides = array<i32>} : memref<256x1024xf32, #tpu.memory_space<vmem>>, vector<8x256xf32>,
    %c168_149 = arith.constant 168 : index
    %c256_150 = arith.constant 256 : index
    %184 = vector.load %arg7[%c168_149, %c256_150] : memref<256x1024xf32, #tpu.memory_space<vmem>>, vector<8x256xf32>
    tpu.vector_store %arg7[%c168_149, %c256_150], %159 {strides = array<i32>} : memref<256x1024xf32, #tpu.memory_space<vmem>>, vector<8x256xf32>,
    %c176_151 = arith.constant 176 : index
    %c256_152 = arith.constant 256 : index
    %185 = vector.load %arg7[%c176_151, %c256_152] : memref<256x1024xf32, #tpu.memory_space<vmem>>, vector<8x256xf32>
    tpu.vector_store %arg7[%c176_151, %c256_152], %156 {strides = array<i32>} : memref<256x1024xf32, #tpu.memory_space<vmem>>, vector<8x256xf32>,
    %c184_153 = arith.constant 184 : index
    %c256_154 = arith.constant 256 : index
    %186 = vector.load %arg7[%c184_153, %c256_154] : memref<256x1024xf32, #tpu.memory_space<vmem>>, vector<8x256xf32>
    tpu.vector_store %arg7[%c184_153, %c256_154], %162 {strides = array<i32>} : memref<256x1024xf32, #tpu.memory_space<vmem>>, vector<8x256xf32>,
    %c192_155 = arith.constant 192 : index
    %c256_156 = arith.constant 256 : index
    %187 = vector.load %arg7[%c192_155, %c256_156] : memref<256x1024xf32, #tpu.memory_space<vmem>>, vector<8x256xf32>
    tpu.vector_store %arg7[%c192_155, %c256_156], %174 {strides = array<i32>} : memref<256x1024xf32, #tpu.memory_space<vmem>>, vector<8x256xf32>,
    %c200_157 = arith.constant 200 : index
    %c256_158 = arith.constant 256 : index
    %188 = vector.load %arg7[%c200_157, %c256_158] : memref<256x1024xf32, #tpu.memory_space<vmem>>, vector<8x256xf32>
    tpu.vector_store %arg7[%c200_157, %c256_158], %177 {strides = array<i32>} : memref<256x1024xf32, #tpu.memory_space<vmem>>, vector<8x256xf32>,
    %c208_159 = arith.constant 208 : index
    %c256_160 = arith.constant 256 : index
    %189 = vector.load %arg7[%c208_159, %c256_160] : memref<256x1024xf32, #tpu.memory_space<vmem>>, vector<8x256xf32>
    tpu.vector_store %arg7[%c208_159, %c256_160], %180 {strides = array<i32>} : memref<256x1024xf32, #tpu.memory_space<vmem>>, vector<8x256xf32>,
    %c0_161 = arith.constant 0 : index
    %c5 = arith.constant 5 : index
    %c0_162 = arith.constant 0 : index
    %c0_163 = arith.constant 0 : index
    %190 = vector.load %arg5[%c0_161, %c5, %c0_162, %c0_163] : memref<1x11x8x256xf32, #tpu.memory_space<vmem>>, vector<1x1x8x256xf32>
    %191 = vector.shape_cast %190 : vector<1x1x8x256xf32> to vector<8x256xf32>
    %c1_i32_164 = arith.constant 1 : i32
    %192 = tpu.dynamic_rotate %191 by %c1_i32_164 dim 1 : vector<8x256xf32>, i32 -> vector<8x256xf32>
    %cst_165 = arith.constant 0.000000e+00 : f32
    %193 = vector.broadcast %cst_165 : f32 to vector<8x256xf32>
    %194 = arith.select %4, %192, %193 : vector<8x256xi1>, vector<8x256xf32>
    %c255_i32_166 = arith.constant 255 : i32
    %195 = tpu.dynamic_rotate %191 by %c255_i32_166 dim 1 : vector<8x256xf32>, i32 -> vector<8x256xf32>
    %cst_167 = arith.constant 0.000000e+00 : f32
    %196 = vector.broadcast %cst_167 : f32 to vector<8x256xf32>
    %197 = arith.select %6, %195, %196 : vector<8x256xi1>, vector<8x256xf32>
    %c16_i32_168 = arith.constant 16 : i32
    %198 = tpu.dynamic_rotate %194 by %c16_i32_168 dim 1 : vector<8x256xf32>, i32 -> vector<8x256xf32>
    %cst_169 = arith.constant 0.000000e+00 : f32
    %199 = vector.broadcast %cst_169 : f32 to vector<8x256xf32>
    %200 = arith.select %8, %198, %199 : vector<8x256xi1>, vector<8x256xf32>
    %c16_i32_170 = arith.constant 16 : i32
    %201 = tpu.dynamic_rotate %191 by %c16_i32_170 dim 1 : vector<8x256xf32>, i32 -> vector<8x256xf32>
    %cst_171 = arith.constant 0.000000e+00 : f32
    %202 = vector.broadcast %cst_171 : f32 to vector<8x256xf32>
    %203 = arith.select %8, %201, %202 : vector<8x256xi1>, vector<8x256xf32>
    %c16_i32_172 = arith.constant 16 : i32
    %204 = tpu.dynamic_rotate %197 by %c16_i32_172 dim 1 : vector<8x256xf32>, i32 -> vector<8x256xf32>
    %cst_173 = arith.constant 0.000000e+00 : f32
    %205 = vector.broadcast %cst_173 : f32 to vector<8x256xf32>
    %206 = arith.select %8, %204, %205 : vector<8x256xi1>, vector<8x256xf32>
    %c240_i32_174 = arith.constant 240 : i32
    %207 = tpu.dynamic_rotate %194 by %c240_i32_174 dim 1 : vector<8x256xf32>, i32 -> vector<8x256xf32>
    %cst_175 = arith.constant 0.000000e+00 : f32
    %208 = vector.broadcast %cst_175 : f32 to vector<8x256xf32>
    %209 = arith.select %10, %207, %208 : vector<8x256xi1>, vector<8x256xf32>
    %c240_i32_176 = arith.constant 240 : i32
    %210 = tpu.dynamic_rotate %191 by %c240_i32_176 dim 1 : vector<8x256xf32>, i32 -> vector<8x256xf32>
    %cst_177 = arith.constant 0.000000e+00 : f32
    %211 = vector.broadcast %cst_177 : f32 to vector<8x256xf32>
    %212 = arith.select %10, %210, %211 : vector<8x256xi1>, vector<8x256xf32>
    %c240_i32_178 = arith.constant 240 : i32
    %213 = tpu.dynamic_rotate %197 by %c240_i32_178 dim 1 : vector<8x256xf32>, i32 -> vector<8x256xf32>
    %cst_179 = arith.constant 0.000000e+00 : f32
    %214 = vector.broadcast %cst_179 : f32 to vector<8x256xf32>
    %215 = arith.select %10, %213, %214 : vector<8x256xi1>, vector<8x256xf32>
    %c0_180 = arith.constant 0 : index
    %c512 = arith.constant 512 : index
    %216 = vector.load %arg7[%c0_180, %c512] : memref<256x1024xf32, #tpu.memory_space<vmem>>, vector<8x256xf32>
    tpu.vector_store %arg7[%c0_180, %c512], %200 {strides = array<i32>} : memref<256x1024xf32, #tpu.memory_space<vmem>>, vector<8x256xf32>,
    %c8_181 = arith.constant 8 : index
    %c512_182 = arith.constant 512 : index
    %217 = vector.load %arg7[%c8_181, %c512_182] : memref<256x1024xf32, #tpu.memory_space<vmem>>, vector<8x256xf32>
    tpu.vector_store %arg7[%c8_181, %c512_182], %203 {strides = array<i32>} : memref<256x1024xf32, #tpu.memory_space<vmem>>, vector<8x256xf32>,
    %c16_183 = arith.constant 16 : index
    %c512_184 = arith.constant 512 : index
    %218 = vector.load %arg7[%c16_183, %c512_184] : memref<256x1024xf32, #tpu.memory_space<vmem>>, vector<8x256xf32>
    tpu.vector_store %arg7[%c16_183, %c512_184], %206 {strides = array<i32>} : memref<256x1024xf32, #tpu.memory_space<vmem>>, vector<8x256xf32>,
    %c24_185 = arith.constant 24 : index
    %c512_186 = arith.constant 512 : index
    %219 = vector.load %arg7[%c24_185, %c512_186] : memref<256x1024xf32, #tpu.memory_space<vmem>>, vector<8x256xf32>
    tpu.vector_store %arg7[%c24_185, %c512_186], %194 {strides = array<i32>} : memref<256x1024xf32, #tpu.memory_space<vmem>>, vector<8x256xf32>,
    %c32_187 = arith.constant 32 : index
    %c512_188 = arith.constant 512 : index
    %220 = vector.load %arg7[%c32_187, %c512_188] : memref<256x1024xf32, #tpu.memory_space<vmem>>, vector<8x256xf32>
    tpu.vector_store %arg7[%c32_187, %c512_188], %191 {strides = array<i32>} : memref<256x1024xf32, #tpu.memory_space<vmem>>, vector<8x256xf32>,
    %c40_189 = arith.constant 40 : index
    %c512_190 = arith.constant 512 : index
    %221 = vector.load %arg7[%c40_189, %c512_190] : memref<256x1024xf32, #tpu.memory_space<vmem>>, vector<8x256xf32>
    tpu.vector_store %arg7[%c40_189, %c512_190], %197 {strides = array<i32>} : memref<256x1024xf32, #tpu.memory_space<vmem>>, vector<8x256xf32>,
    %c48_191 = arith.constant 48 : index
    %c512_192 = arith.constant 512 : index
    %222 = vector.load %arg7[%c48_191, %c512_192] : memref<256x1024xf32, #tpu.memory_space<vmem>>, vector<8x256xf32>
    tpu.vector_store %arg7[%c48_191, %c512_192], %209 {strides = array<i32>} : memref<256x1024xf32, #tpu.memory_space<vmem>>, vector<8x256xf32>,
    %c56_193 = arith.constant 56 : index
    %c512_194 = arith.constant 512 : index
    %223 = vector.load %arg7[%c56_193, %c512_194] : memref<256x1024xf32, #tpu.memory_space<vmem>>, vector<8x256xf32>
    tpu.vector_store %arg7[%c56_193, %c512_194], %212 {strides = array<i32>} : memref<256x1024xf32, #tpu.memory_space<vmem>>, vector<8x256xf32>,
    %c64_195 = arith.constant 64 : index
    %c512_196 = arith.constant 512 : index
    %224 = vector.load %arg7[%c64_195, %c512_196] : memref<256x1024xf32, #tpu.memory_space<vmem>>, vector<8x256xf32>
    tpu.vector_store %arg7[%c64_195, %c512_196], %215 {strides = array<i32>} : memref<256x1024xf32, #tpu.memory_space<vmem>>, vector<8x256xf32>,
    %c0_197 = arith.constant 0 : index
    %c6 = arith.constant 6 : index
    %c0_198 = arith.constant 0 : index
    %c0_199 = arith.constant 0 : index
    %225 = vector.load %arg5[%c0_197, %c6, %c0_198, %c0_199] : memref<1x11x8x256xf32, #tpu.memory_space<vmem>>, vector<1x1x8x256xf32>
    %226 = vector.shape_cast %225 : vector<1x1x8x256xf32> to vector<8x256xf32>
    %c1_i32_200 = arith.constant 1 : i32
    %227 = tpu.dynamic_rotate %226 by %c1_i32_200 dim 1 : vector<8x256xf32>, i32 -> vector<8x256xf32>
    %cst_201 = arith.constant 0.000000e+00 : f32
    %228 = vector.broadcast %cst_201 : f32 to vector<8x256xf32>
    %229 = arith.select %4, %227, %228 : vector<8x256xi1>, vector<8x256xf32>
    %c255_i32_202 = arith.constant 255 : i32
    %230 = tpu.dynamic_rotate %226 by %c255_i32_202 dim 1 : vector<8x256xf32>, i32 -> vector<8x256xf32>
    %cst_203 = arith.constant 0.000000e+00 : f32
    %231 = vector.broadcast %cst_203 : f32 to vector<8x256xf32>
    %232 = arith.select %6, %230, %231 : vector<8x256xi1>, vector<8x256xf32>
    %c16_i32_204 = arith.constant 16 : i32
    %233 = tpu.dynamic_rotate %229 by %c16_i32_204 dim 1 : vector<8x256xf32>, i32 -> vector<8x256xf32>
    %cst_205 = arith.constant 0.000000e+00 : f32
    %234 = vector.broadcast %cst_205 : f32 to vector<8x256xf32>
    %235 = arith.select %8, %233, %234 : vector<8x256xi1>, vector<8x256xf32>
    %c16_i32_206 = arith.constant 16 : i32
    %236 = tpu.dynamic_rotate %226 by %c16_i32_206 dim 1 : vector<8x256xf32>, i32 -> vector<8x256xf32>
    %cst_207 = arith.constant 0.000000e+00 : f32
    %237 = vector.broadcast %cst_207 : f32 to vector<8x256xf32>
    %238 = arith.select %8, %236, %237 : vector<8x256xi1>, vector<8x256xf32>
    %c16_i32_208 = arith.constant 16 : i32
    %239 = tpu.dynamic_rotate %232 by %c16_i32_208 dim 1 : vector<8x256xf32>, i32 -> vector<8x256xf32>
    %cst_209 = arith.constant 0.000000e+00 : f32
    %240 = vector.broadcast %cst_209 : f32 to vector<8x256xf32>
    %241 = arith.select %8, %239, %240 : vector<8x256xi1>, vector<8x256xf32>
    %c240_i32_210 = arith.constant 240 : i32
    %242 = tpu.dynamic_rotate %229 by %c240_i32_210 dim 1 : vector<8x256xf32>, i32 -> vector<8x256xf32>
    %cst_211 = arith.constant 0.000000e+00 : f32
    %243 = vector.broadcast %cst_211 : f32 to vector<8x256xf32>
    %244 = arith.select %10, %242, %243 : vector<8x256xi1>, vector<8x256xf32>
    %c240_i32_212 = arith.constant 240 : i32
    %245 = tpu.dynamic_rotate %226 by %c240_i32_212 dim 1 : vector<8x256xf32>, i32 -> vector<8x256xf32>
    %cst_213 = arith.constant 0.000000e+00 : f32
    %246 = vector.broadcast %cst_213 : f32 to vector<8x256xf32>
    %247 = arith.select %10, %245, %246 : vector<8x256xi1>, vector<8x256xf32>
    %c240_i32_214 = arith.constant 240 : i32
    %248 = tpu.dynamic_rotate %232 by %c240_i32_214 dim 1 : vector<8x256xf32>, i32 -> vector<8x256xf32>
    %cst_215 = arith.constant 0.000000e+00 : f32
    %249 = vector.broadcast %cst_215 : f32 to vector<8x256xf32>
    %250 = arith.select %10, %248, %249 : vector<8x256xi1>, vector<8x256xf32>
    %c72_216 = arith.constant 72 : index
    %c512_217 = arith.constant 512 : index
    %251 = vector.load %arg7[%c72_216, %c512_217] : memref<256x1024xf32, #tpu.memory_space<vmem>>, vector<8x256xf32>
    tpu.vector_store %arg7[%c72_216, %c512_217], %235 {strides = array<i32>} : memref<256x1024xf32, #tpu.memory_space<vmem>>, vector<8x256xf32>,
    %c80_218 = arith.constant 80 : index
    %c512_219 = arith.constant 512 : index
    %252 = vector.load %arg7[%c80_218, %c512_219] : memref<256x1024xf32, #tpu.memory_space<vmem>>, vector<8x256xf32>
    tpu.vector_store %arg7[%c80_218, %c512_219], %238 {strides = array<i32>} : memref<256x1024xf32, #tpu.memory_space<vmem>>, vector<8x256xf32>,
    %c88_220 = arith.constant 88 : index
    %c512_221 = arith.constant 512 : index
    %253 = vector.load %arg7[%c88_220, %c512_221] : memref<256x1024xf32, #tpu.memory_space<vmem>>, vector<8x256xf32>
    tpu.vector_store %arg7[%c88_220, %c512_221], %241 {strides = array<i32>} : memref<256x1024xf32, #tpu.memory_space<vmem>>, vector<8x256xf32>,
    %c96_222 = arith.constant 96 : index
    %c512_223 = arith.constant 512 : index
    %254 = vector.load %arg7[%c96_222, %c512_223] : memref<256x1024xf32, #tpu.memory_space<vmem>>, vector<8x256xf32>
    tpu.vector_store %arg7[%c96_222, %c512_223], %229 {strides = array<i32>} : memref<256x1024xf32, #tpu.memory_space<vmem>>, vector<8x256xf32>,
    %c104_224 = arith.constant 104 : index
    %c512_225 = arith.constant 512 : index
    %255 = vector.load %arg7[%c104_224, %c512_225] : memref<256x1024xf32, #tpu.memory_space<vmem>>, vector<8x256xf32>
    tpu.vector_store %arg7[%c104_224, %c512_225], %226 {strides = array<i32>} : memref<256x1024xf32, #tpu.memory_space<vmem>>, vector<8x256xf32>,
    %c112_226 = arith.constant 112 : index
    %c512_227 = arith.constant 512 : index
    %256 = vector.load %arg7[%c112_226, %c512_227] : memref<256x1024xf32, #tpu.memory_space<vmem>>, vector<8x256xf32>
    tpu.vector_store %arg7[%c112_226, %c512_227], %232 {strides = array<i32>} : memref<256x1024xf32, #tpu.memory_space<vmem>>, vector<8x256xf32>,
    %c120_228 = arith.constant 120 : index
    %c512_229 = arith.constant 512 : index
    %257 = vector.load %arg7[%c120_228, %c512_229] : memref<256x1024xf32, #tpu.memory_space<vmem>>, vector<8x256xf32>
    tpu.vector_store %arg7[%c120_228, %c512_229], %244 {strides = array<i32>} : memref<256x1024xf32, #tpu.memory_space<vmem>>, vector<8x256xf32>,
    %c128_230 = arith.constant 128 : index
    %c512_231 = arith.constant 512 : index
    %258 = vector.load %arg7[%c128_230, %c512_231] : memref<256x1024xf32, #tpu.memory_space<vmem>>, vector<8x256xf32>
    tpu.vector_store %arg7[%c128_230, %c512_231], %247 {strides = array<i32>} : memref<256x1024xf32, #tpu.memory_space<vmem>>, vector<8x256xf32>,
    %c136_232 = arith.constant 136 : index
    %c512_233 = arith.constant 512 : index
    %259 = vector.load %arg7[%c136_232, %c512_233] : memref<256x1024xf32, #tpu.memory_space<vmem>>, vector<8x256xf32>
    tpu.vector_store %arg7[%c136_232, %c512_233], %250 {strides = array<i32>} : memref<256x1024xf32, #tpu.memory_space<vmem>>, vector<8x256xf32>,
    %c0_234 = arith.constant 0 : index
    %c7 = arith.constant 7 : index
    %c0_235 = arith.constant 0 : index
    %c0_236 = arith.constant 0 : index
    %260 = vector.load %arg5[%c0_234, %c7, %c0_235, %c0_236] : memref<1x11x8x256xf32, #tpu.memory_space<vmem>>, vector<1x1x8x256xf32>
    %261 = vector.shape_cast %260 : vector<1x1x8x256xf32> to vector<8x256xf32>
    %c1_i32_237 = arith.constant 1 : i32
    %262 = tpu.dynamic_rotate %261 by %c1_i32_237 dim 1 : vector<8x256xf32>, i32 -> vector<8x256xf32>
    %cst_238 = arith.constant 0.000000e+00 : f32
    %263 = vector.broadcast %cst_238 : f32 to vector<8x256xf32>
    %264 = arith.select %4, %262, %263 : vector<8x256xi1>, vector<8x256xf32>
    %c255_i32_239 = arith.constant 255 : i32
    %265 = tpu.dynamic_rotate %261 by %c255_i32_239 dim 1 : vector<8x256xf32>, i32 -> vector<8x256xf32>
    %cst_240 = arith.constant 0.000000e+00 : f32
    %266 = vector.broadcast %cst_240 : f32 to vector<8x256xf32>
    %267 = arith.select %6, %265, %266 : vector<8x256xi1>, vector<8x256xf32>
    %c16_i32_241 = arith.constant 16 : i32
    %268 = tpu.dynamic_rotate %264 by %c16_i32_241 dim 1 : vector<8x256xf32>, i32 -> vector<8x256xf32>
    %cst_242 = arith.constant 0.000000e+00 : f32
    %269 = vector.broadcast %cst_242 : f32 to vector<8x256xf32>
    %270 = arith.select %8, %268, %269 : vector<8x256xi1>, vector<8x256xf32>
    %c16_i32_243 = arith.constant 16 : i32
    %271 = tpu.dynamic_rotate %261 by %c16_i32_243 dim 1 : vector<8x256xf32>, i32 -> vector<8x256xf32>
    %cst_244 = arith.constant 0.000000e+00 : f32
    %272 = vector.broadcast %cst_244 : f32 to vector<8x256xf32>
    %273 = arith.select %8, %271, %272 : vector<8x256xi1>, vector<8x256xf32>
    %c16_i32_245 = arith.constant 16 : i32
    %274 = tpu.dynamic_rotate %267 by %c16_i32_245 dim 1 : vector<8x256xf32>, i32 -> vector<8x256xf32>
    %cst_246 = arith.constant 0.000000e+00 : f32
    %275 = vector.broadcast %cst_246 : f32 to vector<8x256xf32>
    %276 = arith.select %8, %274, %275 : vector<8x256xi1>, vector<8x256xf32>
    %c240_i32_247 = arith.constant 240 : i32
    %277 = tpu.dynamic_rotate %264 by %c240_i32_247 dim 1 : vector<8x256xf32>, i32 -> vector<8x256xf32>
    %cst_248 = arith.constant 0.000000e+00 : f32
    %278 = vector.broadcast %cst_248 : f32 to vector<8x256xf32>
    %279 = arith.select %10, %277, %278 : vector<8x256xi1>, vector<8x256xf32>
    %c240_i32_249 = arith.constant 240 : i32
    %280 = tpu.dynamic_rotate %261 by %c240_i32_249 dim 1 : vector<8x256xf32>, i32 -> vector<8x256xf32>
    %cst_250 = arith.constant 0.000000e+00 : f32
    %281 = vector.broadcast %cst_250 : f32 to vector<8x256xf32>
    %282 = arith.select %10, %280, %281 : vector<8x256xi1>, vector<8x256xf32>
    %c240_i32_251 = arith.constant 240 : i32
    %283 = tpu.dynamic_rotate %267 by %c240_i32_251 dim 1 : vector<8x256xf32>, i32 -> vector<8x256xf32>
    %cst_252 = arith.constant 0.000000e+00 : f32
    %284 = vector.broadcast %cst_252 : f32 to vector<8x256xf32>
    %285 = arith.select %10, %283, %284 : vector<8x256xi1>, vector<8x256xf32>
    %c144_253 = arith.constant 144 : index
    %c512_254 = arith.constant 512 : index
    %286 = vector.load %arg7[%c144_253, %c512_254] : memref<256x1024xf32, #tpu.memory_space<vmem>>, vector<8x256xf32>
    tpu.vector_store %arg7[%c144_253, %c512_254], %270 {strides = array<i32>} : memref<256x1024xf32, #tpu.memory_space<vmem>>, vector<8x256xf32>,
    %c152_255 = arith.constant 152 : index
    %c512_256 = arith.constant 512 : index
    %287 = vector.load %arg7[%c152_255, %c512_256] : memref<256x1024xf32, #tpu.memory_space<vmem>>, vector<8x256xf32>
    tpu.vector_store %arg7[%c152_255, %c512_256], %273 {strides = array<i32>} : memref<256x1024xf32, #tpu.memory_space<vmem>>, vector<8x256xf32>,
    %c160_257 = arith.constant 160 : index
    %c512_258 = arith.constant 512 : index
    %288 = vector.load %arg7[%c160_257, %c512_258] : memref<256x1024xf32, #tpu.memory_space<vmem>>, vector<8x256xf32>
    tpu.vector_store %arg7[%c160_257, %c512_258], %276 {strides = array<i32>} : memref<256x1024xf32, #tpu.memory_space<vmem>>, vector<8x256xf32>,
    %c168_259 = arith.constant 168 : index
    %c512_260 = arith.constant 512 : index
    %289 = vector.load %arg7[%c168_259, %c512_260] : memref<256x1024xf32, #tpu.memory_space<vmem>>, vector<8x256xf32>
    tpu.vector_store %arg7[%c168_259, %c512_260], %264 {strides = array<i32>} : memref<256x1024xf32, #tpu.memory_space<vmem>>, vector<8x256xf32>,
    %c176_261 = arith.constant 176 : index
    %c512_262 = arith.constant 512 : index
    %290 = vector.load %arg7[%c176_261, %c512_262] : memref<256x1024xf32, #tpu.memory_space<vmem>>, vector<8x256xf32>
    tpu.vector_store %arg7[%c176_261, %c512_262], %261 {strides = array<i32>} : memref<256x1024xf32, #tpu.memory_space<vmem>>, vector<8x256xf32>,
    %c184_263 = arith.constant 184 : index
    %c512_264 = arith.constant 512 : index
    %291 = vector.load %arg7[%c184_263, %c512_264] : memref<256x1024xf32, #tpu.memory_space<vmem>>, vector<8x256xf32>
    tpu.vector_store %arg7[%c184_263, %c512_264], %267 {strides = array<i32>} : memref<256x1024xf32, #tpu.memory_space<vmem>>, vector<8x256xf32>,
    %c192_265 = arith.constant 192 : index
    %c512_266 = arith.constant 512 : index
    %292 = vector.load %arg7[%c192_265, %c512_266] : memref<256x1024xf32, #tpu.memory_space<vmem>>, vector<8x256xf32>
    tpu.vector_store %arg7[%c192_265, %c512_266], %279 {strides = array<i32>} : memref<256x1024xf32, #tpu.memory_space<vmem>>, vector<8x256xf32>,
    %c200_267 = arith.constant 200 : index
    %c512_268 = arith.constant 512 : index
    %293 = vector.load %arg7[%c200_267, %c512_268] : memref<256x1024xf32, #tpu.memory_space<vmem>>, vector<8x256xf32>
    tpu.vector_store %arg7[%c200_267, %c512_268], %282 {strides = array<i32>} : memref<256x1024xf32, #tpu.memory_space<vmem>>, vector<8x256xf32>,
    %c208_269 = arith.constant 208 : index
    %c512_270 = arith.constant 512 : index
    %294 = vector.load %arg7[%c208_269, %c512_270] : memref<256x1024xf32, #tpu.memory_space<vmem>>, vector<8x256xf32>
    tpu.vector_store %arg7[%c208_269, %c512_270], %285 {strides = array<i32>} : memref<256x1024xf32, #tpu.memory_space<vmem>>, vector<8x256xf32>,
    %c0_271 = arith.constant 0 : index
    %c8_272 = arith.constant 8 : index
    %c0_273 = arith.constant 0 : index
    %c0_274 = arith.constant 0 : index
    %295 = vector.load %arg5[%c0_271, %c8_272, %c0_273, %c0_274] : memref<1x11x8x256xf32, #tpu.memory_space<vmem>>, vector<1x1x8x256xf32>
    %296 = vector.shape_cast %295 : vector<1x1x8x256xf32> to vector<8x256xf32>
    %c1_i32_275 = arith.constant 1 : i32
    %297 = tpu.dynamic_rotate %296 by %c1_i32_275 dim 1 : vector<8x256xf32>, i32 -> vector<8x256xf32>
    %cst_276 = arith.constant 0.000000e+00 : f32
    %298 = vector.broadcast %cst_276 : f32 to vector<8x256xf32>
    %299 = arith.select %4, %297, %298 : vector<8x256xi1>, vector<8x256xf32>
    %c255_i32_277 = arith.constant 255 : i32
    %300 = tpu.dynamic_rotate %296 by %c255_i32_277 dim 1 : vector<8x256xf32>, i32 -> vector<8x256xf32>
    %cst_278 = arith.constant 0.000000e+00 : f32
    %301 = vector.broadcast %cst_278 : f32 to vector<8x256xf32>
    %302 = arith.select %6, %300, %301 : vector<8x256xi1>, vector<8x256xf32>
    %c16_i32_279 = arith.constant 16 : i32
    %303 = tpu.dynamic_rotate %299 by %c16_i32_279 dim 1 : vector<8x256xf32>, i32 -> vector<8x256xf32>
    %cst_280 = arith.constant 0.000000e+00 : f32
    %304 = vector.broadcast %cst_280 : f32 to vector<8x256xf32>
    %305 = arith.select %8, %303, %304 : vector<8x256xi1>, vector<8x256xf32>
    %c16_i32_281 = arith.constant 16 : i32
    %306 = tpu.dynamic_rotate %296 by %c16_i32_281 dim 1 : vector<8x256xf32>, i32 -> vector<8x256xf32>
    %cst_282 = arith.constant 0.000000e+00 : f32
    %307 = vector.broadcast %cst_282 : f32 to vector<8x256xf32>
    %308 = arith.select %8, %306, %307 : vector<8x256xi1>, vector<8x256xf32>
    %c16_i32_283 = arith.constant 16 : i32
    %309 = tpu.dynamic_rotate %302 by %c16_i32_283 dim 1 : vector<8x256xf32>, i32 -> vector<8x256xf32>
    %cst_284 = arith.constant 0.000000e+00 : f32
    %310 = vector.broadcast %cst_284 : f32 to vector<8x256xf32>
    %311 = arith.select %8, %309, %310 : vector<8x256xi1>, vector<8x256xf32>
    %c240_i32_285 = arith.constant 240 : i32
    %312 = tpu.dynamic_rotate %299 by %c240_i32_285 dim 1 : vector<8x256xf32>, i32 -> vector<8x256xf32>
    %cst_286 = arith.constant 0.000000e+00 : f32
    %313 = vector.broadcast %cst_286 : f32 to vector<8x256xf32>
    %314 = arith.select %10, %312, %313 : vector<8x256xi1>, vector<8x256xf32>
    %c240_i32_287 = arith.constant 240 : i32
    %315 = tpu.dynamic_rotate %296 by %c240_i32_287 dim 1 : vector<8x256xf32>, i32 -> vector<8x256xf32>
    %cst_288 = arith.constant 0.000000e+00 : f32
    %316 = vector.broadcast %cst_288 : f32 to vector<8x256xf32>
    %317 = arith.select %10, %315, %316 : vector<8x256xi1>, vector<8x256xf32>
    %c240_i32_289 = arith.constant 240 : i32
    %318 = tpu.dynamic_rotate %302 by %c240_i32_289 dim 1 : vector<8x256xf32>, i32 -> vector<8x256xf32>
    %cst_290 = arith.constant 0.000000e+00 : f32
    %319 = vector.broadcast %cst_290 : f32 to vector<8x256xf32>
    %320 = arith.select %10, %318, %319 : vector<8x256xi1>, vector<8x256xf32>
    %c0_291 = arith.constant 0 : index
    %c768 = arith.constant 768 : index
    %321 = vector.load %arg7[%c0_291, %c768] : memref<256x1024xf32, #tpu.memory_space<vmem>>, vector<8x256xf32>
    tpu.vector_store %arg7[%c0_291, %c768], %305 {strides = array<i32>} : memref<256x1024xf32, #tpu.memory_space<vmem>>, vector<8x256xf32>,
    %c8_292 = arith.constant 8 : index
    %c768_293 = arith.constant 768 : index
    %322 = vector.load %arg7[%c8_292, %c768_293] : memref<256x1024xf32, #tpu.memory_space<vmem>>, vector<8x256xf32>
    tpu.vector_store %arg7[%c8_292, %c768_293], %308 {strides = array<i32>} : memref<256x1024xf32, #tpu.memory_space<vmem>>, vector<8x256xf32>,
    %c16_294 = arith.constant 16 : index
    %c768_295 = arith.constant 768 : index
    %323 = vector.load %arg7[%c16_294, %c768_295] : memref<256x1024xf32, #tpu.memory_space<vmem>>, vector<8x256xf32>
    tpu.vector_store %arg7[%c16_294, %c768_295], %311 {strides = array<i32>} : memref<256x1024xf32, #tpu.memory_space<vmem>>, vector<8x256xf32>,
    %c24_296 = arith.constant 24 : index
    %c768_297 = arith.constant 768 : index
    %324 = vector.load %arg7[%c24_296, %c768_297] : memref<256x1024xf32, #tpu.memory_space<vmem>>, vector<8x256xf32>
    tpu.vector_store %arg7[%c24_296, %c768_297], %299 {strides = array<i32>} : memref<256x1024xf32, #tpu.memory_space<vmem>>, vector<8x256xf32>,
    %c32_298 = arith.constant 32 : index
    %c768_299 = arith.constant 768 : index
    %325 = vector.load %arg7[%c32_298, %c768_299] : memref<256x1024xf32, #tpu.memory_space<vmem>>, vector<8x256xf32>
    tpu.vector_store %arg7[%c32_298, %c768_299], %296 {strides = array<i32>} : memref<256x1024xf32, #tpu.memory_space<vmem>>, vector<8x256xf32>,
    %c40_300 = arith.constant 40 : index
    %c768_301 = arith.constant 768 : index
    %326 = vector.load %arg7[%c40_300, %c768_301] : memref<256x1024xf32, #tpu.memory_space<vmem>>, vector<8x256xf32>
    tpu.vector_store %arg7[%c40_300, %c768_301], %302 {strides = array<i32>} : memref<256x1024xf32, #tpu.memory_space<vmem>>, vector<8x256xf32>,
    %c48_302 = arith.constant 48 : index
    %c768_303 = arith.constant 768 : index
    %327 = vector.load %arg7[%c48_302, %c768_303] : memref<256x1024xf32, #tpu.memory_space<vmem>>, vector<8x256xf32>
    tpu.vector_store %arg7[%c48_302, %c768_303], %314 {strides = array<i32>} : memref<256x1024xf32, #tpu.memory_space<vmem>>, vector<8x256xf32>,
    %c56_304 = arith.constant 56 : index
    %c768_305 = arith.constant 768 : index
    %328 = vector.load %arg7[%c56_304, %c768_305] : memref<256x1024xf32, #tpu.memory_space<vmem>>, vector<8x256xf32>
    tpu.vector_store %arg7[%c56_304, %c768_305], %317 {strides = array<i32>} : memref<256x1024xf32, #tpu.memory_space<vmem>>, vector<8x256xf32>,
    %c64_306 = arith.constant 64 : index
    %c768_307 = arith.constant 768 : index
    %329 = vector.load %arg7[%c64_306, %c768_307] : memref<256x1024xf32, #tpu.memory_space<vmem>>, vector<8x256xf32>
    tpu.vector_store %arg7[%c64_306, %c768_307], %320 {strides = array<i32>} : memref<256x1024xf32, #tpu.memory_space<vmem>>, vector<8x256xf32>,
    %c0_308 = arith.constant 0 : index
    %c9 = arith.constant 9 : index
    %c0_309 = arith.constant 0 : index
    %c0_310 = arith.constant 0 : index
    %330 = vector.load %arg5[%c0_308, %c9, %c0_309, %c0_310] : memref<1x11x8x256xf32, #tpu.memory_space<vmem>>, vector<1x1x8x256xf32>
    %331 = vector.shape_cast %330 : vector<1x1x8x256xf32> to vector<8x256xf32>
    %c1_i32_311 = arith.constant 1 : i32
    %332 = tpu.dynamic_rotate %331 by %c1_i32_311 dim 1 : vector<8x256xf32>, i32 -> vector<8x256xf32>
    %cst_312 = arith.constant 0.000000e+00 : f32
    %333 = vector.broadcast %cst_312 : f32 to vector<8x256xf32>
    %334 = arith.select %4, %332, %333 : vector<8x256xi1>, vector<8x256xf32>
    %c255_i32_313 = arith.constant 255 : i32
    %335 = tpu.dynamic_rotate %331 by %c255_i32_313 dim 1 : vector<8x256xf32>, i32 -> vector<8x256xf32>
    %cst_314 = arith.constant 0.000000e+00 : f32
    %336 = vector.broadcast %cst_314 : f32 to vector<8x256xf32>
    %337 = arith.select %6, %335, %336 : vector<8x256xi1>, vector<8x256xf32>
    %c16_i32_315 = arith.constant 16 : i32
    %338 = tpu.dynamic_rotate %334 by %c16_i32_315 dim 1 : vector<8x256xf32>, i32 -> vector<8x256xf32>
    %cst_316 = arith.constant 0.000000e+00 : f32
    %339 = vector.broadcast %cst_316 : f32 to vector<8x256xf32>
    %340 = arith.select %8, %338, %339 : vector<8x256xi1>, vector<8x256xf32>
    %c16_i32_317 = arith.constant 16 : i32
    %341 = tpu.dynamic_rotate %331 by %c16_i32_317 dim 1 : vector<8x256xf32>, i32 -> vector<8x256xf32>
    %cst_318 = arith.constant 0.000000e+00 : f32
    %342 = vector.broadcast %cst_318 : f32 to vector<8x256xf32>
    %343 = arith.select %8, %341, %342 : vector<8x256xi1>, vector<8x256xf32>
    %c16_i32_319 = arith.constant 16 : i32
    %344 = tpu.dynamic_rotate %337 by %c16_i32_319 dim 1 : vector<8x256xf32>, i32 -> vector<8x256xf32>
    %cst_320 = arith.constant 0.000000e+00 : f32
    %345 = vector.broadcast %cst_320 : f32 to vector<8x256xf32>
    %346 = arith.select %8, %344, %345 : vector<8x256xi1>, vector<8x256xf32>
    %c240_i32_321 = arith.constant 240 : i32
    %347 = tpu.dynamic_rotate %334 by %c240_i32_321 dim 1 : vector<8x256xf32>, i32 -> vector<8x256xf32>
    %cst_322 = arith.constant 0.000000e+00 : f32
    %348 = vector.broadcast %cst_322 : f32 to vector<8x256xf32>
    %349 = arith.select %10, %347, %348 : vector<8x256xi1>, vector<8x256xf32>
    %c240_i32_323 = arith.constant 240 : i32
    %350 = tpu.dynamic_rotate %331 by %c240_i32_323 dim 1 : vector<8x256xf32>, i32 -> vector<8x256xf32>
    %cst_324 = arith.constant 0.000000e+00 : f32
    %351 = vector.broadcast %cst_324 : f32 to vector<8x256xf32>
    %352 = arith.select %10, %350, %351 : vector<8x256xi1>, vector<8x256xf32>
    %c240_i32_325 = arith.constant 240 : i32
    %353 = tpu.dynamic_rotate %337 by %c240_i32_325 dim 1 : vector<8x256xf32>, i32 -> vector<8x256xf32>
    %cst_326 = arith.constant 0.000000e+00 : f32
    %354 = vector.broadcast %cst_326 : f32 to vector<8x256xf32>
    %355 = arith.select %10, %353, %354 : vector<8x256xi1>, vector<8x256xf32>
    %c72_327 = arith.constant 72 : index
    %c768_328 = arith.constant 768 : index
    %356 = vector.load %arg7[%c72_327, %c768_328] : memref<256x1024xf32, #tpu.memory_space<vmem>>, vector<8x256xf32>
    tpu.vector_store %arg7[%c72_327, %c768_328], %340 {strides = array<i32>} : memref<256x1024xf32, #tpu.memory_space<vmem>>, vector<8x256xf32>,
    %c80_329 = arith.constant 80 : index
    %c768_330 = arith.constant 768 : index
    %357 = vector.load %arg7[%c80_329, %c768_330] : memref<256x1024xf32, #tpu.memory_space<vmem>>, vector<8x256xf32>
    tpu.vector_store %arg7[%c80_329, %c768_330], %343 {strides = array<i32>} : memref<256x1024xf32, #tpu.memory_space<vmem>>, vector<8x256xf32>,
    %c88_331 = arith.constant 88 : index
    %c768_332 = arith.constant 768 : index
    %358 = vector.load %arg7[%c88_331, %c768_332] : memref<256x1024xf32, #tpu.memory_space<vmem>>, vector<8x256xf32>
    tpu.vector_store %arg7[%c88_331, %c768_332], %346 {strides = array<i32>} : memref<256x1024xf32, #tpu.memory_space<vmem>>, vector<8x256xf32>,
    %c96_333 = arith.constant 96 : index
    %c768_334 = arith.constant 768 : index
    %359 = vector.load %arg7[%c96_333, %c768_334] : memref<256x1024xf32, #tpu.memory_space<vmem>>, vector<8x256xf32>
    tpu.vector_store %arg7[%c96_333, %c768_334], %334 {strides = array<i32>} : memref<256x1024xf32, #tpu.memory_space<vmem>>, vector<8x256xf32>,
    %c104_335 = arith.constant 104 : index
    %c768_336 = arith.constant 768 : index
    %360 = vector.load %arg7[%c104_335, %c768_336] : memref<256x1024xf32, #tpu.memory_space<vmem>>, vector<8x256xf32>
    tpu.vector_store %arg7[%c104_335, %c768_336], %331 {strides = array<i32>} : memref<256x1024xf32, #tpu.memory_space<vmem>>, vector<8x256xf32>,
    %c112_337 = arith.constant 112 : index
    %c768_338 = arith.constant 768 : index
    %361 = vector.load %arg7[%c112_337, %c768_338] : memref<256x1024xf32, #tpu.memory_space<vmem>>, vector<8x256xf32>
    tpu.vector_store %arg7[%c112_337, %c768_338], %337 {strides = array<i32>} : memref<256x1024xf32, #tpu.memory_space<vmem>>, vector<8x256xf32>,
    %c120_339 = arith.constant 120 : index
    %c768_340 = arith.constant 768 : index
    %362 = vector.load %arg7[%c120_339, %c768_340] : memref<256x1024xf32, #tpu.memory_space<vmem>>, vector<8x256xf32>
    tpu.vector_store %arg7[%c120_339, %c768_340], %349 {strides = array<i32>} : memref<256x1024xf32, #tpu.memory_space<vmem>>, vector<8x256xf32>,
    %c128_341 = arith.constant 128 : index
    %c768_342 = arith.constant 768 : index
    %363 = vector.load %arg7[%c128_341, %c768_342] : memref<256x1024xf32, #tpu.memory_space<vmem>>, vector<8x256xf32>
    tpu.vector_store %arg7[%c128_341, %c768_342], %352 {strides = array<i32>} : memref<256x1024xf32, #tpu.memory_space<vmem>>, vector<8x256xf32>,
    %c136_343 = arith.constant 136 : index
    %c768_344 = arith.constant 768 : index
    %364 = vector.load %arg7[%c136_343, %c768_344] : memref<256x1024xf32, #tpu.memory_space<vmem>>, vector<8x256xf32>
    tpu.vector_store %arg7[%c136_343, %c768_344], %355 {strides = array<i32>} : memref<256x1024xf32, #tpu.memory_space<vmem>>, vector<8x256xf32>,
    %c0_345 = arith.constant 0 : index
    %c10 = arith.constant 10 : index
    %c0_346 = arith.constant 0 : index
    %c0_347 = arith.constant 0 : index
    %365 = vector.load %arg5[%c0_345, %c10, %c0_346, %c0_347] : memref<1x11x8x256xf32, #tpu.memory_space<vmem>>, vector<1x1x8x256xf32>
    %366 = vector.shape_cast %365 : vector<1x1x8x256xf32> to vector<8x256xf32>
    %c1_i32_348 = arith.constant 1 : i32
    %367 = tpu.dynamic_rotate %366 by %c1_i32_348 dim 1 : vector<8x256xf32>, i32 -> vector<8x256xf32>
    %cst_349 = arith.constant 0.000000e+00 : f32
    %368 = vector.broadcast %cst_349 : f32 to vector<8x256xf32>
    %369 = arith.select %4, %367, %368 : vector<8x256xi1>, vector<8x256xf32>
    %c255_i32_350 = arith.constant 255 : i32
    %370 = tpu.dynamic_rotate %366 by %c255_i32_350 dim 1 : vector<8x256xf32>, i32 -> vector<8x256xf32>
    %cst_351 = arith.constant 0.000000e+00 : f32
    %371 = vector.broadcast %cst_351 : f32 to vector<8x256xf32>
    %372 = arith.select %6, %370, %371 : vector<8x256xi1>, vector<8x256xf32>
    %c16_i32_352 = arith.constant 16 : i32
    %373 = tpu.dynamic_rotate %369 by %c16_i32_352 dim 1 : vector<8x256xf32>, i32 -> vector<8x256xf32>
    %cst_353 = arith.constant 0.000000e+00 : f32
    %374 = vector.broadcast %cst_353 : f32 to vector<8x256xf32>
    %375 = arith.select %8, %373, %374 : vector<8x256xi1>, vector<8x256xf32>
    %c16_i32_354 = arith.constant 16 : i32
    %376 = tpu.dynamic_rotate %366 by %c16_i32_354 dim 1 : vector<8x256xf32>, i32 -> vector<8x256xf32>
    %cst_355 = arith.constant 0.000000e+00 : f32
    %377 = vector.broadcast %cst_355 : f32 to vector<8x256xf32>
    %378 = arith.select %8, %376, %377 : vector<8x256xi1>, vector<8x256xf32>
    %c16_i32_356 = arith.constant 16 : i32
    %379 = tpu.dynamic_rotate %372 by %c16_i32_356 dim 1 : vector<8x256xf32>, i32 -> vector<8x256xf32>
    %cst_357 = arith.constant 0.000000e+00 : f32
    %380 = vector.broadcast %cst_357 : f32 to vector<8x256xf32>
    %381 = arith.select %8, %379, %380 : vector<8x256xi1>, vector<8x256xf32>
    %c240_i32_358 = arith.constant 240 : i32
    %382 = tpu.dynamic_rotate %369 by %c240_i32_358 dim 1 : vector<8x256xf32>, i32 -> vector<8x256xf32>
    %cst_359 = arith.constant 0.000000e+00 : f32
    %383 = vector.broadcast %cst_359 : f32 to vector<8x256xf32>
    %384 = arith.select %10, %382, %383 : vector<8x256xi1>, vector<8x256xf32>
    %c240_i32_360 = arith.constant 240 : i32
    %385 = tpu.dynamic_rotate %366 by %c240_i32_360 dim 1 : vector<8x256xf32>, i32 -> vector<8x256xf32>
    %cst_361 = arith.constant 0.000000e+00 : f32
    %386 = vector.broadcast %cst_361 : f32 to vector<8x256xf32>
    %387 = arith.select %10, %385, %386 : vector<8x256xi1>, vector<8x256xf32>
    %c240_i32_362 = arith.constant 240 : i32
    %388 = tpu.dynamic_rotate %372 by %c240_i32_362 dim 1 : vector<8x256xf32>, i32 -> vector<8x256xf32>
    %cst_363 = arith.constant 0.000000e+00 : f32
    %389 = vector.broadcast %cst_363 : f32 to vector<8x256xf32>
    %390 = arith.select %10, %388, %389 : vector<8x256xi1>, vector<8x256xf32>
    %c144_364 = arith.constant 144 : index
    %c768_365 = arith.constant 768 : index
    %391 = vector.load %arg7[%c144_364, %c768_365] : memref<256x1024xf32, #tpu.memory_space<vmem>>, vector<8x256xf32>
    tpu.vector_store %arg7[%c144_364, %c768_365], %375 {strides = array<i32>} : memref<256x1024xf32, #tpu.memory_space<vmem>>, vector<8x256xf32>,
    %c152_366 = arith.constant 152 : index
    %c768_367 = arith.constant 768 : index
    %392 = vector.load %arg7[%c152_366, %c768_367] : memref<256x1024xf32, #tpu.memory_space<vmem>>, vector<8x256xf32>
    tpu.vector_store %arg7[%c152_366, %c768_367], %378 {strides = array<i32>} : memref<256x1024xf32, #tpu.memory_space<vmem>>, vector<8x256xf32>,
    %c160_368 = arith.constant 160 : index
    %c768_369 = arith.constant 768 : index
    %393 = vector.load %arg7[%c160_368, %c768_369] : memref<256x1024xf32, #tpu.memory_space<vmem>>, vector<8x256xf32>
    tpu.vector_store %arg7[%c160_368, %c768_369], %381 {strides = array<i32>} : memref<256x1024xf32, #tpu.memory_space<vmem>>, vector<8x256xf32>,
    %c168_370 = arith.constant 168 : index
    %c768_371 = arith.constant 768 : index
    %394 = vector.load %arg7[%c168_370, %c768_371] : memref<256x1024xf32, #tpu.memory_space<vmem>>, vector<8x256xf32>
    tpu.vector_store %arg7[%c168_370, %c768_371], %369 {strides = array<i32>} : memref<256x1024xf32, #tpu.memory_space<vmem>>, vector<8x256xf32>,
    %c176_372 = arith.constant 176 : index
    %c768_373 = arith.constant 768 : index
    %395 = vector.load %arg7[%c176_372, %c768_373] : memref<256x1024xf32, #tpu.memory_space<vmem>>, vector<8x256xf32>
    tpu.vector_store %arg7[%c176_372, %c768_373], %366 {strides = array<i32>} : memref<256x1024xf32, #tpu.memory_space<vmem>>, vector<8x256xf32>,
    %c184_374 = arith.constant 184 : index
    %c768_375 = arith.constant 768 : index
    %396 = vector.load %arg7[%c184_374, %c768_375] : memref<256x1024xf32, #tpu.memory_space<vmem>>, vector<8x256xf32>
    tpu.vector_store %arg7[%c184_374, %c768_375], %372 {strides = array<i32>} : memref<256x1024xf32, #tpu.memory_space<vmem>>, vector<8x256xf32>,
    %c192_376 = arith.constant 192 : index
    %c768_377 = arith.constant 768 : index
    %397 = vector.load %arg7[%c192_376, %c768_377] : memref<256x1024xf32, #tpu.memory_space<vmem>>, vector<8x256xf32>
    tpu.vector_store %arg7[%c192_376, %c768_377], %384 {strides = array<i32>} : memref<256x1024xf32, #tpu.memory_space<vmem>>, vector<8x256xf32>,
    %c200_378 = arith.constant 200 : index
    %c768_379 = arith.constant 768 : index
    %398 = vector.load %arg7[%c200_378, %c768_379] : memref<256x1024xf32, #tpu.memory_space<vmem>>, vector<8x256xf32>
    tpu.vector_store %arg7[%c200_378, %c768_379], %387 {strides = array<i32>} : memref<256x1024xf32, #tpu.memory_space<vmem>>, vector<8x256xf32>,
    %c208_380 = arith.constant 208 : index
    %c768_381 = arith.constant 768 : index
    %399 = vector.load %arg7[%c208_380, %c768_381] : memref<256x1024xf32, #tpu.memory_space<vmem>>, vector<8x256xf32>
    tpu.vector_store %arg7[%c208_380, %c768_381], %390 {strides = array<i32>} : memref<256x1024xf32, #tpu.memory_space<vmem>>, vector<8x256xf32>,
    %c0_382 = arith.constant 0 : index
    %c0_383 = arith.constant 0 : index
    %400 = vector.load %arg1[%c0_382, %c0_383] : memref<8x256xf32, #tpu.memory_space<vmem>>, vector<8x256xf32>
    %c0_384 = arith.constant 0 : index
    %c0_385 = arith.constant 0 : index
    %401 = vector.load %arg7[%c0_384, %c0_385] : memref<256x1024xf32, #tpu.memory_space<vmem>>, vector<256x1024xf32>
    %cst_386 = arith.constant dense<0.000000e+00> : vector<8x1024xf32>
    %402 = tpu.matmul %400, %401, %cst_386 {dimension_numbers = #tpu.dot_dimension_numbers<[1], [0], [0], [1], [0, 0, 1, 1], [], []>} : vector<8x256xf32>, vector<256x1024xf32>, vector<8x1024xf32> -> vector<8x1024xf32>
    %c0_387 = arith.constant 0 : index
    %c0_388 = arith.constant 0 : index
    %403 = vector.load %arg2[%c0_387, %c0_388] : memref<8x1xf32, #tpu.memory_space<vmem>>, vector<8x1xf32>
    %404 = vector.broadcast %403 : vector<8x1xf32> to vector<8x1024xf32>
    %405 = arith.addf %402, %404 : vector<8x1024xf32>
    %cst_389 = arith.constant 0.000000e+00 : f32
    %406 = vector.broadcast %cst_389 : f32 to vector<8x1024xf32>
    %407 = arith.maximumf %405, %406 : vector<8x1024xf32>
    %408 = vector.extract_strided_slice %407 {offsets = [0, 0], sizes = [8, 256], strides = [1, 1]} : vector<8x1024xf32> to vector<8x256xf32>
    %409 = vector.extract_strided_slice %407 {offsets = [0, 256], sizes = [8, 256], strides = [1, 1]} : vector<8x1024xf32> to vector<8x256xf32>
    %410 = vector.extract_strided_slice %407 {offsets = [0, 512], sizes = [8, 256], strides = [1, 1]} : vector<8x1024xf32> to vector<8x256xf32>
    %411 = vector.extract_strided_slice %407 {offsets = [0, 768], sizes = [8, 256], strides = [1, 1]} : vector<8x1024xf32> to vector<8x256xf32>
    %c0_390 = arith.constant 0 : index
    %c0_391 = arith.constant 0 : index
    %412 = vector.load %arg7[%c0_390, %c0_391] : memref<256x1024xf32, #tpu.memory_space<vmem>>, vector<72x256xf32>
    tpu.vector_store %arg7[%c0_390, %c0_391], %11 {strides = array<i32>} : memref<256x1024xf32, #tpu.memory_space<vmem>>, vector<72x256xf32>,
    %c144_392 = arith.constant 144 : index
    %c256_393 = arith.constant 256 : index
    %413 = vector.load %arg7[%c144_392, %c256_393] : memref<256x1024xf32, #tpu.memory_space<vmem>>, vector<72x256xf32>
    tpu.vector_store %arg7[%c144_392, %c256_393], %11 {strides = array<i32>} : memref<256x1024xf32, #tpu.memory_space<vmem>>, vector<72x256xf32>,
    %c1_i32_394 = arith.constant 1 : i32
    %414 = tpu.dynamic_rotate %408 by %c1_i32_394 dim 1 : vector<8x256xf32>, i32 -> vector<8x256xf32>
    %cst_395 = arith.constant 0.000000e+00 : f32
    %415 = vector.broadcast %cst_395 : f32 to vector<8x256xf32>
    %416 = arith.select %4, %414, %415 : vector<8x256xi1>, vector<8x256xf32>
    %c255_i32_396 = arith.constant 255 : i32
    %417 = tpu.dynamic_rotate %408 by %c255_i32_396 dim 1 : vector<8x256xf32>, i32 -> vector<8x256xf32>
    %cst_397 = arith.constant 0.000000e+00 : f32
    %418 = vector.broadcast %cst_397 : f32 to vector<8x256xf32>
    %419 = arith.select %6, %417, %418 : vector<8x256xi1>, vector<8x256xf32>
    %c16_i32_398 = arith.constant 16 : i32
    %420 = tpu.dynamic_rotate %416 by %c16_i32_398 dim 1 : vector<8x256xf32>, i32 -> vector<8x256xf32>
    %cst_399 = arith.constant 0.000000e+00 : f32
    %421 = vector.broadcast %cst_399 : f32 to vector<8x256xf32>
    %422 = arith.select %8, %420, %421 : vector<8x256xi1>, vector<8x256xf32>
    %c16_i32_400 = arith.constant 16 : i32
    %423 = tpu.dynamic_rotate %408 by %c16_i32_400 dim 1 : vector<8x256xf32>, i32 -> vector<8x256xf32>
    %cst_401 = arith.constant 0.000000e+00 : f32
    %424 = vector.broadcast %cst_401 : f32 to vector<8x256xf32>
    %425 = arith.select %8, %423, %424 : vector<8x256xi1>, vector<8x256xf32>
    %c16_i32_402 = arith.constant 16 : i32
    %426 = tpu.dynamic_rotate %419 by %c16_i32_402 dim 1 : vector<8x256xf32>, i32 -> vector<8x256xf32>
    %cst_403 = arith.constant 0.000000e+00 : f32
    %427 = vector.broadcast %cst_403 : f32 to vector<8x256xf32>
    %428 = arith.select %8, %426, %427 : vector<8x256xi1>, vector<8x256xf32>
    %c240_i32_404 = arith.constant 240 : i32
    %429 = tpu.dynamic_rotate %416 by %c240_i32_404 dim 1 : vector<8x256xf32>, i32 -> vector<8x256xf32>
    %cst_405 = arith.constant 0.000000e+00 : f32
    %430 = vector.broadcast %cst_405 : f32 to vector<8x256xf32>
    %431 = arith.select %10, %429, %430 : vector<8x256xi1>, vector<8x256xf32>
    %c240_i32_406 = arith.constant 240 : i32
    %432 = tpu.dynamic_rotate %408 by %c240_i32_406 dim 1 : vector<8x256xf32>, i32 -> vector<8x256xf32>
    %cst_407 = arith.constant 0.000000e+00 : f32
    %433 = vector.broadcast %cst_407 : f32 to vector<8x256xf32>
    %434 = arith.select %10, %432, %433 : vector<8x256xi1>, vector<8x256xf32>
    %c240_i32_408 = arith.constant 240 : i32
    %435 = tpu.dynamic_rotate %419 by %c240_i32_408 dim 1 : vector<8x256xf32>, i32 -> vector<8x256xf32>
    %cst_409 = arith.constant 0.000000e+00 : f32
    %436 = vector.broadcast %cst_409 : f32 to vector<8x256xf32>
    %437 = arith.select %10, %435, %436 : vector<8x256xi1>, vector<8x256xf32>
    %c72_410 = arith.constant 72 : index
    %c0_411 = arith.constant 0 : index
    %438 = vector.load %arg7[%c72_410, %c0_411] : memref<256x1024xf32, #tpu.memory_space<vmem>>, vector<8x256xf32>
    tpu.vector_store %arg7[%c72_410, %c0_411], %422 {strides = array<i32>} : memref<256x1024xf32, #tpu.memory_space<vmem>>, vector<8x256xf32>,
    %c80_412 = arith.constant 80 : index
    %c0_413 = arith.constant 0 : index
    %439 = vector.load %arg7[%c80_412, %c0_413] : memref<256x1024xf32, #tpu.memory_space<vmem>>, vector<8x256xf32>
    tpu.vector_store %arg7[%c80_412, %c0_413], %425 {strides = array<i32>} : memref<256x1024xf32, #tpu.memory_space<vmem>>, vector<8x256xf32>,
    %c88_414 = arith.constant 88 : index
    %c0_415 = arith.constant 0 : index
    %440 = vector.load %arg7[%c88_414, %c0_415] : memref<256x1024xf32, #tpu.memory_space<vmem>>, vector<8x256xf32>
    tpu.vector_store %arg7[%c88_414, %c0_415], %428 {strides = array<i32>} : memref<256x1024xf32, #tpu.memory_space<vmem>>, vector<8x256xf32>,
    %c96_416 = arith.constant 96 : index
    %c0_417 = arith.constant 0 : index
    %441 = vector.load %arg7[%c96_416, %c0_417] : memref<256x1024xf32, #tpu.memory_space<vmem>>, vector<8x256xf32>
    tpu.vector_store %arg7[%c96_416, %c0_417], %416 {strides = array<i32>} : memref<256x1024xf32, #tpu.memory_space<vmem>>, vector<8x256xf32>,
    %c104_418 = arith.constant 104 : index
    %c0_419 = arith.constant 0 : index
    %442 = vector.load %arg7[%c104_418, %c0_419] : memref<256x1024xf32, #tpu.memory_space<vmem>>, vector<8x256xf32>
    tpu.vector_store %arg7[%c104_418, %c0_419], %408 {strides = array<i32>} : memref<256x1024xf32, #tpu.memory_space<vmem>>, vector<8x256xf32>,
    %c112_420 = arith.constant 112 : index
    %c0_421 = arith.constant 0 : index
    %443 = vector.load %arg7[%c112_420, %c0_421] : memref<256x1024xf32, #tpu.memory_space<vmem>>, vector<8x256xf32>
    tpu.vector_store %arg7[%c112_420, %c0_421], %419 {strides = array<i32>} : memref<256x1024xf32, #tpu.memory_space<vmem>>, vector<8x256xf32>,
    %c120_422 = arith.constant 120 : index
    %c0_423 = arith.constant 0 : index
    %444 = vector.load %arg7[%c120_422, %c0_423] : memref<256x1024xf32, #tpu.memory_space<vmem>>, vector<8x256xf32>
    tpu.vector_store %arg7[%c120_422, %c0_423], %431 {strides = array<i32>} : memref<256x1024xf32, #tpu.memory_space<vmem>>, vector<8x256xf32>,
    %c128_424 = arith.constant 128 : index
    %c0_425 = arith.constant 0 : index
    %445 = vector.load %arg7[%c128_424, %c0_425] : memref<256x1024xf32, #tpu.memory_space<vmem>>, vector<8x256xf32>
    tpu.vector_store %arg7[%c128_424, %c0_425], %434 {strides = array<i32>} : memref<256x1024xf32, #tpu.memory_space<vmem>>, vector<8x256xf32>,
    %c136_426 = arith.constant 136 : index
    %c0_427 = arith.constant 0 : index
    %446 = vector.load %arg7[%c136_426, %c0_427] : memref<256x1024xf32, #tpu.memory_space<vmem>>, vector<8x256xf32>
    tpu.vector_store %arg7[%c136_426, %c0_427], %437 {strides = array<i32>} : memref<256x1024xf32, #tpu.memory_space<vmem>>, vector<8x256xf32>,
    %c1_i32_428 = arith.constant 1 : i32
    %447 = tpu.dynamic_rotate %409 by %c1_i32_428 dim 1 : vector<8x256xf32>, i32 -> vector<8x256xf32>
    %cst_429 = arith.constant 0.000000e+00 : f32
    %448 = vector.broadcast %cst_429 : f32 to vector<8x256xf32>
    %449 = arith.select %4, %447, %448 : vector<8x256xi1>, vector<8x256xf32>
    %c255_i32_430 = arith.constant 255 : i32
    %450 = tpu.dynamic_rotate %409 by %c255_i32_430 dim 1 : vector<8x256xf32>, i32 -> vector<8x256xf32>
    %cst_431 = arith.constant 0.000000e+00 : f32
    %451 = vector.broadcast %cst_431 : f32 to vector<8x256xf32>
    %452 = arith.select %6, %450, %451 : vector<8x256xi1>, vector<8x256xf32>
    %c16_i32_432 = arith.constant 16 : i32
    %453 = tpu.dynamic_rotate %449 by %c16_i32_432 dim 1 : vector<8x256xf32>, i32 -> vector<8x256xf32>
    %cst_433 = arith.constant 0.000000e+00 : f32
    %454 = vector.broadcast %cst_433 : f32 to vector<8x256xf32>
    %455 = arith.select %8, %453, %454 : vector<8x256xi1>, vector<8x256xf32>
    %c16_i32_434 = arith.constant 16 : i32
    %456 = tpu.dynamic_rotate %409 by %c16_i32_434 dim 1 : vector<8x256xf32>, i32 -> vector<8x256xf32>
    %cst_435 = arith.constant 0.000000e+00 : f32
    %457 = vector.broadcast %cst_435 : f32 to vector<8x256xf32>
    %458 = arith.select %8, %456, %457 : vector<8x256xi1>, vector<8x256xf32>
    %c16_i32_436 = arith.constant 16 : i32
    %459 = tpu.dynamic_rotate %452 by %c16_i32_436 dim 1 : vector<8x256xf32>, i32 -> vector<8x256xf32>
    %cst_437 = arith.constant 0.000000e+00 : f32
    %460 = vector.broadcast %cst_437 : f32 to vector<8x256xf32>
    %461 = arith.select %8, %459, %460 : vector<8x256xi1>, vector<8x256xf32>
    %c240_i32_438 = arith.constant 240 : i32
    %462 = tpu.dynamic_rotate %449 by %c240_i32_438 dim 1 : vector<8x256xf32>, i32 -> vector<8x256xf32>
    %cst_439 = arith.constant 0.000000e+00 : f32
    %463 = vector.broadcast %cst_439 : f32 to vector<8x256xf32>
    %464 = arith.select %10, %462, %463 : vector<8x256xi1>, vector<8x256xf32>
    %c240_i32_440 = arith.constant 240 : i32
    %465 = tpu.dynamic_rotate %409 by %c240_i32_440 dim 1 : vector<8x256xf32>, i32 -> vector<8x256xf32>
    %cst_441 = arith.constant 0.000000e+00 : f32
    %466 = vector.broadcast %cst_441 : f32 to vector<8x256xf32>
    %467 = arith.select %10, %465, %466 : vector<8x256xi1>, vector<8x256xf32>
    %c240_i32_442 = arith.constant 240 : i32
    %468 = tpu.dynamic_rotate %452 by %c240_i32_442 dim 1 : vector<8x256xf32>, i32 -> vector<8x256xf32>
    %cst_443 = arith.constant 0.000000e+00 : f32
    %469 = vector.broadcast %cst_443 : f32 to vector<8x256xf32>
    %470 = arith.select %10, %468, %469 : vector<8x256xi1>, vector<8x256xf32>
    %c144_444 = arith.constant 144 : index
    %c0_445 = arith.constant 0 : index
    %471 = vector.load %arg7[%c144_444, %c0_445] : memref<256x1024xf32, #tpu.memory_space<vmem>>, vector<8x256xf32>
    tpu.vector_store %arg7[%c144_444, %c0_445], %455 {strides = array<i32>} : memref<256x1024xf32, #tpu.memory_space<vmem>>, vector<8x256xf32>,
    %c152_446 = arith.constant 152 : index
    %c0_447 = arith.constant 0 : index
    %472 = vector.load %arg7[%c152_446, %c0_447] : memref<256x1024xf32, #tpu.memory_space<vmem>>, vector<8x256xf32>
    tpu.vector_store %arg7[%c152_446, %c0_447], %458 {strides = array<i32>} : memref<256x1024xf32, #tpu.memory_space<vmem>>, vector<8x256xf32>,
    %c160_448 = arith.constant 160 : index
    %c0_449 = arith.constant 0 : index
    %473 = vector.load %arg7[%c160_448, %c0_449] : memref<256x1024xf32, #tpu.memory_space<vmem>>, vector<8x256xf32>
    tpu.vector_store %arg7[%c160_448, %c0_449], %461 {strides = array<i32>} : memref<256x1024xf32, #tpu.memory_space<vmem>>, vector<8x256xf32>,
    %c168_450 = arith.constant 168 : index
    %c0_451 = arith.constant 0 : index
    %474 = vector.load %arg7[%c168_450, %c0_451] : memref<256x1024xf32, #tpu.memory_space<vmem>>, vector<8x256xf32>
    tpu.vector_store %arg7[%c168_450, %c0_451], %449 {strides = array<i32>} : memref<256x1024xf32, #tpu.memory_space<vmem>>, vector<8x256xf32>,
    %c176_452 = arith.constant 176 : index
    %c0_453 = arith.constant 0 : index
    %475 = vector.load %arg7[%c176_452, %c0_453] : memref<256x1024xf32, #tpu.memory_space<vmem>>, vector<8x256xf32>
    tpu.vector_store %arg7[%c176_452, %c0_453], %409 {strides = array<i32>} : memref<256x1024xf32, #tpu.memory_space<vmem>>, vector<8x256xf32>,
    %c184_454 = arith.constant 184 : index
    %c0_455 = arith.constant 0 : index
    %476 = vector.load %arg7[%c184_454, %c0_455] : memref<256x1024xf32, #tpu.memory_space<vmem>>, vector<8x256xf32>
    tpu.vector_store %arg7[%c184_454, %c0_455], %452 {strides = array<i32>} : memref<256x1024xf32, #tpu.memory_space<vmem>>, vector<8x256xf32>,
    %c192_456 = arith.constant 192 : index
    %c0_457 = arith.constant 0 : index
    %477 = vector.load %arg7[%c192_456, %c0_457] : memref<256x1024xf32, #tpu.memory_space<vmem>>, vector<8x256xf32>
    tpu.vector_store %arg7[%c192_456, %c0_457], %464 {strides = array<i32>} : memref<256x1024xf32, #tpu.memory_space<vmem>>, vector<8x256xf32>,
    %c200_458 = arith.constant 200 : index
    %c0_459 = arith.constant 0 : index
    %478 = vector.load %arg7[%c200_458, %c0_459] : memref<256x1024xf32, #tpu.memory_space<vmem>>, vector<8x256xf32>
    tpu.vector_store %arg7[%c200_458, %c0_459], %467 {strides = array<i32>} : memref<256x1024xf32, #tpu.memory_space<vmem>>, vector<8x256xf32>,
    %c208_460 = arith.constant 208 : index
    %c0_461 = arith.constant 0 : index
    %479 = vector.load %arg7[%c208_460, %c0_461] : memref<256x1024xf32, #tpu.memory_space<vmem>>, vector<8x256xf32>
    tpu.vector_store %arg7[%c208_460, %c0_461], %470 {strides = array<i32>} : memref<256x1024xf32, #tpu.memory_space<vmem>>, vector<8x256xf32>,
    %c1_i32_462 = arith.constant 1 : i32
    %480 = tpu.dynamic_rotate %410 by %c1_i32_462 dim 1 : vector<8x256xf32>, i32 -> vector<8x256xf32>
    %cst_463 = arith.constant 0.000000e+00 : f32
    %481 = vector.broadcast %cst_463 : f32 to vector<8x256xf32>
    %482 = arith.select %4, %480, %481 : vector<8x256xi1>, vector<8x256xf32>
    %c255_i32_464 = arith.constant 255 : i32
    %483 = tpu.dynamic_rotate %410 by %c255_i32_464 dim 1 : vector<8x256xf32>, i32 -> vector<8x256xf32>
    %cst_465 = arith.constant 0.000000e+00 : f32
    %484 = vector.broadcast %cst_465 : f32 to vector<8x256xf32>
    %485 = arith.select %6, %483, %484 : vector<8x256xi1>, vector<8x256xf32>
    %c16_i32_466 = arith.constant 16 : i32
    %486 = tpu.dynamic_rotate %482 by %c16_i32_466 dim 1 : vector<8x256xf32>, i32 -> vector<8x256xf32>
    %cst_467 = arith.constant 0.000000e+00 : f32
    %487 = vector.broadcast %cst_467 : f32 to vector<8x256xf32>
    %488 = arith.select %8, %486, %487 : vector<8x256xi1>, vector<8x256xf32>
    %c16_i32_468 = arith.constant 16 : i32
    %489 = tpu.dynamic_rotate %410 by %c16_i32_468 dim 1 : vector<8x256xf32>, i32 -> vector<8x256xf32>
    %cst_469 = arith.constant 0.000000e+00 : f32
    %490 = vector.broadcast %cst_469 : f32 to vector<8x256xf32>
    %491 = arith.select %8, %489, %490 : vector<8x256xi1>, vector<8x256xf32>
    %c16_i32_470 = arith.constant 16 : i32
    %492 = tpu.dynamic_rotate %485 by %c16_i32_470 dim 1 : vector<8x256xf32>, i32 -> vector<8x256xf32>
    %cst_471 = arith.constant 0.000000e+00 : f32
    %493 = vector.broadcast %cst_471 : f32 to vector<8x256xf32>
    %494 = arith.select %8, %492, %493 : vector<8x256xi1>, vector<8x256xf32>
    %c240_i32_472 = arith.constant 240 : i32
    %495 = tpu.dynamic_rotate %482 by %c240_i32_472 dim 1 : vector<8x256xf32>, i32 -> vector<8x256xf32>
    %cst_473 = arith.constant 0.000000e+00 : f32
    %496 = vector.broadcast %cst_473 : f32 to vector<8x256xf32>
    %497 = arith.select %10, %495, %496 : vector<8x256xi1>, vector<8x256xf32>
    %c240_i32_474 = arith.constant 240 : i32
    %498 = tpu.dynamic_rotate %410 by %c240_i32_474 dim 1 : vector<8x256xf32>, i32 -> vector<8x256xf32>
    %cst_475 = arith.constant 0.000000e+00 : f32
    %499 = vector.broadcast %cst_475 : f32 to vector<8x256xf32>
    %500 = arith.select %10, %498, %499 : vector<8x256xi1>, vector<8x256xf32>
    %c240_i32_476 = arith.constant 240 : i32
    %501 = tpu.dynamic_rotate %485 by %c240_i32_476 dim 1 : vector<8x256xf32>, i32 -> vector<8x256xf32>
    %cst_477 = arith.constant 0.000000e+00 : f32
    %502 = vector.broadcast %cst_477 : f32 to vector<8x256xf32>
    %503 = arith.select %10, %501, %502 : vector<8x256xi1>, vector<8x256xf32>
    %c0_478 = arith.constant 0 : index
    %c256_479 = arith.constant 256 : index
    %504 = vector.load %arg7[%c0_478, %c256_479] : memref<256x1024xf32, #tpu.memory_space<vmem>>, vector<8x256xf32>
    tpu.vector_store %arg7[%c0_478, %c256_479], %488 {strides = array<i32>} : memref<256x1024xf32, #tpu.memory_space<vmem>>, vector<8x256xf32>,
    %c8_480 = arith.constant 8 : index
    %c256_481 = arith.constant 256 : index
    %505 = vector.load %arg7[%c8_480, %c256_481] : memref<256x1024xf32, #tpu.memory_space<vmem>>, vector<8x256xf32>
    tpu.vector_store %arg7[%c8_480, %c256_481], %491 {strides = array<i32>} : memref<256x1024xf32, #tpu.memory_space<vmem>>, vector<8x256xf32>,
    %c16_482 = arith.constant 16 : index
    %c256_483 = arith.constant 256 : index
    %506 = vector.load %arg7[%c16_482, %c256_483] : memref<256x1024xf32, #tpu.memory_space<vmem>>, vector<8x256xf32>
    tpu.vector_store %arg7[%c16_482, %c256_483], %494 {strides = array<i32>} : memref<256x1024xf32, #tpu.memory_space<vmem>>, vector<8x256xf32>,
    %c24_484 = arith.constant 24 : index
    %c256_485 = arith.constant 256 : index
    %507 = vector.load %arg7[%c24_484, %c256_485] : memref<256x1024xf32, #tpu.memory_space<vmem>>, vector<8x256xf32>
    tpu.vector_store %arg7[%c24_484, %c256_485], %482 {strides = array<i32>} : memref<256x1024xf32, #tpu.memory_space<vmem>>, vector<8x256xf32>,
    %c32_486 = arith.constant 32 : index
    %c256_487 = arith.constant 256 : index
    %508 = vector.load %arg7[%c32_486, %c256_487] : memref<256x1024xf32, #tpu.memory_space<vmem>>, vector<8x256xf32>
    tpu.vector_store %arg7[%c32_486, %c256_487], %410 {strides = array<i32>} : memref<256x1024xf32, #tpu.memory_space<vmem>>, vector<8x256xf32>,
    %c40_488 = arith.constant 40 : index
    %c256_489 = arith.constant 256 : index
    %509 = vector.load %arg7[%c40_488, %c256_489] : memref<256x1024xf32, #tpu.memory_space<vmem>>, vector<8x256xf32>
    tpu.vector_store %arg7[%c40_488, %c256_489], %485 {strides = array<i32>} : memref<256x1024xf32, #tpu.memory_space<vmem>>, vector<8x256xf32>,
    %c48_490 = arith.constant 48 : index
    %c256_491 = arith.constant 256 : index
    %510 = vector.load %arg7[%c48_490, %c256_491] : memref<256x1024xf32, #tpu.memory_space<vmem>>, vector<8x256xf32>
    tpu.vector_store %arg7[%c48_490, %c256_491], %497 {strides = array<i32>} : memref<256x1024xf32, #tpu.memory_space<vmem>>, vector<8x256xf32>,
    %c56_492 = arith.constant 56 : index
    %c256_493 = arith.constant 256 : index
    %511 = vector.load %arg7[%c56_492, %c256_493] : memref<256x1024xf32, #tpu.memory_space<vmem>>, vector<8x256xf32>
    tpu.vector_store %arg7[%c56_492, %c256_493], %500 {strides = array<i32>} : memref<256x1024xf32, #tpu.memory_space<vmem>>, vector<8x256xf32>,
    %c64_494 = arith.constant 64 : index
    %c256_495 = arith.constant 256 : index
    %512 = vector.load %arg7[%c64_494, %c256_495] : memref<256x1024xf32, #tpu.memory_space<vmem>>, vector<8x256xf32>
    tpu.vector_store %arg7[%c64_494, %c256_495], %503 {strides = array<i32>} : memref<256x1024xf32, #tpu.memory_space<vmem>>, vector<8x256xf32>,
    %c1_i32_496 = arith.constant 1 : i32
    %513 = tpu.dynamic_rotate %411 by %c1_i32_496 dim 1 : vector<8x256xf32>, i32 -> vector<8x256xf32>
    %cst_497 = arith.constant 0.000000e+00 : f32
    %514 = vector.broadcast %cst_497 : f32 to vector<8x256xf32>
    %515 = arith.select %4, %513, %514 : vector<8x256xi1>, vector<8x256xf32>
    %c255_i32_498 = arith.constant 255 : i32
    %516 = tpu.dynamic_rotate %411 by %c255_i32_498 dim 1 : vector<8x256xf32>, i32 -> vector<8x256xf32>
    %cst_499 = arith.constant 0.000000e+00 : f32
    %517 = vector.broadcast %cst_499 : f32 to vector<8x256xf32>
    %518 = arith.select %6, %516, %517 : vector<8x256xi1>, vector<8x256xf32>
    %c16_i32_500 = arith.constant 16 : i32
    %519 = tpu.dynamic_rotate %515 by %c16_i32_500 dim 1 : vector<8x256xf32>, i32 -> vector<8x256xf32>
    %cst_501 = arith.constant 0.000000e+00 : f32
    %520 = vector.broadcast %cst_501 : f32 to vector<8x256xf32>
    %521 = arith.select %8, %519, %520 : vector<8x256xi1>, vector<8x256xf32>
    %c16_i32_502 = arith.constant 16 : i32
    %522 = tpu.dynamic_rotate %411 by %c16_i32_502 dim 1 : vector<8x256xf32>, i32 -> vector<8x256xf32>
    %cst_503 = arith.constant 0.000000e+00 : f32
    %523 = vector.broadcast %cst_503 : f32 to vector<8x256xf32>
    %524 = arith.select %8, %522, %523 : vector<8x256xi1>, vector<8x256xf32>
    %c16_i32_504 = arith.constant 16 : i32
    %525 = tpu.dynamic_rotate %518 by %c16_i32_504 dim 1 : vector<8x256xf32>, i32 -> vector<8x256xf32>
    %cst_505 = arith.constant 0.000000e+00 : f32
    %526 = vector.broadcast %cst_505 : f32 to vector<8x256xf32>
    %527 = arith.select %8, %525, %526 : vector<8x256xi1>, vector<8x256xf32>
    %c240_i32_506 = arith.constant 240 : i32
    %528 = tpu.dynamic_rotate %515 by %c240_i32_506 dim 1 : vector<8x256xf32>, i32 -> vector<8x256xf32>
    %cst_507 = arith.constant 0.000000e+00 : f32
    %529 = vector.broadcast %cst_507 : f32 to vector<8x256xf32>
    %530 = arith.select %10, %528, %529 : vector<8x256xi1>, vector<8x256xf32>
    %c240_i32_508 = arith.constant 240 : i32
    %531 = tpu.dynamic_rotate %411 by %c240_i32_508 dim 1 : vector<8x256xf32>, i32 -> vector<8x256xf32>
    %cst_509 = arith.constant 0.000000e+00 : f32
    %532 = vector.broadcast %cst_509 : f32 to vector<8x256xf32>
    %533 = arith.select %10, %531, %532 : vector<8x256xi1>, vector<8x256xf32>
    %c240_i32_510 = arith.constant 240 : i32
    %534 = tpu.dynamic_rotate %518 by %c240_i32_510 dim 1 : vector<8x256xf32>, i32 -> vector<8x256xf32>
    %cst_511 = arith.constant 0.000000e+00 : f32
    %535 = vector.broadcast %cst_511 : f32 to vector<8x256xf32>
    %536 = arith.select %10, %534, %535 : vector<8x256xi1>, vector<8x256xf32>
    %c72_512 = arith.constant 72 : index
    %c256_513 = arith.constant 256 : index
    %537 = vector.load %arg7[%c72_512, %c256_513] : memref<256x1024xf32, #tpu.memory_space<vmem>>, vector<8x256xf32>
    tpu.vector_store %arg7[%c72_512, %c256_513], %521 {strides = array<i32>} : memref<256x1024xf32, #tpu.memory_space<vmem>>, vector<8x256xf32>,
    %c80_514 = arith.constant 80 : index
    %c256_515 = arith.constant 256 : index
    %538 = vector.load %arg7[%c80_514, %c256_515] : memref<256x1024xf32, #tpu.memory_space<vmem>>, vector<8x256xf32>
    tpu.vector_store %arg7[%c80_514, %c256_515], %524 {strides = array<i32>} : memref<256x1024xf32, #tpu.memory_space<vmem>>, vector<8x256xf32>,
    %c88_516 = arith.constant 88 : index
    %c256_517 = arith.constant 256 : index
    %539 = vector.load %arg7[%c88_516, %c256_517] : memref<256x1024xf32, #tpu.memory_space<vmem>>, vector<8x256xf32>
    tpu.vector_store %arg7[%c88_516, %c256_517], %527 {strides = array<i32>} : memref<256x1024xf32, #tpu.memory_space<vmem>>, vector<8x256xf32>,
    %c96_518 = arith.constant 96 : index
    %c256_519 = arith.constant 256 : index
    %540 = vector.load %arg7[%c96_518, %c256_519] : memref<256x1024xf32, #tpu.memory_space<vmem>>, vector<8x256xf32>
    tpu.vector_store %arg7[%c96_518, %c256_519], %515 {strides = array<i32>} : memref<256x1024xf32, #tpu.memory_space<vmem>>, vector<8x256xf32>,
    %c104_520 = arith.constant 104 : index
    %c256_521 = arith.constant 256 : index
    %541 = vector.load %arg7[%c104_520, %c256_521] : memref<256x1024xf32, #tpu.memory_space<vmem>>, vector<8x256xf32>
    tpu.vector_store %arg7[%c104_520, %c256_521], %411 {strides = array<i32>} : memref<256x1024xf32, #tpu.memory_space<vmem>>, vector<8x256xf32>,
    %c112_522 = arith.constant 112 : index
    %c256_523 = arith.constant 256 : index
    %542 = vector.load %arg7[%c112_522, %c256_523] : memref<256x1024xf32, #tpu.memory_space<vmem>>, vector<8x256xf32>
    tpu.vector_store %arg7[%c112_522, %c256_523], %518 {strides = array<i32>} : memref<256x1024xf32, #tpu.memory_space<vmem>>, vector<8x256xf32>,
    %c120_524 = arith.constant 120 : index
    %c256_525 = arith.constant 256 : index
    %543 = vector.load %arg7[%c120_524, %c256_525] : memref<256x1024xf32, #tpu.memory_space<vmem>>, vector<8x256xf32>
    tpu.vector_store %arg7[%c120_524, %c256_525], %530 {strides = array<i32>} : memref<256x1024xf32, #tpu.memory_space<vmem>>, vector<8x256xf32>,
    %c128_526 = arith.constant 128 : index
    %c256_527 = arith.constant 256 : index
    %544 = vector.load %arg7[%c128_526, %c256_527] : memref<256x1024xf32, #tpu.memory_space<vmem>>, vector<8x256xf32>
    tpu.vector_store %arg7[%c128_526, %c256_527], %533 {strides = array<i32>} : memref<256x1024xf32, #tpu.memory_space<vmem>>, vector<8x256xf32>,
    %c136_528 = arith.constant 136 : index
    %c256_529 = arith.constant 256 : index
    %545 = vector.load %arg7[%c136_528, %c256_529] : memref<256x1024xf32, #tpu.memory_space<vmem>>, vector<8x256xf32>
    tpu.vector_store %arg7[%c136_528, %c256_529], %536 {strides = array<i32>} : memref<256x1024xf32, #tpu.memory_space<vmem>>, vector<8x256xf32>,
    %c0_530 = arith.constant 0 : index
    %c0_531 = arith.constant 0 : index
    %546 = vector.load %arg3[%c0_530, %c0_531] : memref<8x256xf32, #tpu.memory_space<vmem>>, vector<8x256xf32>
    %c0_532 = arith.constant 0 : index
    %c0_533 = arith.constant 0 : index
    %547 = vector.load %arg7[%c0_532, %c0_533] : memref<256x1024xf32, #tpu.memory_space<vmem>>, vector<256x512xf32>
    %cst_534 = arith.constant dense<0.000000e+00> : vector<8x512xf32>
    %548 = tpu.matmul %546, %547, %cst_534 {dimension_numbers = #tpu.dot_dimension_numbers<[1], [0], [0], [1], [0, 0, 1, 1], [], []>} : vector<8x256xf32>, vector<256x512xf32>, vector<8x512xf32> -> vector<8x512xf32>
    %c0_535 = arith.constant 0 : index
    %c0_536 = arith.constant 0 : index
    %549 = vector.load %arg4[%c0_535, %c0_536] : memref<8x1xf32, #tpu.memory_space<vmem>>, vector<8x1xf32>
    %550 = vector.broadcast %549 : vector<8x1xf32> to vector<8x512xf32>
    %551 = arith.addf %548, %550 : vector<8x512xf32>
    %cst_537 = arith.constant 0.000000e+00 : f32
    %552 = vector.broadcast %cst_537 : f32 to vector<8x512xf32>
    %553 = arith.maximumf %551, %552 : vector<8x512xf32>
    %554 = vector.extract_strided_slice %553 {offsets = [0, 0], sizes = [8, 256], strides = [1, 1]} : vector<8x512xf32> to vector<8x256xf32>
    %555 = vector.extract_strided_slice %553 {offsets = [0, 256], sizes = [8, 256], strides = [1, 1]} : vector<8x512xf32> to vector<8x256xf32>
    %556 = arith.addf %554, %555 : vector<8x256xf32>
    %cst_538 = arith.constant 5.000000e-01 : f32
    %557 = vector.broadcast %cst_538 : f32 to vector<8x256xf32>
    %558 = arith.mulf %556, %557 : vector<8x256xf32>
    %c0_539 = arith.constant 0 : index
    %c0_540 = arith.constant 0 : index
    %c0_541 = arith.constant 0 : index
    %559 = vector.load %arg6[%c0_539, %c0_540, %c0_541] : memref<1x8x256xf32, #tpu.memory_space<vmem>>, vector<1x8x256xf32>
    %560 = vector.shape_cast %559 : vector<1x8x256xf32> to vector<8x256xf32>
    %561 = vector.shape_cast %558 : vector<8x256xf32> to vector<1x8x256xf32>
    tpu.vector_store %arg6[%c0_539, %c0_540, %c0_541], %561 {strides = array<i32>} : memref<1x8x256xf32, #tpu.memory_space<vmem>>, vector<1x8x256xf32>,
    return
  }
  func.func @transform_0(%arg0: i32) -> (i32, i32) {
    %c0_i32 = arith.constant 0 : i32
    %c0_i32_0 = arith.constant 0 : i32
    %c0_i32_1 = arith.constant 0 : i32
    return %c0_i32, %c0_i32_0 : i32, i32
  }
  func.func @transform_1(%arg0: i32) -> (i32, i32) {
    %c0_i32 = arith.constant 0 : i32
    %c0_i32_0 = arith.constant 0 : i32
    %c0_i32_1 = arith.constant 0 : i32
    return %c0_i32, %c0_i32_0 : i32, i32
  }
  func.func @transform_2(%arg0: i32) -> (i32, i32) {
    %c0_i32 = arith.constant 0 : i32
    %c0_i32_0 = arith.constant 0 : i32
    %c0_i32_1 = arith.constant 0 : i32
    return %c0_i32, %c0_i32_0 : i32, i32
  }
  func.func @transform_3(%arg0: i32) -> (i32, i32) {
    %c0_i32 = arith.constant 0 : i32
    %c0_i32_0 = arith.constant 0 : i32
    %c0_i32_1 = arith.constant 0 : i32
    return %c0_i32, %c0_i32_0 : i32, i32
  }
  func.func @transform_4(%arg0: i32) -> (i32, i32, i32, i32) {
    %c0_i32 = arith.constant 0 : i32
    %c0_i32_0 = arith.constant 0 : i32
    %c0_i32_1 = arith.constant 0 : i32
    %c0_i32_2 = arith.constant 0 : i32
    return %arg0, %c0_i32, %c0_i32_0, %c0_i32_1 : i32, i32, i32, i32
  }
  func.func @transform_5(%arg0: i32) -> (i32, i32, i32) {
    %c0_i32 = arith.constant 0 : i32
    %c0_i32_0 = arith.constant 0 : i32
    %c0_i32_1 = arith.constant 0 : i32
    return %arg0, %c0_i32, %c0_i32_0 : i32, i32, i32
  }
}

</mosaic_0001>

<bundles_post_ra>
// kernel: feat_ex_z_forward.1
= control target key start
LH: loop header
LB: loop body
LE: loop exit
PB: predicated region body
PF: predicated region fallthrough
CT: control target
= control target key end

     0   :  { %s2750_s18 = smov 0   ;;  %s4739_s0 = inlined_call_operand.vmem [shape: f32[8,256], index: 0, kind: input, shape index: {}]   ;;  %s4740_s1 = inlined_call_operand.vmem [shape: f32[8,1], index: 1, kind: input, shape index: {}]   ;;  %s4741_s2 = inlined_call_operand.vmem [shape: f32[8,256], index: 2, kind: input, shape index: {}]   ;;  %s4742_s3 = inlined_call_operand.vmem [shape: f32[8,1], index: 3, kind: input, shape index: {}]   ;;  %s4743_s4 = inlined_call_operand.vmem [shape: f32[2,11,8,256], index: 4, kind: input, shape index: {}]   ;;  %s4744_s5 = inlined_call_operand.vmem [shape: f32[2,8,256], index: 5, kind: output, shape index: {}]  }
   0x1 LB: > { %s2497_s19 = sadd.s32 4294967295, %s2712_s18   ;;  %p2501_p0 = scmp.ge.s32.totalorder %s2712_s18, 1  ;;  %s2712_s18 = sphi %s2750_s18, %s15_s18  }
   0x2   : > { %p187_p1 = scmp.lt.s32.totalorder %s2712_s18, 3 }
   0x4   : > { %p188_p2 = pnand %p2501_p0, %p187_p1 }
   0x6   : > { %191 = sbr.rel (%p188_p2) target bundleno = 1174 (0x496), region = 40 }
   0xb   : > { %p215_p3 = scmp.lt.s32.totalorder %s2497_s19, 1  ;;  %s2714_s24 = smov 127   ;;  %v225_v20 = vlaneseq }
   0xc   : > { %s2715_s25 = smov 1   ;;  %s2716_s26 = smov 16  }
   0xd   : > { %s4830_s19 = smov (!%p215_p3, %s2497_s19), 1  ;;  %s2717_s27 = smov 112   ;;  %v2918_v21 = vand.u32 127, %v225_v20 }
   0xe   : > { %s2678_s20 = smul.u32 176, %s4830_s19  ;;  %s2527_s15 = sshll.u32 %s4830_s19, 4 }
   0xf   : > { %v2921_v22 = vadd.s32 128, %v2918_v21  ;;  %v228_v24 = vand.u32 15, %v2918_v21  ;;  %vm302_vm0 = vcmp.lt.s32.totalorder %v2918_v21, 1  ;;  %vm311_vm3 = vcmp.lt.s32.totalorder %v2918_v21, 127 }
  0x10   : > { %s2764_s23 = scalar_lea.vmem %s4743_s4, %s2678_s20  ;;  %vm345_vm7 = vcmp.lt.s32.totalorder %v2918_v21, 112  ;;  %vm234_vm8 = vcmp.ge.s32.totalorder %v2918_v21, 16  ;;  %vm320_vm9 = vcmp.lt.s32.totalorder %v2918_v21, 16  ;;  %s224_s20 = scalar_lea.vmem %s4744_s5, %s2527_s15 }
  0x11   : > { %v2767_v0 = vld [vmem:[%s2764_s23 + $0x30] sm:$0xff]  ;;  %v2774_v1 = vld [vmem:[%s2764_s23 + $0x38] sm:$0xff]  ;;  %v2781_v2 = vld [vmem:[%s2764_s23 + $0x8] sm:$0xff]  ;;  %v229_v23 = vand.u32 15, %v2921_v22  ;;  %vm2930_vm2 = vcmp.ne.s32.totalorder %v228_v24, 0  ;;  %vm2959_vm5 = vcmp.ne.s32.totalorder %v228_v24, 15 }
  0x12   : > { %565 = vrot.lane.b32.xlu1 %v2767_v0, %s2714_s24  ;;  %557 = vrot.lane.b32.xlu0 %v2767_v0, %s2715_s25  ;;  %v2784_v3 = vld [vmem:[%s2764_s23] sm:$0xff]  ;;  %v2791_v4 = vld [vmem:[%s2764_s23 + $0x28] sm:$0xff]  ;;  %vm237_vm6 = vcmp.lt.s32.totalorder %v2921_v22, 240 }
  0x13   : > { %v2794_v5 = vld [vmem:[%s2764_s23 + $0x20] sm:$0xff]  ;;  %v2809_v6 = vld [vmem:[%s2764_s23 + $0x48] sm:$0xff]  ;;  %v2823_v8 = vld [vmem:[%s2764_s23 + $0x18] sm:$0xff]  ;;  %vm2926_vm1 = vcmp.ne.s32.totalorder %v229_v23, 0  ;;  %vm2951_vm4 = vcmp.ne.s32.totalorder %v229_v23, 15 }
  0x14   : > { %4775 = vst [vmem:[#allocation3_spill] sm:$0xff] %v2809_v6  ;;  %v2812_v7 = vld [vmem:[%s2764_s23 + $0x40] sm:$0xff]  ;;  %4777 = vst [vmem:[#allocation5_spill] sm:$0xff] %v2823_v8  ;;  %v2826_v9 = vld [vmem:[%s2764_s23 + $0x10] sm:$0xff] }
  0x15   : > { %4776 = vst [vmem:[#allocation4_spill] sm:$0xff] %v2812_v7  ;;  %4778 = vst [vmem:[#allocation6_spill] sm:$0xff] %v2826_v9  ;;  %v2837_v10 = vld [vmem:[%s2764_s23 + $0x98] sm:$0xff]  ;;  %v2840_v11 = vld [vmem:[%s2764_s23 + $0x90] sm:$0xff] }
  0x16   : > { %567 = vrot.lane.b32.xlu1 %v2774_v1, %s2714_s24  ;;  %559 = vrot.lane.b32.xlu0 %v2774_v1, %s2715_s25  ;;  %v2851_v12 = vld [vmem:[%s2764_s23 + $0x68] sm:$0xff]  ;;  %v2854_v13 = vld [vmem:[%s2764_s23 + $0x60] sm:$0xff] }
  0x17   : > { %v2861_v14 = vld [vmem:[%s2764_s23 + $0x88] sm:$0xff]  ;;  %v2864_v15 = vld [vmem:[%s2764_s23 + $0x80] sm:$0xff]  ;;  %v2887_v16 = vld [vmem:[%s2764_s23 + $0x58] sm:$0xff] }
  0x18   : > { %4779 = vst [vmem:[#allocation7_spill] sm:$0xff] %v2887_v16  ;;  %v2890_v17 = vld [vmem:[%s2764_s23 + $0x50] sm:$0xff]  ;;  %v2905_v18 = vld [vmem:[%s2764_s23 + $0xa8] sm:$0xff]  ;;  %v2908_v19 = vld [vmem:[%s2764_s23 + $0xa0] sm:$0xff] }
  0x19   : > { %4780 = vst [vmem:[#allocation8_spill] sm:$0xff] %v2890_v17  ;;  %4781 = vst [vmem:[#allocation9_spill] sm:$0xff] %v2905_v18 }
  0x1a   : > { %300 = vrot.lane.b32.xlu1 %v2781_v2, %s2715_s25  ;;  %298 = vrot.lane.b32.xlu0 %v2784_v3, %s2715_s25  ;;  %4782 = vst [vmem:[#allocation10_spill] sm:$0xff] %v2908_v19 }
  0x1e   : > { %482 = vrot.lane.b32.xlu1 %v2791_v4, %s2714_s24  ;;  %480 = vrot.lane.b32.xlu0 %v2794_v5, %s2714_s24 }
  0x22   : > { %474 = vrot.lane.b32.xlu1 %v2791_v4, %s2715_s25  ;;  %472 = vrot.lane.b32.xlu0 %v2794_v5, %s2715_s25 }
  0x26   : > { %309 = vrot.lane.b32.xlu1 %v2781_v2, %s2714_s24  ;;  %307 = vrot.lane.b32.xlu0 %v2784_v3, %s2714_s24 }
  0x2a   : > { %652 = vrot.lane.b32.xlu1 %v2809_v6, %s2714_s24  ;;  %650 = vrot.lane.b32.xlu0 %v2812_v7, %s2714_s24 }
  0x2e   : > { %644 = vrot.lane.b32.xlu1 %v2809_v6, %s2715_s25  ;;  %642 = vrot.lane.b32.xlu0 %v2812_v7, %s2715_s25 }
  0x32   : > { %397 = vrot.lane.b32.xlu1 %v2823_v8, %s2714_s24  ;;  %395 = vrot.lane.b32.xlu0 %v2826_v9, %s2714_s24 }
  0x36   : > { %389 = vrot.lane.b32.xlu1 %v2823_v8, %s2715_s25  ;;  %387 = vrot.lane.b32.xlu0 %v2826_v9, %s2715_s25 }
  0x3a   : > { %1069 = vrot.lane.b32.xlu1 %v2837_v10, %s2715_s25  ;;  %1067 = vrot.lane.b32.xlu0 %v2840_v11, %s2715_s25 }
  0x3e   : > { %1077 = vrot.lane.b32.xlu1 %v2837_v10, %s2714_s24  ;;  %1075 = vrot.lane.b32.xlu0 %v2840_v11, %s2714_s24 }
  0x42   : > { %814 = vrot.lane.b32.xlu1 %v2851_v12, %s2715_s25  ;;  %812 = vrot.lane.b32.xlu0 %v2854_v13, %s2715_s25 }
  0x46   : > { %992 = vrot.lane.b32.xlu1 %v2861_v14, %s2714_s24  ;;  %990 = vrot.lane.b32.xlu0 %v2864_v15, %s2714_s24 }
  0x4a   : > { %583 = vrot.lane.b32.xlu1 %v2774_v1, %s2716_s26  ;;  %581 = vrot.lane.b32.xlu0 %v2767_v0, %s2716_s26 }
  0x4e   : > { %984 = vrot.lane.b32.xlu1 %v2861_v14, %s2715_s25  ;;  %982 = vrot.lane.b32.xlu0 %v2864_v15, %s2715_s25 }
  0x52   : > { %522 = vrot.lane.b32.xlu1 %v2791_v4, %s2717_s27  ;;  %520 = vrot.lane.b32.xlu0 %v2794_v5, %s2717_s27 }
  0x56   : > { %822 = vrot.lane.b32.xlu1 %v2851_v12, %s2714_s24  ;;  %820 = vrot.lane.b32.xlu0 %v2854_v13, %s2714_s24 }
  0x5a   : > { %737 = vrot.lane.b32.xlu1 %v2887_v16, %s2714_s24  ;;  %735 = vrot.lane.b32.xlu0 %v2890_v17, %s2714_s24 }
  0x5e   : > { %327 = vrot.lane.b32.xlu1 %v2781_v2, %s2716_s26  ;;  %325 = vrot.lane.b32.xlu0 %v2784_v3, %s2716_s26 }
  0x62   : > { %729 = vrot.lane.b32.xlu1 %v2887_v16, %s2715_s25  ;;  %727 = vrot.lane.b32.xlu0 %v2890_v17, %s2715_s25  ;;  %v3184_v16 = vld [vmem:[%s4739_s0 + $0x8] sm:$0xff] }
  0x63   : > { %4801 = vst [vmem:[#allocation21_spill] sm:$0xff] %v3184_v16  ;;  %1633 = vmatprep.mubr.f32.mxu1 %v3184_v16  ;;  %1562 = vmatprep.mubr.f32.mxu0 %v3184_v16 }
  0x66   : > { %1162 = vrot.lane.b32.xlu1 %v2905_v18, %s2714_s24  ;;  %1160 = vrot.lane.b32.xlu0 %v2908_v19, %s2714_s24 }
  0x6a   : > { %498 = vrot.lane.b32.xlu1 %v2791_v4, %s2716_s26  ;;  %496 = vrot.lane.b32.xlu0 %v2794_v5, %s2716_s26 }
  0x84   : > { %v566_v25 = vpop.permute.xlu1 %565  ;;  %v558_v26 = vpop.permute.xlu0 %557 }
  0x88   : > { %v568_v29 = vpop.permute.xlu1 %567  ;;  %v560_v30 = vpop.permute.xlu0 %559 }
  0x89   : > { %v2937_v31 = vsel %vm302_vm0, %v558_v26, %v560_v30  ;;  %v2941_v32 = vsel %vm302_vm0, %v560_v30, %v558_v26  ;;  %v2957_v36 = vsel %vm311_vm3, %v568_v29, %v566_v25  ;;  %v2965_v38 = vsel %vm311_vm3, %v566_v25, %v568_v29 }
  0x8a   : > { %v564_v33 = vsel %vm2926_vm1, %v2937_v31, 0.0  ;;  %v563_v34 = vsel %vm2930_vm2, %v2941_v32, 0.0  ;;  %v2970_v41 = vsel %vm2951_vm4, %v2957_v36, 0.0  ;;  %v2975_v42 = vsel %vm2959_vm5, %v2965_v38, 0.0 }
  0x8b   : > { %599 = vrot.lane.b32.xlu1 %v564_v33, %s2717_s27  ;;  %597 = vrot.lane.b32.xlu0 %v563_v34, %s2717_s27 }
  0x8c   : > { %v301_v39 = vpop.permute.xlu1 %300  ;;  %v299_v40 = vpop.permute.xlu0 %298 }
  0x8d   : > { %v2983_v45 = vsel %vm302_vm0, %v301_v39, %v299_v40  ;;  %v2987_v46 = vsel %vm302_vm0, %v299_v40, %v301_v39 }
  0x8e   : > { %v305_v47 = vsel %vm2930_vm2, %v2983_v45, 0.0  ;;  %v306_v48 = vsel %vm2926_vm1, %v2987_v46, 0.0 }
  0x8f   : > { %591 = vrot.lane.b32.xlu1 %v2970_v41, %s2716_s26  ;;  %589 = vrot.lane.b32.xlu0 %v2975_v42, %s2716_s26 }
  0x90   : > { %v483_v43 = vpop.permute.xlu1 %482  ;;  %v481_v44 = vpop.permute.xlu0 %480 }
  0x91   : > { %v2999_v51 = vsel %vm311_vm3, %v483_v43, %v481_v44  ;;  %v3003_v52 = vsel %vm311_vm3, %v481_v44, %v483_v43 }
  0x92   : > { %v487_v53 = vsel %vm2951_vm4, %v2999_v51, 0.0  ;;  %v486_v54 = vsel %vm2959_vm5, %v3003_v52, 0.0 }
  0x93   : > { %575 = vrot.lane.b32.xlu1 %v564_v33, %s2716_s26  ;;  %573 = vrot.lane.b32.xlu0 %v563_v34, %s2716_s26 }
  0x94   : > { %v475_v49 = vpop.permute.xlu1 %474  ;;  %v473_v50 = vpop.permute.xlu0 %472 }
  0x95   : > { %v3015_v57 = vsel %vm302_vm0, %v475_v49, %v473_v50  ;;  %v3019_v58 = vsel %vm302_vm0, %v473_v50, %v475_v49 }
  0x96   : > { %v478_v59 = vsel %vm2930_vm2, %v3015_v57, 0.0  ;;  %v479_v60 = vsel %vm2926_vm1, %v3019_v58, 0.0 }
  0x97   : > { %341 = vrot.lane.b32.xlu0 %v305_v47, %s2717_s27  ;;  %343 = vrot.lane.b32.xlu1 %v306_v48, %s2717_s27 }
  0x98   : > { %v310_v55 = vpop.permute.xlu1 %309  ;;  %v308_v56 = vpop.permute.xlu0 %307 }
  0x99   : > { %v3031_v63 = vsel %vm311_vm3, %v310_v55, %v308_v56  ;;  %v3035_v20 = vsel %vm311_vm3, %v308_v56, %v310_v55 }
  0x9a   : > { %v3042_v23 = vsel %vm2951_vm4, %v3031_v63, 0.0  ;;  %v3047_v24 = vsel %vm2959_vm5, %v3035_v20, 0.0 }
  0x9b   : > { %530 = vrot.lane.b32.xlu1 %v487_v53, %s2717_s27  ;;  %528 = vrot.lane.b32.xlu0 %v486_v54, %s2717_s27 }
  0x9c   : > { %v653_v61 = vpop.permute.xlu1 %652  ;;  %v651_v62 = vpop.permute.xlu0 %650 }
  0x9d   : > { %v3065_v43 = vsel %vm311_vm3, %v653_v61, %v651_v62  ;;  %v3069_v44 = vsel %vm311_vm3, %v651_v62, %v653_v61  ;;  %v3112_v61 = vld [vmem:[%s2764_s23 + $0x70] sm:$0xff]  ;;  %v3115_v62 = vld [vmem:[%s2764_s23 + $0x78] sm:$0xff] }
  0x9e   : > { %4791 = vst [vmem:[#allocation11_spill] sm:$0xff] %v3065_v43  ;;  %4792 = vst [vmem:[#allocation12_spill] sm:$0xff] %v3069_v44 }
  0x9f   : > { %512 = vrot.lane.b32.xlu0 %v478_v59, %s2717_s27  ;;  %514 = vrot.lane.b32.xlu1 %v479_v60, %s2717_s27  ;;  %4795 = vst [vmem:[#allocation15_spill] sm:$0xff] %v3112_v61  ;;  %4796 = vst [vmem:[#allocation16_spill] sm:$0xff] %v3115_v62 }
  0xa0   : > { %v645_v25 = vpop.permute.xlu1 %644  ;;  %v643_v26 = vpop.permute.xlu0 %642 }
  0xa3   : > { %335 = vrot.lane.b32.xlu1 %v3042_v23, %s2716_s26  ;;  %333 = vrot.lane.b32.xlu0 %v3047_v24, %s2716_s26 }
  0xa4   : > { %v398_v29 = vpop.permute.xlu1 %397  ;;  %v396_v30 = vpop.permute.xlu0 %395 }
  0xa7   : > { %318 = vrot.lane.b32.xlu1 %v306_v48, %s2716_s26  ;;  %316 = vrot.lane.b32.xlu0 %v305_v47, %s2716_s26  ;;  %v657_v47 = vsel %vm2951_vm4, %v3065_v43, 0.0  ;;  %v656_v48 = vsel %vm2959_vm5, %v3069_v44, 0.0 }
  0xa8   : > { %v390_v33 = vpop.permute.xlu1 %389  ;;  %v388_v34 = vpop.permute.xlu0 %387 }
  0xab   : > { %506 = vrot.lane.b32.xlu1 %v487_v53, %s2716_s26  ;;  %504 = vrot.lane.b32.xlu0 %v486_v54, %s2716_s26  ;;  %v3089_v53 = vsel %vm302_vm0, %v645_v25, %v643_v26  ;;  %v3093_v54 = vsel %vm302_vm0, %v643_v26, %v645_v25 }
  0xac   : > { %v3059_v39 = vpop.permute.xlu1 %1069  ;;  %v3061_v40 = vpop.permute.xlu0 %1067  ;;  %4793 = vst [vmem:[#allocation13_spill] sm:$0xff] %v3089_v53  ;;  %4794 = vst [vmem:[#allocation14_spill] sm:$0xff] %v3093_v54 }
  0xad   : > { %v3216_v16 = vsel %vm302_vm0, %v3059_v39, %v3061_v40 }
  0xae   : > { %4802 = vst [vmem:[#allocation22_spill] sm:$0xff] %v3216_v16 }
  0xaf   : > { %490 = vrot.lane.b32.xlu1 %v479_v60, %s2716_s26  ;;  %488 = vrot.lane.b32.xlu0 %v478_v59, %s2716_s26  ;;  %v648_v59 = vsel %vm2930_vm2, %v3089_v53, 0.0  ;;  %v649_v60 = vsel %vm2926_vm1, %v3093_v54, 0.0  ;;  %v3137_v53 = vsel %vm311_vm3, %v398_v29, %v396_v30  ;;  %v3141_v54 = vsel %vm311_vm3, %v396_v30, %v398_v29 }
  0xb0   : > { %v3081_v49 = vpop.permute.xlu1 %1077  ;;  %v3083_v50 = vpop.permute.xlu0 %1075  ;;  %4797 = vst [vmem:[#allocation17_spill] sm:$0xff] %v3137_v53  ;;  %4798 = vst [vmem:[#allocation18_spill] sm:$0xff] %v3141_v54  ;;  %v402_v17 = vsel %vm2951_vm4, %v3137_v53, 0.0  ;;  %v3175_v53 = vsel %vm302_vm0, %v390_v33, %v388_v34 }
  0xb1   : > { %4799 = vst [vmem:[#allocation19_spill] sm:$0xff] %v3175_v53 }
  0xb3   : > { %1154 = vrot.lane.b32.xlu1 %v2905_v18, %s2715_s25  ;;  %1152 = vrot.lane.b32.xlu0 %v2908_v19, %s2715_s25 }
  0xb4   : > { %v3099_v55 = vpop.permute.xlu1 %814  ;;  %v3101_v56 = vpop.permute.xlu0 %812 }
  0xb7   : > { %700 = vrot.lane.b32.xlu1 %v657_v47, %s2717_s27  ;;  %698 = vrot.lane.b32.xlu0 %v656_v48, %s2717_s27 }
  0xb8   : > { %v3117_v25 = vpop.permute.xlu1 %992  ;;  %v3119_v26 = vpop.permute.xlu0 %990 }
  0xbb   : > { %692 = vrot.lane.b32.xlu1 %v2809_v6, %s2717_s27  ;;  %690 = vrot.lane.b32.xlu0 %v2812_v7, %s2717_s27 }
  0xbc   : > { %v3127_v19 = vpop.permute.xlu1 %583  ;;  %v3129_v18 = vpop.permute.xlu0 %581 }
  0xbf   : > { %682 = vrot.lane.b32.xlu0 %v648_v59, %s2717_s27  ;;  %684 = vrot.lane.b32.xlu1 %v649_v60, %s2717_s27 }
  0xc3   : > { %905 = vrot.lane.b32.xlu0 %v3112_v61, %s2714_s24  ;;  %907 = vrot.lane.b32.xlu1 %v3115_v62, %s2714_s24 }
  0xc7   : > { %674 = vrot.lane.b32.xlu0 %v656_v48, %s2716_s26  ;;  %676 = vrot.lane.b32.xlu1 %v657_v47, %s2716_s26  ;;  %v3143_v48 = vpop.permute.xlu1 %984  ;;  %v3145_v47 = vpop.permute.xlu0 %982 }
  0xcb   : > { %897 = vrot.lane.b32.xlu0 %v3112_v61, %s2715_s25  ;;  %899 = vrot.lane.b32.xlu1 %v3115_v62, %s2715_s25  ;;  %v401_v61 = vsel %vm2959_vm5, %v3141_v54, 0.0  ;;  %v3159_v29 = vpop.permute.xlu1 %522  ;;  %v3161_v30 = vpop.permute.xlu0 %520 }
  0xcf   : > { %445 = vrot.lane.b32.xlu1 %v402_v17, %s2717_s27  ;;  %443 = vrot.lane.b32.xlu0 %v401_v61, %s2717_s27  ;;  %v3167_v62 = vpop.permute.xlu1 %822  ;;  %v3169_v54 = vpop.permute.xlu0 %820 }
  0xd3   : > { %668 = vrot.lane.b32.xlu1 %v2809_v6, %s2716_s26  ;;  %666 = vrot.lane.b32.xlu0 %v2812_v7, %s2716_s26  ;;  %v3179_v7 = vsel %vm302_vm0, %v388_v34, %v390_v33  ;;  %v393_v6 = vsel %vm2930_vm2, %v3175_v53, 0.0  ;;  %v3196_v33 = vpop.permute.xlu1 %737  ;;  %v3198_v34 = vpop.permute.xlu0 %735 }
  0xd4   : > { %4800 = vst [vmem:[#allocation20_spill] sm:$0xff] %v3179_v7 }
  0xd7   : > { %437 = vrot.lane.b32.xlu1 %v2823_v8, %s2717_s27  ;;  %435 = vrot.lane.b32.xlu0 %v2826_v9, %s2717_s27  ;;  %v3206_v53 = vpop.permute.xlu0 %325 }
  0xdb   : > { %660 = vrot.lane.b32.xlu1 %v649_v60, %s2716_s26  ;;  %658 = vrot.lane.b32.xlu0 %v648_v59, %s2716_s26  ;;  %v394_v59 = vsel %vm2926_vm1, %v3179_v7, 0.0  ;;  %v3204_v60 = vpop.permute.xlu1 %327  ;;  %v3237_v43 = vpop.permute.xlu0 %727 }
  0xdf   : > { %427 = vrot.lane.b32.xlu0 %v393_v6, %s2717_s27  ;;  %429 = vrot.lane.b32.xlu1 %v394_v59, %s2717_s27  ;;  %v3235_v44 = vpop.permute.xlu1 %729 }
  0xe3   : > { %613 = vrot.lane.b32.xlu0 %v2975_v42, %s2717_s27  ;;  %615 = vrot.lane.b32.xlu1 %v2970_v41, %s2717_s27  ;;  %v3222_v41 = vsel %vm302_vm0, %v3061_v40, %v3059_v39  ;;  %v3227_v42 = vsel %vm2930_vm2, %v3216_v16, 0.0  ;;  %v3241_v39 = vpop.permute.xlu1 %1162  ;;  %v3243_v40 = vpop.permute.xlu0 %1160  ;;  %v3253_v16 = vsel %vm311_vm3, %v3083_v50, %v3081_v49 }
  0xe4   : > { %4803 = vst [vmem:[#allocation23_spill] sm:$0xff] %v3222_v41  ;;  %v1074_v7 = vsel %vm2926_vm1, %v3222_v41, 0.0 }
  0xe7   : > { %605 = vrot.lane.b32.xlu0 %v2767_v0, %s2717_s27  ;;  %607 = vrot.lane.b32.xlu1 %v2774_v1, %s2717_s27  ;;  %v3265_v41 = vpop.permute.xlu0 %496 }
  0xeb   : > { %1107 = vrot.lane.b32.xlu0 %v3227_v42, %s2717_s27  ;;  %1109 = vrot.lane.b32.xlu1 %v1074_v7, %s2717_s27 }
  0xef   : > { %419 = vrot.lane.b32.xlu0 %v401_v61, %s2716_s26  ;;  %421 = vrot.lane.b32.xlu1 %v402_v17, %s2716_s26  ;;  %v3259_v17 = vsel %vm311_vm3, %v3081_v49, %v3083_v50  ;;  %v3263_v61 = vpop.permute.xlu1 %498 }
  0xf3   : > { %411 = vrot.lane.b32.xlu0 %v2826_v9, %s2716_s26  ;;  %413 = vrot.lane.b32.xlu1 %v2823_v8, %s2716_s26  ;;  %v3270_v9 = vsel %vm2951_vm4, %v3259_v17, 0.0  ;;  %v3275_v8 = vsel %vm2959_vm5, %v3253_v16, 0.0 }
  0xf4   : > { %4804 = vst [vmem:[#allocation24_spill] sm:$0xff] %v3270_v9  ;;  %4805 = vst [vmem:[#allocation25_spill] sm:$0xff] %v3275_v8 }
  0xf7   : > { %403 = vrot.lane.b32.xlu0 %v393_v6, %s2716_s26  ;;  %405 = vrot.lane.b32.xlu1 %v394_v59, %s2716_s26 }
  0xfb   : > { %1101 = vrot.lane.b32.xlu1 %v3270_v9, %s2716_s26  ;;  %1099 = vrot.lane.b32.xlu0 %v3275_v8, %s2716_s26 }
  0xfd   : > { %v600_v6 = vpop.permute.xlu1 %599  ;;  %v598_v49 = vpop.permute.xlu0 %597 }
  0xfe   : > { %v602_v50 = vsel %vm345_vm7, %v600_v6, %v598_v49  ;;  %v601_v59 = vsel %vm345_vm7, %v598_v49, %v600_v6 }
  0xff   : > { %360 = vrot.lane.b32.xlu1 %v3042_v23, %s2717_s27  ;;  %358 = vrot.lane.b32.xlu0 %v3047_v24, %s2717_s27 }
 0x100   : > { %2548 = vmatprep.subr.msk.mxu1 %vm237_vm6, %v602_v50  ;;  %v3386_v50 = vsel %vm311_vm3, %v3117_v25, %v3119_v26 }
 0x101   : > { %1570 = vmatpush1.msra.mxu1 %v601_v59  ;;  %v592_v9 = vpop.permute.xlu1 %591  ;;  %v590_v8 = vpop.permute.xlu0 %589 }
 0x102   : > { %2549 = vmatprep.subr.msk.mxu1 %vm2951_vm4, %v2957_v36  ;;  %v586_v36 = vsel %vm320_vm9, %v3127_v19, %v3129_v18 }
 0x103   : > { %2550 = vmatpush1.msk.msra.mxu1 %vm2959_vm5, %v2965_v38  ;;  %1093 = vrot.lane.b32.xlu1 %v2837_v10, %s2716_s26 }
 0x104   : > { %1091 = vrot.lane.b32.xlu0 %v2840_v11, %s2716_s26  ;;  %1573 = vmatprep.subr.mxu1 %v2774_v1  ;;  %v594_v1 = vsel %vm320_vm9, %v592_v9, %v590_v8 }
 0x105   : > { %1574 = vmatpush1.msra.mxu1 %v2767_v0  ;;  %v576_v23 = vpop.permute.xlu1 %575  ;;  %v574_v24 = vpop.permute.xlu0 %573  ;;  %v593_v0 = vsel %vm320_vm9, %v590_v8, %v592_v9  ;;  %v3339_v9 = vsel %vm302_vm0, %v3101_v56, %v3099_v55 }
 0x106   : > { %2551 = vmatprep.subr.msk.mxu1 %vm2926_vm1, %v2937_v31  ;;  %v585_v31 = vsel %vm320_vm9, %v3129_v18, %v3127_v19  ;;  %v3348_v18 = vsel %vm302_vm0, %v3099_v55, %v3101_v56  ;;  %v577_v19 = vsel %vm320_vm9, %v574_v24, %v576_v23  ;;  %v3366_v55 = vsel %vm2926_vm1, %v3339_v9, 0.0 }
 0x107   : > { %2552 = vmatpush1.msk.msra.mxu1 %vm2930_vm2, %v2941_v32  ;;  %352 = vrot.lane.b32.xlu1 %v2781_v2, %s2717_s27 }
 0x108   : > { %350 = vrot.lane.b32.xlu0 %v2784_v3, %s2717_s27  ;;  %1577 = vmatprep.subr.mxu1 %v593_v0 }
 0x109   : > { %2553 = vmatpush1.msk.msra.mxu1 %vm234_vm8, %v594_v1  ;;  %v344_v11 = vpop.permute.xlu1 %343  ;;  %v342_v32 = vpop.permute.xlu0 %341  ;;  %v3452_v1 = vsel %vm302_vm0, %v3145_v47, %v3143_v48 }
 0x10a   : > { %1579 = vmatprep.subr.mxu1 %v585_v31  ;;  %v347_v38 = vsel %vm345_vm7, %v344_v11, %v342_v32  ;;  %v346_v8 = vsel %vm345_vm7, %v342_v32, %v344_v11  ;;  %v329_v31 = vsel %vm320_vm9, %v3206_v53, %v3204_v60 }
 0x10b   : > { %2554 = vmatpush1.msk.msra.mxu1 %vm234_vm8, %v586_v36  ;;  %1085 = vrot.lane.b32.xlu1 %v1074_v7, %s2716_s26  ;;  %v578_v7 = vsel %vm320_vm9, %v576_v23, %v574_v24 }
 0x10c   : > { %1083 = vrot.lane.b32.xlu0 %v3227_v42, %s2716_s26  ;;  %2528 = vmatprep.subr.msk.mxu0 %vm237_vm6, %v347_v38  ;;  %v3376_v42 = vsel %vm2930_vm2, %v3348_v18, 0.0 }
 0x10d   : > { %1581 = vmatprep.subr.mxu1 %v577_v19  ;;  %1499 = vmatpush1.msra.mxu0 %v346_v8  ;;  %v531_v6 = vpop.permute.xlu1 %530  ;;  %v529_v49 = vpop.permute.xlu0 %528  ;;  %v2718_v8 = vmov 0.0  }
 0x10e   : > { %2555 = vmatpush1.msk.msra.mxu1 %vm234_vm8, %v578_v7  ;;  %2529 = vmatprep.subr.msk.mxu0 %vm2951_vm4, %v3031_v63  ;;  %v533_v56 = vsel %vm345_vm7, %v531_v6, %v529_v49  ;;  %v532_v63 = vsel %vm345_vm7, %v529_v49, %v531_v6  ;;  %v500_v7 = vsel %vm320_vm9, %v3265_v41, %v3263_v61 }
 0x10f   : > { %2530 = vmatpush1.msk.msra.mxu0 %vm2959_vm5, %v3035_v20  ;;  %854 = vrot.lane.b32.xlu1 %v3366_v55, %s2717_s27  ;;  %v3395_v20 = vsel %vm311_vm3, %v3119_v26, %v3117_v25  ;;  %v501_v49 = vsel %vm320_vm9, %v3263_v61, %v3265_v41 }
 0x110   : > { %852 = vrot.lane.b32.xlu0 %v3376_v42, %s2717_s27  ;;  %1502 = vmatprep.subr.mxu0 %v2781_v2  ;;  %v525_v2 = vsel %vm345_vm7, %v3159_v29, %v3161_v30 }
 0x111   : > { %2556 = vmatprep.subr.msk.mxu1 %vm237_vm6, %v533_v56  ;;  %1503 = vmatpush1.msra.mxu0 %v2784_v3  ;;  %v515_v59 = vpop.permute.xlu1 %514  ;;  %v513_v23 = vpop.permute.xlu0 %512  ;;  %v524_v3 = vsel %vm345_vm7, %v3161_v30, %v3159_v29 }
 0x112   : > { %1584 = vmatpush1.msra.mxu1 %v532_v63  ;;  %2531 = vmatprep.subr.msk.mxu0 %vm2926_vm1, %v2987_v46  ;;  %v517_v25 = vsel %vm345_vm7, %v515_v59, %v513_v23  ;;  %v3421_v46 = vsel %vm2951_vm4, %v3386_v50, 0.0  ;;  %v516_v26 = vsel %vm345_vm7, %v513_v23, %v515_v59 }
 0x113   : > { %2557 = vmatprep.subr.msk.mxu1 %vm237_vm6, %v525_v2  ;;  %2532 = vmatpush1.msk.msra.mxu0 %vm2930_vm2, %v2983_v45  ;;  %v3430_v45 = vsel %vm2959_vm5, %v3395_v20, 0.0 }
 0x114   : > { %1586 = vmatpush1.msra.mxu1 %v524_v3  ;;  %1040 = vrot.lane.b32.xlu1 %v3421_v46, %s2717_s27 }
 0x115   : > { %1038 = vrot.lane.b32.xlu0 %v3430_v45, %s2717_s27  ;;  %2558 = vmatprep.subr.msk.mxu1 %vm237_vm6, %v517_v25  ;;  %v336_v29 = vpop.permute.xlu1 %335  ;;  %v334_v30 = vpop.permute.xlu0 %333 }
 0x116   : > { %1588 = vmatpush1.msra.mxu1 %v516_v26  ;;  %v337_v24 = vsel %vm320_vm9, %v334_v30, %v336_v29  ;;  %v338_v0 = vsel %vm320_vm9, %v336_v29, %v334_v30 }
 0x117   : > { %2559 = vmatprep.subr.msk.mxu1 %vm2951_vm4, %v2999_v51  ;;  %1506 = vmatprep.subr.mxu0 %v337_v24  ;;  %v3458_v51 = vsel %vm302_vm0, %v3143_v48, %v3145_v47  ;;  %v3500_v47 = vsel %vm311_vm3, %v3169_v54, %v3167_v62 }
 0x118   : > { %2560 = vmatpush1.msk.msra.mxu1 %vm2959_vm5, %v3003_v52  ;;  %1032 = vrot.lane.b32.xlu1 %v2861_v14, %s2717_s27 }
 0x119   : > { %1030 = vrot.lane.b32.xlu0 %v2864_v15, %s2717_s27  ;;  %1591 = vmatprep.subr.mxu1 %v2791_v4  ;;  %v319_v52 = vpop.permute.xlu1 %318  ;;  %v317_v11 = vpop.permute.xlu0 %316  ;;  %v330_v4 = vsel %vm320_vm9, %v3204_v60, %v3206_v53 }
 0x11a   : > { %2533 = vmatpush1.msk.msra.mxu0 %vm234_vm8, %v338_v0  ;;  %1592 = vmatpush1.msra.mxu1 %v2794_v5  ;;  %v321_v48 = vsel %vm320_vm9, %v317_v11, %v319_v52  ;;  %v3487_v5 = vsel %vm2930_vm2, %v3458_v51, 0.0  ;;  %v322_v53 = vsel %vm320_vm9, %v319_v52, %v317_v11  ;;  %v4806_v52 = vld [vmem:[#allocation11_spill] sm:$0xff]  ;;  %v4807_v11 = vld [vmem:[#allocation12_spill] sm:$0xff] }
 0x11b   : > { %1508 = vmatprep.subr.mxu0 %v329_v31  ;;  %2561 = vmatprep.subr.msk.mxu1 %vm2926_vm1, %v3019_v58  ;;  %v3492_v58 = vsel %vm2926_vm1, %v3452_v1, 0.0  ;;  %v4810_v31 = vld [vmem:[#allocation8_spill] sm:$0xff] }
 0x11c   : > { %2534 = vmatpush1.msk.msra.mxu0 %vm234_vm8, %v330_v4  ;;  %2562 = vmatpush1.msk.msra.mxu1 %vm2930_vm2, %v3015_v57  ;;  %v3506_v57 = vsel %vm311_vm3, %v3167_v62, %v3169_v54  ;;  %v3526_v62 = vsel %vm2959_vm5, %v3500_v47, 0.0 }
 0x11d   : > { %1022 = vrot.lane.b32.xlu0 %v3487_v5, %s2717_s27  ;;  %1024 = vrot.lane.b32.xlu1 %v3492_v58, %s2717_s27  ;;  %v507_v60 = vpop.permute.xlu1 %506  ;;  %v505_v32 = vpop.permute.xlu0 %504  ;;  %v3521_v54 = vsel %vm2951_vm4, %v3506_v57, 0.0 }
 0x11e   : > { %1510 = vmatprep.subr.mxu0 %v321_v48  ;;  %v508_v36 = vsel %vm320_vm9, %v505_v32, %v507_v60  ;;  %v509_v38 = vsel %vm320_vm9, %v507_v60, %v505_v32  ;;  %v4812_v60 = vld [vmem:[#allocation14_spill] sm:$0xff] }
 0x11f   : > { %2535 = vmatpush1.msk.msra.mxu0 %vm234_vm8, %v322_v53  ;;  %1595 = vmatprep.subr.mxu1 %v508_v36  ;;  %v4811_v53 = vld [vmem:[#allocation4_spill] sm:$0xff]  ;;  %v4813_v36 = vld [vmem:[#allocation13_spill] sm:$0xff] }
 0x120   : > { %2563 = vmatpush1.msk.msra.mxu1 %vm234_vm8, %v509_v38  ;;  %1512 = vmatprep.subr.mxu0 %v2718_v8 }
 0x121   : > { %846 = vrot.lane.b32.xlu1 %v3521_v54, %s2716_s26  ;;  %844 = vrot.lane.b32.xlu0 %v3526_v62, %s2716_s26  ;;  %v491_v19 = vpop.permute.xlu1 %490  ;;  %v489_v6 = vpop.permute.xlu0 %488 }
 0x122   : > { %1597 = vmatprep.subr.mxu1 %v500_v7  ;;  %v492_v56 = vsel %vm320_vm9, %v489_v6, %v491_v19  ;;  %1513 = vmatpush1.msra.mxu0 %v2718_v8  ;;  %v493_v63 = vsel %vm320_vm9, %v491_v19, %v489_v6  ;;  %v3662_v19 = vsel %vm302_vm0, %v3237_v43, %v3235_v44 }
 0x123   : > { %2564 = vmatpush1.msk.msra.mxu1 %vm234_vm8, %v501_v49  ;;  %1514 = vmatprep.subr.mxu0 %v2718_v8  ;;  %v3668_v7 = vsel %vm302_vm0, %v3235_v44, %v3237_v43  ;;  %v734_v43 = vsel %vm2926_vm1, %v3662_v19, 0.0  ;;  %v3690_v44 = vsel %vm311_vm3, %v3243_v40, %v3241_v39 }
 0x124   : > { %1599 = vmatprep.subr.mxu1 %v492_v56  ;;  %1515 = vmatpush1.msra.mxu0 %v2718_v8  ;;  %v733_v56 = vsel %vm2930_vm2, %v3668_v7, 0.0 }
 0x125   : > { %838 = vrot.lane.b32.xlu1 %v2851_v12, %s2716_s26  ;;  %836 = vrot.lane.b32.xlu0 %v2854_v13, %s2716_s26  ;;  %v3556_v41 = vpop.permute.xlu1 %1154  ;;  %v3558_v61 = vpop.permute.xlu0 %1152 }
 0x126   : > { %2565 = vmatpush1.msk.msra.mxu1 %vm234_vm8, %v493_v63  ;;  %1516 = vmatprep.subr.mxu0 %v2718_v8 }
 0x127   : > { %1517 = vmatpush1.msra.mxu0 %v2718_v8 }
 0x128   : > { %1518 = vmatprep.subr.mxu0 %v2718_v8 }
 0x129   : > { %830 = vrot.lane.b32.xlu1 %v3366_v55, %s2716_s26  ;;  %828 = vrot.lane.b32.xlu0 %v3376_v42, %s2716_s26  ;;  %v701_v12 = vpop.permute.xlu1 %700  ;;  %v699_v13 = vpop.permute.xlu0 %698  ;;  %v3582_v55 = vsel %vm311_vm3, %v3198_v34, %v3196_v33  ;;  %v3588_v42 = vsel %vm311_vm3, %v3196_v33, %v3198_v34 }
 0x12a   : > { %v703_v59 = vsel %vm345_vm7, %v701_v12, %v699_v13  ;;  %v702_v23 = vsel %vm345_vm7, %v699_v13, %v701_v12  ;;  %1519 = vmatpush1.msra.mxu0 %v2718_v8  ;;  %v3605_v33 = vsel %vm2951_vm4, %v3588_v42, 0.0  ;;  %v3610_v34 = vsel %vm2959_vm5, %v3582_v55, 0.0 }
 0x12b   : > { %2566 = vmatprep.subr.msk.mxu1 %vm237_vm6, %v703_v59  ;;  %1520 = vmatprep.subr.mxu0 %v2718_v8 }
 0x12c   : > { %1612 = vmatpush2.msra.mxu1 %v702_v23  ;;  %1521 = vmatpush1.msra.mxu0 %v2718_v8 }
 0x12d   : > { %1016 = vrot.lane.b32.xlu1 %v3421_v46, %s2716_s26  ;;  %1014 = vrot.lane.b32.xlu0 %v3430_v45, %s2716_s26  ;;  %v693_v2 = vpop.permute.xlu1 %692  ;;  %v691_v25 = vpop.permute.xlu0 %690 }
 0x12e   : > { %v695_v3 = vsel %vm345_vm7, %v693_v2, %v691_v25  ;;  %v694_v26 = vsel %vm345_vm7, %v691_v25, %v693_v2  ;;  %1522 = vmatprep.subr.mxu0 %v2718_v8 }
 0x12f   : > { %2567 = vmatprep.subr.msk.mxu1 %vm237_vm6, %v695_v3  ;;  %1523 = vmatpush1.msra.mxu0 %v2718_v8  ;;  %v3730_v3 = vsel %vm302_vm0, %v3558_v61, %v3556_v41 }
 0x130   : > { %1614 = vmatpush2.msra.mxu1 %v694_v26  ;;  %1524 = vmatprep.subr.mxu0 %v2718_v8  ;;  %v3736_v26 = vsel %vm302_vm0, %v3556_v41, %v3558_v61  ;;  %v3756_v61 = vsel %vm2926_vm1, %v3730_v3, 0.0 }
 0x131   : > { %785 = vrot.lane.b32.xlu1 %v3605_v33, %s2717_s27  ;;  %783 = vrot.lane.b32.xlu0 %v3610_v34, %s2717_s27  ;;  %v685_v46 = vpop.permute.xlu1 %684  ;;  %v683_v45 = vpop.permute.xlu0 %682  ;;  %v3751_v41 = vsel %vm2930_vm2, %v3736_v26, 0.0 }
 0x132   : > { %v687_v29 = vsel %vm345_vm7, %v685_v46, %v683_v45  ;;  %v686_v30 = vsel %vm345_vm7, %v683_v45, %v685_v46  ;;  %1525 = vmatpush1.msra.mxu0 %v2718_v8  ;;  %v4814_v46 = vld [vmem:[#allocation9_spill] sm:$0xff]  ;;  %v4815_v45 = vld [vmem:[#allocation10_spill] sm:$0xff] }
 0x133   : > { %2568 = vmatprep.subr.msk.mxu1 %vm237_vm6, %v687_v29  ;;  %1526 = vmatprep.subr.mxu0 %v2718_v8 }
 0x134   : > { %1616 = vmatpush2.msra.mxu1 %v686_v30  ;;  %1527 = vmatpush1.msra.mxu0 %v2718_v8 }
 0x135   : > { %1008 = vrot.lane.b32.xlu1 %v2861_v14, %s2716_s26  ;;  %1006 = vrot.lane.b32.xlu0 %v2864_v15, %s2716_s26  ;;  %v3630_v24 = vpop.permute.xlu1 %907  ;;  %v3632_v0 = vpop.permute.xlu0 %905  ;;  %v4808_v14 = vld [vmem:[#allocation3_spill] sm:$0xff] }
 0x136   : > { %2569 = vmatprep.subr.msk.mxu1 %vm2951_vm4, %v4806_v52  ;;  %1528 = vmatprep.subr.mxu0 %v2718_v8  ;;  %v4809_v15 = vld [vmem:[#allocation7_spill] sm:$0xff] }
 0x137   : > { %2570 = vmatpush2.msk.msra.mxu1 %vm2959_vm5, %v4807_v11  ;;  %1529 = vmatpush1.msra.mxu0 %v2718_v8 }
 0x138   : > { %1619 = vmatprep.subr.mxu1 %v4808_v14 }
 0x139   : > { %777 = vrot.lane.b32.xlu1 %v4809_v15, %s2717_s27  ;;  %775 = vrot.lane.b32.xlu0 %v4810_v31, %s2717_s27  ;;  %v677_v4 = vpop.permute.xlu1 %676  ;;  %v675_v48 = vpop.permute.xlu0 %674 }
 0x13a   : > { %1620 = vmatpush2.msra.mxu1 %v4811_v53  ;;  %v678_v32 = vsel %vm320_vm9, %v675_v48, %v677_v4  ;;  %v679_v38 = vsel %vm320_vm9, %v677_v4, %v675_v48 }
 0x13b   : > { %2571 = vmatprep.subr.msk.mxu1 %vm2926_vm1, %v4812_v60 }
 0x13c   : > { %2572 = vmatpush2.msk.msra.mxu1 %vm2930_vm2, %v4813_v36 }
 0x13d   : > { %1000 = vrot.lane.b32.xlu1 %v3492_v58, %s2716_s26  ;;  %998 = vrot.lane.b32.xlu0 %v3487_v5, %s2716_s26  ;;  %v3674_v6 = vpop.permute.xlu1 %899  ;;  %v3676_v49 = vpop.permute.xlu0 %897  ;;  %v3696_v5 = vsel %vm311_vm3, %v3241_v39, %v3243_v40  ;;  %v3714_v40 = vsel %vm2959_vm5, %v3690_v44, 0.0 }
 0x13e   : > { %1623 = vmatprep.subr.mxu1 %v678_v32  ;;  %v3709_v39 = vsel %vm2951_vm4, %v3696_v5, 0.0 }
 0x13f   : > { %2573 = vmatpush2.msk.msra.mxu1 %vm234_vm8, %v679_v38 }
 0x141   : > { %767 = vrot.lane.b32.xlu0 %v733_v56, %s2717_s27  ;;  %769 = vrot.lane.b32.xlu1 %v734_v43, %s2717_s27  ;;  %v446_v58 = vpop.permute.xlu1 %445  ;;  %v444_v63 = vpop.permute.xlu0 %443 }
 0x142   : > { %v448_v12 = vsel %vm345_vm7, %v446_v58, %v444_v63  ;;  %v447_v13 = vsel %vm345_vm7, %v444_v63, %v446_v58  ;;  %v4816_v58 = vld [vmem:[#allocation17_spill] sm:$0xff] }
 0x143   : > { %2536 = vmatprep.subr.msk.mxu0 %vm237_vm6, %v448_v12 }
 0x144   : > { %1541 = vmatpush2.msra.mxu0 %v447_v13  ;;  %v4817_v13 = vld [vmem:[#allocation18_spill] sm:$0xff] }
 0x145   : > { %1210 = vrot.lane.b32.xlu1 %v3709_v39, %s2717_s27  ;;  %1208 = vrot.lane.b32.xlu0 %v3714_v40, %s2717_s27  ;;  %v669_v59 = vpop.permute.xlu1 %668  ;;  %v667_v23 = vpop.permute.xlu0 %666 }
 0x146   : > { %v670_v2 = vsel %vm320_vm9, %v667_v23, %v669_v59  ;;  %v671_v25 = vsel %vm320_vm9, %v669_v59, %v667_v23  ;;  %v4819_v23 = vld [vmem:[#allocation6_spill] sm:$0xff] }
 0x147   : > { %1625 = vmatprep.subr.mxu1 %v670_v2 }
 0x148   : > { %2574 = vmatpush2.msk.msra.mxu1 %vm234_vm8, %v671_v25 }
 0x149   : > { %1202 = vrot.lane.b32.xlu1 %v4814_v46, %s2717_s27  ;;  %1200 = vrot.lane.b32.xlu0 %v4815_v45, %s2717_s27  ;;  %v438_v29 = vpop.permute.xlu1 %437  ;;  %v436_v30 = vpop.permute.xlu0 %435 }
 0x14a   : > { %v440_v52 = vsel %vm345_vm7, %v438_v29, %v436_v30  ;;  %v439_v11 = vsel %vm345_vm7, %v436_v30, %v438_v29  ;;  %v4820_v29 = vld [vmem:[#allocation20_spill] sm:$0xff]  ;;  %v3819_v30 = vsel %vm311_vm3, %v3632_v0, %v3630_v24 }
 0x14b   : > { %2537 = vmatprep.subr.msk.mxu0 %vm237_vm6, %v440_v52  ;;  %v3825_v52 = vsel %vm311_vm3, %v3630_v24, %v3632_v0  ;;  %v4822_v24 = vld [vmem:[#allocation21_spill] sm:$0xff] }
 0x14c   : > { %1543 = vmatpush2.msra.mxu0 %v439_v11  ;;  %v3842_v0 = vsel %vm2951_vm4, %v3825_v52, 0.0 }
 0x14d   : > { %1192 = vrot.lane.b32.xlu0 %v3751_v41, %s2717_s27  ;;  %1194 = vrot.lane.b32.xlu1 %v3756_v61, %s2717_s27  ;;  %v661_v14 = vpop.permute.xlu1 %660  ;;  %v659_v4 = vpop.permute.xlu0 %658 }
 0x14e   : > { %v662_v48 = vsel %vm320_vm9, %v659_v4, %v661_v14  ;;  %v663_v53 = vsel %vm320_vm9, %v661_v14, %v659_v4 }
 0x14f   : > { %1627 = vmatprep.subr.mxu1 %v662_v48 }
 0x150   : > { %2575 = vmatpush2.msk.msra.mxu1 %vm234_vm8, %v663_v53 }
 0x151   : > { %759 = vrot.lane.b32.xlu0 %v3610_v34, %s2716_s26  ;;  %761 = vrot.lane.b32.xlu1 %v3605_v33, %s2716_s26  ;;  %v430_v60 = vpop.permute.xlu1 %429  ;;  %v428_v32 = vpop.permute.xlu0 %427 }
 0x152   : > { %v432_v36 = vsel %vm345_vm7, %v430_v60, %v428_v32  ;;  %v431_v38 = vsel %vm345_vm7, %v428_v32, %v430_v60 }
 0x153   : > { %2538 = vmatprep.subr.msk.mxu0 %vm237_vm6, %v432_v36 }
 0x154   : > { %1545 = vmatpush2.msra.mxu0 %v431_v38  ;;  %v2694_v38 = vld [vmem:[%s2764_s23 + $0x90] sm:$0xff] }
 0x155   : > { %751 = vrot.lane.b32.xlu0 %v4810_v31, %s2716_s26  ;;  %753 = vrot.lane.b32.xlu1 %v4809_v15, %s2716_s26  ;;  %v616_v34 = vpop.permute.xlu1 %615  ;;  %v614_v33 = vpop.permute.xlu0 %613  ;;  %v4818_v15 = vld [vmem:[#allocation5_spill] sm:$0xff] }
 0x156   : > { %2539 = vmatprep.subr.msk.mxu0 %vm2951_vm4, %v4816_v58  ;;  %v618_v63 = vsel %vm345_vm7, %v616_v34, %v614_v33  ;;  %v617_v12 = vsel %vm345_vm7, %v614_v33, %v616_v34  ;;  %v4823_v33 = vld [vmem:[#allocation23_spill] sm:$0xff] }
 0x157   : > { %2540 = vmatpush2.msk.msra.mxu0 %vm2959_vm5, %v4817_v13  ;;  %2576 = vmatprep.subr.msk.mxu1 %vm237_vm6, %v618_v63  ;;  %v4826_v58 = vld [vmem:[#allocation15_spill] sm:$0xff] }
 0x158   : > { %1548 = vmatprep.subr.mxu0 %v4818_v15  ;;  %1630 = vmatpush2.msra.mxu1 %v617_v12 }
 0x159   : > { %743 = vrot.lane.b32.xlu0 %v733_v56, %s2716_s26  ;;  %745 = vrot.lane.b32.xlu1 %v734_v43, %s2716_s26  ;;  %v608_v31 = vpop.permute.xlu1 %607  ;;  %v606_v59 = vpop.permute.xlu0 %605  ;;  %v3810_v56 = vld [vmem:[%s4739_s0] sm:$0xff] }
 0x15a   : > { %1549 = vmatpush2.msra.mxu0 %v4819_v23  ;;  %v610_v2 = vsel %vm345_vm7, %v608_v31, %v606_v59  ;;  %v609_v25 = vsel %vm345_vm7, %v606_v59, %v608_v31  ;;  %v4821_v43 = vld [vmem:[#allocation19_spill] sm:$0xff]  ;;  %v3897_v31 = vsel %vm302_vm0, %v3676_v49, %v3674_v6  ;;  %v3903_v59 = vsel %vm302_vm0, %v3674_v6, %v3676_v49 }
 0x15b   : > { %2541 = vmatprep.subr.msk.mxu0 %vm2926_vm1, %v4820_v29  ;;  %2577 = vmatprep.subr.msk.mxu1 %vm237_vm6, %v610_v2  ;;  %v903_v6 = vsel %vm2930_vm2, %v3903_v59, 0.0  ;;  %v904_v49 = vsel %vm2926_vm1, %v3897_v31, 0.0 }
 0x15c   : > { %2542 = vmatpush2.msk.msra.mxu0 %vm2930_vm2, %v4821_v43  ;;  %1632 = vmatpush2.msra.mxu1 %v609_v25 }
 0x15d   : > { %1184 = vrot.lane.b32.xlu0 %v3714_v40, %s2716_s26  ;;  %1186 = vrot.lane.b32.xlu1 %v3709_v39, %s2716_s26  ;;  %v1110_v11 = vpop.permute.xlu1 %1109  ;;  %v1108_v14 = vpop.permute.xlu0 %1107  ;;  %v3847_v39 = vsel %vm2959_vm5, %v3819_v30, 0.0 }
 0x15e   : > { %v1112_v4 = vsel %vm345_vm7, %v1110_v11, %v1108_v14  ;;  %1634 = vmatmul.mubr.f32.vlgmr.msra.gmra.mxu1 %v3810_v56  ;;  %v1111_v48 = vsel %vm345_vm7, %v1108_v14, %v1110_v11  ;;  %v4827_v14 = vld [vmem:[#allocation25_spill] sm:$0xff] }
 0x15f   : > { %2608 = vmatprep.subr.msk.mxu1 %vm237_vm6, %v1112_v4  ;;  %1775 = vmatprep.mubr.f32.mxu1 %v4822_v24  ;;  %v4828_v4 = vld [vmem:[#allocation24_spill] sm:$0xff] }
 0x160   : > { %1712 = vmatpush1.msra.mxu1 %v1111_v48 }
 0x161   : > { %955 = vrot.lane.b32.xlu1 %v3842_v0, %s2717_s27  ;;  %953 = vrot.lane.b32.xlu0 %v3847_v39, %s2717_s27  ;;  %v422_v40 = vpop.permute.xlu1 %421  ;;  %v420_v53 = vpop.permute.xlu0 %419 }
 0x162   : > { %2609 = vmatprep.subr.msk.mxu1 %vm2951_vm4, %v3259_v17  ;;  %v423_v60 = vsel %vm320_vm9, %v420_v53, %v422_v40  ;;  %v424_v32 = vsel %vm320_vm9, %v422_v40, %v420_v53 }
 0x163   : > { %2610 = vmatpush1.msk.msra.mxu1 %vm2959_vm5, %v3253_v16  ;;  %1552 = vmatprep.subr.mxu0 %v423_v60 }
 0x164   : > { %1715 = vmatprep.subr.mxu1 %v2837_v10  ;;  %2543 = vmatpush2.msk.msra.mxu0 %vm234_vm8, %v424_v32  ;;  %v2719_v10 = vmov 0   ;;  %v2695_v32 = vld [vmem:[%s2764_s23 + $0x98] sm:$0xff] }
 0x165   : > { %1178 = vrot.lane.b32.xlu1 %v4814_v46, %s2716_s26  ;;  %1176 = vrot.lane.b32.xlu0 %v4815_v45, %s2716_s26  ;;  %v414_v17 = vpop.permute.xlu1 %413  ;;  %v412_v36 = vpop.permute.xlu0 %411  ;;  %v4824_v46 = vld [vmem:[#allocation22_spill] sm:$0xff]  ;;  %v4825_v45 = vld [vmem:[#allocation16_spill] sm:$0xff] }
 0x166   : > { %1716 = vmatpush1.msra.mxu1 %v2694_v38  ;;  %v415_v34 = vsel %vm320_vm9, %v412_v36, %v414_v17  ;;  %v416_v16 = vsel %vm320_vm9, %v414_v17, %v412_v36  ;;  %2693 = vset.pattern.permute.xlu0 %v2719_v10 }
 0x167   : > { %2611 = vmatprep.subr.msk.mxu1 %vm2926_vm1, %v4823_v33  ;;  %1554 = vmatprep.subr.mxu0 %v415_v34 }
 0x168   : > { %2612 = vmatpush1.msk.msra.mxu1 %vm2930_vm2, %v4824_v46  ;;  %2544 = vmatpush2.msk.msra.mxu0 %vm234_vm8, %v416_v16 }
 0x169   : > { %947 = vrot.lane.b32.xlu1 %v4825_v45, %s2717_s27  ;;  %945 = vrot.lane.b32.xlu0 %v4826_v58, %s2717_s27  ;;  %v406_v63 = vpop.permute.xlu1 %405  ;;  %v404_v12 = vpop.permute.xlu0 %403 }
 0x16a   : > { %v407_v13 = vsel %vm320_vm9, %v404_v12, %v406_v63  ;;  %v408_v15 = vsel %vm320_vm9, %v406_v63, %v404_v12 }
 0x16b   : > { %1556 = vmatprep.subr.mxu0 %v407_v13 }
 0x16c   : > { %2545 = vmatpush2.msk.msra.mxu0 %vm234_vm8, %v408_v15  ;;  %v2696_v15 = vld [vmem:[%s2764_s23 + $0x68] sm:$0xff] }
 0x16d   : > { %1170 = vrot.lane.b32.xlu1 %v3756_v61, %s2716_s26  ;;  %1168 = vrot.lane.b32.xlu0 %v3751_v41, %s2716_s26  ;;  %v1102_v23 = vpop.permute.xlu1 %1101  ;;  %v1100_v2 = vpop.permute.xlu0 %1099 }
 0x16e   : > { %v1104_v25 = vsel %vm320_vm9, %v1102_v23, %v1100_v2  ;;  %v1103_v29 = vsel %vm320_vm9, %v1100_v2, %v1102_v23  ;;  %v2697_v23 = vld [vmem:[%s2764_s23 + $0x60] sm:$0xff] }
 0x16f   : > { %1719 = vmatprep.subr.mxu1 %v1103_v29 }
 0x170   : > { %2613 = vmatpush1.msk.msra.mxu1 %vm234_vm8, %v1104_v25 }
 0x171   : > { %937 = vrot.lane.b32.xlu0 %v903_v6, %s2717_s27  ;;  %939 = vrot.lane.b32.xlu1 %v904_v49, %s2717_s27  ;;  %v361_v41 = vpop.permute.xlu1 %360  ;;  %v359_v61 = vpop.permute.xlu0 %358 }
 0x172   : > { %v363_v43 = vsel %vm345_vm7, %v361_v41, %v359_v61  ;;  %v362_v11 = vsel %vm345_vm7, %v359_v61, %v361_v41 }
 0x173   : > { %2546 = vmatprep.subr.msk.mxu0 %vm237_vm6, %v363_v43  ;;  %v2698_v43 = vld [vmem:[%s2764_s23 + $0x88] sm:$0xff] }
 0x174   : > { %1559 = vmatpush2.msra.mxu0 %v362_v11  ;;  %v2699_v11 = vld [vmem:[%s2764_s23 + $0x80] sm:$0xff] }
 0x175   : > { %1123 = vrot.lane.b32.xlu0 %v4827_v14, %s2717_s27  ;;  %1125 = vrot.lane.b32.xlu1 %v4828_v4, %s2717_s27  ;;  %v1094_v48 = vpop.permute.xlu1 %1093 }
 0x176   : > { %v1092_v40 = vpop.permute.xlu0 %1091 }
 0x177   : > { %v1096_v53 = vsel %vm320_vm9, %v1094_v48, %v1092_v40  ;;  %v1095_v60 = vsel %vm320_vm9, %v1092_v40, %v1094_v48 }
 0x178   : > { %1721 = vmatprep.subr.mxu1 %v1095_v60 }
 0x179   : > { %1115 = vrot.lane.b32.xlu0 %v2694_v38, %s2717_s27  ;;  %1117 = vrot.lane.b32.xlu1 %v2695_v32, %s2717_s27  ;;  %v353_v17 = vpop.permute.xlu1 %352 }
 0x17a   : > { %2614 = vmatpush1.msk.msra.mxu1 %vm234_vm8, %v1096_v53  ;;  %v351_v36 = vpop.permute.xlu0 %350 }
 0x17b   : > { %v355_v34 = vsel %vm345_vm7, %v353_v17, %v351_v36  ;;  %v354_v16 = vsel %vm345_vm7, %v351_v36, %v353_v17 }
 0x17c   : > { %2547 = vmatprep.subr.msk.mxu0 %vm237_vm6, %v355_v34 }
 0x17d   : > { %929 = vrot.lane.b32.xlu0 %v3847_v39, %s2716_s26  ;;  %931 = vrot.lane.b32.xlu1 %v3842_v0, %s2716_s26  ;;  %v1086_v38 = vpop.permute.xlu1 %1085 }
 0x17e   : > { %1561 = vmatpush2.msra.mxu0 %v354_v16  ;;  %v1084_v10 = vpop.permute.xlu0 %1083 }
 0x17f   : > { %v1088_v33 = vsel %vm320_vm9, %v1086_v38, %v1084_v10  ;;  %v1087_v46 = vsel %vm320_vm9, %v1084_v10, %v1086_v38  ;;  %1563 = vmatmul.mubr.f32.vlgmr.msra.gmra.mxu0 %v3810_v56 }
 0x180   : > { %1723 = vmatprep.subr.mxu1 %v1087_v46  ;;  %1704 = vmatprep.mubr.f32.mxu0 %v4822_v24 }
 0x181   : > { %921 = vrot.lane.b32.xlu0 %v4826_v58, %s2716_s26  ;;  %923 = vrot.lane.b32.xlu1 %v4825_v45, %s2716_s26  ;;  %v855_v0 = vpop.permute.xlu1 %854 }
 0x182   : > { %2615 = vmatpush1.msk.msra.mxu1 %vm234_vm8, %v1088_v33  ;;  %v853_v39 = vpop.permute.xlu0 %852 }
 0x183   : > { %v857_v63 = vsel %vm345_vm7, %v855_v0, %v853_v39  ;;  %v856_v12 = vsel %vm345_vm7, %v853_v39, %v855_v0 }
 0x184   : > { %2578 = vmatprep.subr.msk.mxu0 %vm237_vm6, %v857_v63 }
 0x185   : > { %913 = vrot.lane.b32.xlu0 %v903_v6, %s2716_s26  ;;  %915 = vrot.lane.b32.xlu1 %v904_v49, %s2716_s26 }
 0x186   : > { %1641 = vmatpush1.msra.mxu0 %v856_v12  ;;  %v1041_v24 = vpop.permute.xlu1 %1040 }
 0x187   : > { %2579 = vmatprep.subr.msk.mxu0 %vm2951_vm4, %v3506_v57  ;;  %v1039_v45 = vpop.permute.xlu0 %1038 }
 0x188   : > { %2580 = vmatpush1.msk.msra.mxu0 %vm2959_vm5, %v3500_v47  ;;  %v1043_v58 = vsel %vm345_vm7, %v1041_v24, %v1039_v45  ;;  %v1042_v13 = vsel %vm345_vm7, %v1039_v45, %v1041_v24 }
 0x189   : > { %868 = vrot.lane.b32.xlu0 %v3526_v62, %s2717_s27  ;;  %870 = vrot.lane.b32.xlu1 %v3521_v54, %s2717_s27 }
 0x18a   : > { %1644 = vmatprep.subr.mxu0 %v2696_v15  ;;  %2616 = vmatprep.subr.msk.mxu1 %vm237_vm6, %v1043_v58  ;;  %v1033_v57 = vpop.permute.xlu1 %1032 }
 0x18b   : > { %1645 = vmatpush1.msra.mxu0 %v2697_v23  ;;  %1726 = vmatpush1.msra.mxu1 %v1042_v13  ;;  %v1031_v47 = vpop.permute.xlu0 %1030 }
 0x18c   : > { %2581 = vmatprep.subr.msk.mxu0 %vm2926_vm1, %v3339_v9  ;;  %v1035_v62 = vsel %vm345_vm7, %v1033_v57, %v1031_v47  ;;  %v1034_v54 = vsel %vm345_vm7, %v1031_v47, %v1033_v57  ;;  %v1492_v9 = vld [vmem:[%s4740_s1] sm:$0xff] }
 0x18d   : > { %2582 = vmatpush1.msk.msra.mxu0 %vm2930_vm2, %v3348_v18  ;;  %860 = vrot.lane.b32.xlu0 %v2697_v23, %s2717_s27 }
 0x18e   : > { %862 = vrot.lane.b32.xlu1 %v2696_v15, %s2717_s27  ;;  %2617 = vmatprep.subr.msk.mxu1 %vm237_vm6, %v1035_v62 }
 0x18f   : > { %1728 = vmatpush1.msra.mxu1 %v1034_v54  ;;  %v1025_v2 = vpop.permute.xlu1 %1024  ;;  %v1023_v25 = vpop.permute.xlu0 %1022 }
 0x190   : > { %v1027_v29 = vsel %vm345_vm7, %v1025_v2, %v1023_v25  ;;  %v1026_v18 = vsel %vm345_vm7, %v1023_v25, %v1025_v2 }
 0x191   : > { %2618 = vmatprep.subr.msk.mxu1 %vm237_vm6, %v1027_v29  ;;  %1495 = vperm.xlu0 %2693, %v1492_v9   ;;  %v2700_v29 = vld [vmem:[%s2764_s23 + $0x58] sm:$0xff] }
 0x192   : > { %1730 = vmatpush1.msra.mxu1 %v1026_v18  ;;  %v2701_v18 = vld [vmem:[%s2764_s23 + $0x50] sm:$0xff] }
 0x193   : > { %v847_v6 = vpop.permute.xlu1 %846  ;;  %2619 = vmatprep.subr.msk.mxu1 %vm2951_vm4, %v3386_v50  ;;  %v845_v49 = vpop.permute.xlu0 %844 }
 0x194   : > { %v849_v41 = vsel %vm320_vm9, %v847_v6, %v845_v49  ;;  %2620 = vmatpush1.msk.msra.mxu1 %vm2959_vm5, %v3395_v20  ;;  %v848_v61 = vsel %vm320_vm9, %v845_v49, %v847_v6 }
 0x195   : > { %1648 = vmatprep.subr.mxu0 %v848_v61  ;;  %1733 = vmatprep.subr.mxu1 %v2698_v43 }
 0x196   : > { %2583 = vmatpush1.msk.msra.mxu0 %vm234_vm8, %v849_v41  ;;  %1734 = vmatpush1.msra.mxu1 %v2699_v11 }
 0x197   : > { %v839_v50 = vpop.permute.xlu1 %838  ;;  %2621 = vmatprep.subr.msk.mxu1 %vm2926_vm1, %v3452_v1  ;;  %v837_v14 = vpop.permute.xlu0 %836 }
 0x198   : > { %v841_v20 = vsel %vm320_vm9, %v839_v50, %v837_v14  ;;  %2622 = vmatpush1.msk.msra.mxu1 %vm2930_vm2, %v3458_v51  ;;  %v840_v4 = vsel %vm320_vm9, %v837_v14, %v839_v50 }
 0x199   : > { %1650 = vmatprep.subr.mxu0 %v840_v4  ;;  %v2703_v4 = vld [vmem:[%s2764_s23 + $0xa0] sm:$0xff] }
 0x19a   : > { %2584 = vmatpush1.msk.msra.mxu0 %vm234_vm8, %v841_v20  ;;  %v2702_v20 = vld [vmem:[%s2764_s23 + $0xa8] sm:$0xff] }
 0x19b   : > { %v831_v48 = vpop.permute.xlu1 %830  ;;  %v829_v40 = vpop.permute.xlu0 %828 }
 0x19c   : > { %v833_v1 = vsel %vm320_vm9, %v831_v48, %v829_v40  ;;  %v832_v53 = vsel %vm320_vm9, %v829_v40, %v831_v48 }
 0x19d   : > { %1652 = vmatprep.subr.mxu0 %v832_v53 }
 0x19e   : > { %2585 = vmatpush1.msk.msra.mxu0 %vm234_vm8, %v833_v1 }
 0x19f   : > { %v1017_v51 = vpop.permute.xlu1 %1016  ;;  %v1015_v60 = vpop.permute.xlu0 %1014 }
 0x1a0   : > { %v1019_v32 = vsel %vm320_vm9, %v1017_v51, %v1015_v60  ;;  %v1018_v17 = vsel %vm320_vm9, %v1015_v60, %v1017_v51 }
 0x1a1   : > { %1737 = vmatprep.subr.mxu1 %v1018_v17 }
 0x1a2   : > { %2623 = vmatpush1.msk.msra.mxu1 %vm234_vm8, %v1019_v32 }
 0x1a3   : > { %v786_v36 = vpop.permute.xlu1 %785  ;;  %v784_v34 = vpop.permute.xlu0 %783 }
 0x1a4   : > { %v788_v16 = vsel %vm345_vm7, %v786_v36, %v784_v34  ;;  %v787_v38 = vsel %vm345_vm7, %v784_v34, %v786_v36 }
 0x1a5   : > { %2586 = vmatprep.subr.msk.mxu0 %vm237_vm6, %v788_v16 }
 0x1a6   : > { %1655 = vmatpush1.msra.mxu0 %v787_v38 }
 0x1a7   : > { %v1009_v10 = vpop.permute.xlu1 %1008  ;;  %v1007_v33 = vpop.permute.xlu0 %1006 }
 0x1a8   : > { %v1011_v46 = vsel %vm320_vm9, %v1009_v10, %v1007_v33  ;;  %v1010_v0 = vsel %vm320_vm9, %v1007_v33, %v1009_v10 }
 0x1a9   : > { %1739 = vmatprep.subr.mxu1 %v1010_v0 }
 0x1aa   : > { %2624 = vmatpush1.msk.msra.mxu1 %vm234_vm8, %v1011_v46 }
 0x1ab   : > { %v778_v39 = vpop.permute.xlu1 %777  ;;  %v776_v63 = vpop.permute.xlu0 %775 }
 0x1ac   : > { %v780_v12 = vsel %vm345_vm7, %v778_v39, %v776_v63  ;;  %v779_v24 = vsel %vm345_vm7, %v776_v63, %v778_v39 }
 0x1ad   : > { %2587 = vmatprep.subr.msk.mxu0 %vm237_vm6, %v780_v12 }
 0x1ae   : > { %1657 = vmatpush1.msra.mxu0 %v779_v24 }
 0x1af   : > { %v1001_v45 = vpop.permute.xlu1 %1000  ;;  %v999_v58 = vpop.permute.xlu0 %998 }
 0x1b0   : > { %v1003_v13 = vsel %vm320_vm9, %v1001_v45, %v999_v58  ;;  %v1002_v15 = vsel %vm320_vm9, %v999_v58, %v1001_v45 }
 0x1b1   : > { %1741 = vmatprep.subr.mxu1 %v1002_v15 }
 0x1b2   : > { %2625 = vmatpush1.msk.msra.mxu1 %vm234_vm8, %v1003_v13 }
 0x1b3   : > { %v770_v57 = vpop.permute.xlu1 %769  ;;  %v768_v23 = vpop.permute.xlu0 %767 }
 0x1b4   : > { %v772_v47 = vsel %vm345_vm7, %v770_v57, %v768_v23  ;;  %v771_v62 = vsel %vm345_vm7, %v768_v23, %v770_v57 }
 0x1b5   : > { %2588 = vmatprep.subr.msk.mxu0 %vm237_vm6, %v772_v47 }
 0x1b6   : > { %1659 = vmatpush1.msra.mxu0 %v771_v62 }
 0x1b7   : > { %v1211_v54 = vpop.permute.xlu1 %1210  ;;  %2589 = vmatprep.subr.msk.mxu0 %vm2951_vm4, %v3588_v42  ;;  %v1209_v9 = vpop.permute.xlu0 %1208 }
 0x1b8   : > { %2590 = vmatpush1.msk.msra.mxu0 %vm2959_vm5, %v3582_v55  ;;  %v1213_v2 = vsel %vm345_vm7, %v1211_v54, %v1209_v9  ;;  %v1212_v25 = vsel %vm345_vm7, %v1209_v9, %v1211_v54 }
 0x1b9   : > { %1662 = vmatprep.subr.mxu0 %v2700_v29  ;;  %2626 = vmatprep.subr.msk.mxu1 %vm237_vm6, %v1213_v2  ;;  %v2704_v29 = vld [vmem:[%s2764_s23 + $0x78] sm:$0xff] }
 0x1ba   : > { %1663 = vmatpush1.msra.mxu0 %v2701_v18  ;;  %1754 = vmatpush2.msra.mxu1 %v1212_v25  ;;  %v2705_v18 = vld [vmem:[%s2764_s23 + $0x70] sm:$0xff] }
 0x1bb   : > { %v1203_v42 = vpop.permute.xlu1 %1202  ;;  %2591 = vmatprep.subr.msk.mxu0 %vm2926_vm1, %v3662_v19  ;;  %v1201_v55 = vpop.permute.xlu0 %1200 }
 0x1bc   : > { %2592 = vmatpush1.msk.msra.mxu0 %vm2930_vm2, %v3668_v7  ;;  %v1205_v6 = vsel %vm345_vm7, %v1203_v42, %v1201_v55  ;;  %v1204_v49 = vsel %vm345_vm7, %v1201_v55, %v1203_v42 }
 0x1bd   : > { %2627 = vmatprep.subr.msk.mxu1 %vm237_vm6, %v1205_v6 }
 0x1be   : > { %1756 = vmatpush2.msra.mxu1 %v1204_v49 }
 0x1bf   : > { %v1195_v41 = vpop.permute.xlu1 %1194  ;;  %v1193_v61 = vpop.permute.xlu0 %1192 }
 0x1c0   : > { %v1197_v19 = vsel %vm345_vm7, %v1195_v41, %v1193_v61  ;;  %v1196_v7 = vsel %vm345_vm7, %v1193_v61, %v1195_v41 }
 0x1c1   : > { %2628 = vmatprep.subr.msk.mxu1 %vm237_vm6, %v1197_v19 }
 0x1c2   : > { %1758 = vmatpush2.msra.mxu1 %v1196_v7 }
 0x1c3   : > { %v762_v43 = vpop.permute.xlu1 %761  ;;  %2629 = vmatprep.subr.msk.mxu1 %vm2951_vm4, %v3696_v5  ;;  %v760_v11 = vpop.permute.xlu0 %759 }
 0x1c4   : > { %v764_v50 = vsel %vm320_vm9, %v762_v43, %v760_v11  ;;  %2630 = vmatpush2.msk.msra.mxu1 %vm2959_vm5, %v3690_v44  ;;  %v763_v14 = vsel %vm320_vm9, %v760_v11, %v762_v43 }
 0x1c5   : > { %1666 = vmatprep.subr.mxu0 %v763_v14  ;;  %1761 = vmatprep.subr.mxu1 %v2702_v20 }
 0x1c6   : > { %2593 = vmatpush1.msk.msra.mxu0 %vm234_vm8, %v764_v50  ;;  %1762 = vmatpush2.msra.mxu1 %v2703_v4 }
 0x1c7   : > { %v754_v5 = vpop.permute.xlu1 %753  ;;  %2631 = vmatprep.subr.msk.mxu1 %vm2926_vm1, %v3730_v3  ;;  %v752_v48 = vpop.permute.xlu0 %751 }
 0x1c8   : > { %v756_v44 = vsel %vm320_vm9, %v754_v5, %v752_v48  ;;  %2632 = vmatpush2.msk.msra.mxu1 %vm2930_vm2, %v3736_v26  ;;  %v755_v40 = vsel %vm320_vm9, %v752_v48, %v754_v5 }
 0x1c9   : > { %1668 = vmatprep.subr.mxu0 %v755_v40 }
 0x1ca   : > { %2594 = vmatpush1.msk.msra.mxu0 %vm234_vm8, %v756_v44 }
 0x1cb   : > { %v746_v1 = vpop.permute.xlu1 %745  ;;  %v744_v53 = vpop.permute.xlu0 %743 }
 0x1cc   : > { %v748_v3 = vsel %vm320_vm9, %v746_v1, %v744_v53  ;;  %v747_v51 = vsel %vm320_vm9, %v744_v53, %v746_v1 }
 0x1cd   : > { %1670 = vmatprep.subr.mxu0 %v747_v51 }
 0x1ce   : > { %2595 = vmatpush1.msk.msra.mxu0 %vm234_vm8, %v748_v3 }
 0x1cf   : > { %v1187_v26 = vpop.permute.xlu1 %1186  ;;  %v1185_v60 = vpop.permute.xlu0 %1184 }
 0x1d0   : > { %v1189_v32 = vsel %vm320_vm9, %v1187_v26, %v1185_v60  ;;  %v1188_v17 = vsel %vm320_vm9, %v1185_v60, %v1187_v26 }
 0x1d1   : > { %1765 = vmatprep.subr.mxu1 %v1188_v17 }
 0x1d2   : > { %2633 = vmatpush2.msk.msra.mxu1 %vm234_vm8, %v1189_v32 }
 0x1d3   : > { %v956_v36 = vpop.permute.xlu1 %955  ;;  %v954_v34 = vpop.permute.xlu0 %953 }
 0x1d4   : > { %v957_v16 = vsel %vm345_vm7, %v954_v34, %v956_v36  ;;  %v958_v38 = vsel %vm345_vm7, %v956_v36, %v954_v34 }
 0x1d5   : > { %2596 = vmatprep.subr.msk.mxu0 %vm237_vm6, %v958_v38 }
 0x1d6   : > { %1683 = vmatpush2.msra.mxu0 %v957_v16 }
 0x1d7   : > { %v1179_v10 = vpop.permute.xlu1 %1178  ;;  %v1177_v33 = vpop.permute.xlu0 %1176 }
 0x1d8   : > { %v1181_v46 = vsel %vm320_vm9, %v1179_v10, %v1177_v33  ;;  %v1180_v0 = vsel %vm320_vm9, %v1177_v33, %v1179_v10 }
 0x1d9   : > { %1767 = vmatprep.subr.mxu1 %v1180_v0 }
 0x1da   : > { %2634 = vmatpush2.msk.msra.mxu1 %vm234_vm8, %v1181_v46 }
 0x1db   : > { %v948_v39 = vpop.permute.xlu1 %947  ;;  %v946_v63 = vpop.permute.xlu0 %945 }
 0x1dc   : > { %v949_v12 = vsel %vm345_vm7, %v946_v63, %v948_v39  ;;  %v950_v24 = vsel %vm345_vm7, %v948_v39, %v946_v63 }
 0x1dd   : > { %2597 = vmatprep.subr.msk.mxu0 %vm237_vm6, %v950_v24 }
 0x1de   : > { %1685 = vmatpush2.msra.mxu0 %v949_v12 }
 0x1df   : > { %v1171_v45 = vpop.permute.xlu1 %1170  ;;  %v1169_v58 = vpop.permute.xlu0 %1168 }
 0x1e0   : > { %v1173_v13 = vsel %vm320_vm9, %v1171_v45, %v1169_v58  ;;  %v1172_v15 = vsel %vm320_vm9, %v1169_v58, %v1171_v45 }
 0x1e1   : > { %1769 = vmatprep.subr.mxu1 %v1172_v15 }
 0x1e2   : > { %2635 = vmatpush2.msk.msra.mxu1 %vm234_vm8, %v1173_v13 }
 0x1e3   : > { %v940_v57 = vpop.permute.xlu1 %939  ;;  %v938_v23 = vpop.permute.xlu0 %937 }
 0x1e4   : > { %v941_v47 = vsel %vm345_vm7, %v938_v23, %v940_v57  ;;  %v942_v62 = vsel %vm345_vm7, %v940_v57, %v938_v23 }
 0x1e5   : > { %2598 = vmatprep.subr.msk.mxu0 %vm237_vm6, %v942_v62 }
 0x1e6   : > { %1687 = vmatpush2.msra.mxu0 %v941_v47 }
 0x1e7   : > { %v1126_v54 = vpop.permute.xlu1 %1125  ;;  %2599 = vmatprep.subr.msk.mxu0 %vm2951_vm4, %v3825_v52  ;;  %v1124_v9 = vpop.permute.xlu0 %1123 }
 0x1e8   : > { %v1127_v2 = vsel %vm345_vm7, %v1124_v9, %v1126_v54  ;;  %v1128_v25 = vsel %vm345_vm7, %v1126_v54, %v1124_v9  ;;  %2600 = vmatpush2.msk.msra.mxu0 %vm2959_vm5, %v3819_v30 }
 0x1e9   : > { %1690 = vmatprep.subr.mxu0 %v2704_v29  ;;  %2636 = vmatprep.subr.msk.mxu1 %vm237_vm6, %v1128_v25 }
 0x1ea   : > { %1691 = vmatpush2.msra.mxu0 %v2705_v18  ;;  %1772 = vmatpush2.msra.mxu1 %v1127_v2 }
 0x1eb   : > { %v1118_v52 = vpop.permute.xlu1 %1117  ;;  %2601 = vmatprep.subr.msk.mxu0 %vm2926_vm1, %v3897_v31  ;;  %v1116_v42 = vpop.permute.xlu0 %1115 }
 0x1ec   : > { %v1119_v55 = vsel %vm345_vm7, %v1116_v42, %v1118_v52  ;;  %v1120_v30 = vsel %vm345_vm7, %v1118_v52, %v1116_v42  ;;  %2602 = vmatpush2.msk.msra.mxu0 %vm2930_vm2, %v3903_v59 }
 0x1ed   : > { %2637 = vmatprep.subr.msk.mxu1 %vm237_vm6, %v1120_v30 }
 0x1ee   : > { %1774 = vmatpush2.msra.mxu1 %v1119_v55 }
 0x1ef   : > { %v932_v6 = vpop.permute.xlu1 %931  ;;  %1776 = vmatmul.mubr.f32.vlgmr.msra.gmra.mxu1 %v3810_v56  ;;  %v930_v49 = vpop.permute.xlu0 %929 }
 0x1f0   : > { %v934_v31 = vsel %vm320_vm9, %v932_v6, %v930_v49  ;;  %v933_v41 = vsel %vm320_vm9, %v930_v49, %v932_v6 }
 0x1f1   : > { %1694 = vmatprep.subr.mxu0 %v933_v41 }
 0x1f2   : > { %2603 = vmatpush2.msk.msra.mxu0 %vm234_vm8, %v934_v31 }
 0x1f3   : > { %v924_v61 = vpop.permute.xlu1 %923  ;;  %v922_v59 = vpop.permute.xlu0 %921 }
 0x1f4   : > { %v926_v19 = vsel %vm320_vm9, %v924_v61, %v922_v59  ;;  %v925_v7 = vsel %vm320_vm9, %v922_v59, %v924_v61 }
 0x1f5   : > { %1696 = vmatprep.subr.mxu0 %v925_v7 }
 0x1f6   : > { %2604 = vmatpush2.msk.msra.mxu0 %vm234_vm8, %v926_v19 }
 0x1f7   : > { %v916_v43 = vpop.permute.xlu1 %915  ;;  %v914_v11 = vpop.permute.xlu0 %913 }
 0x1f8   : > { %v918_v50 = vsel %vm320_vm9, %v916_v43, %v914_v11  ;;  %v917_v14 = vsel %vm320_vm9, %v914_v11, %v916_v43 }
 0x1f9   : > { %1698 = vmatprep.subr.mxu0 %v917_v14 }
 0x1fa   : > { %2605 = vmatpush2.msk.msra.mxu0 %vm234_vm8, %v918_v50 }
 0x1fb   : > { %v871_v20 = vpop.permute.xlu1 %870  ;;  %v869_v4 = vpop.permute.xlu0 %868 }
 0x1fc   : > { %v872_v5 = vsel %vm345_vm7, %v869_v4, %v871_v20  ;;  %v873_v48 = vsel %vm345_vm7, %v871_v20, %v869_v4 }
 0x1fd   : > { %2606 = vmatprep.subr.msk.mxu0 %vm237_vm6, %v873_v48 }
 0x1fe   : > { %1701 = vmatpush2.msra.mxu0 %v872_v5 }
 0x1ff   : > { %v861_v44 = vpop.permute.xlu0 %860 }
 0x200   : > { %v863_v40 = vpop.permute.xlu1 %862 }
 0x201   : > { %v864_v1 = vsel %vm345_vm7, %v861_v44, %v863_v40  ;;  %v865_v53 = vsel %vm345_vm7, %v863_v40, %v861_v44 }
 0x202   : > { %2607 = vmatprep.subr.msk.mxu0 %vm237_vm6, %v865_v53 }
 0x203   : > { %1703 = vmatpush2.msra.mxu0 %v864_v1 }
 0x204   : > { %1705 = vmatmul.mubr.f32.vlgmr.msra.gmra.mxu0 %v3810_v56 }
 0x20c   : > { %v1496_v3 = vpop.permute.xlu0 %1495 }
 0x21e   : > { %v1635_v26 = vpop.f32.mrf.mxu1 }
 0x21f   : > { %v1636_v32 = vadd.f32 %v1635_v26, %v1496_v3  ;;  %v2155_v26 = vld [vmem:[%s4741_s2 + $0x8] sm:$0xff] }
 0x220   : > { %v1637_v56 = vpop.f32.mrf.mxu1  ;;  %2354 = vmatprep.mubr.f32.mxu0 %v2155_v26  ;;  %2425 = vmatprep.mubr.f32.mxu1 %v2155_v26 }
 0x221   : > { %v4245_v38 = vmax.f32 %v1636_v32, 0.0  ;;  %v1638_v10 = vadd.f32 %v1637_v56, %v1496_v3 }
 0x223   : > { %v4253_v33 = vmax.f32 %v1638_v10, 0.0 }
 0x23f   : > { %v1564_v51 = vpop.f32.mrf.mxu0 }
 0x240   : > { %v1565_v60 = vadd.f32 %v1564_v51, %v1496_v3 }
 0x241   : > { %v1566_v17 = vpop.f32.mrf.mxu0 }
 0x242   : > { %v1567_v36 = vadd.f32 %v1566_v17, %v1496_v3  ;;  %v4239_v34 = vmax.f32 %v1565_v60, 0.0 }
 0x244   : > { %v4241_v16 = vmax.f32 %v1567_v36, 0.0  ;;  %1826 = vrot.lane.b32.xlu1 %v4239_v34, %s2715_s25  ;;  %1834 = vrot.lane.b32.xlu0 %v4239_v34, %s2714_s24 }
 0x248   : > { %1828 = vrot.lane.b32.xlu1 %v4241_v16, %s2715_s25  ;;  %1916 = vrot.lane.b32.xlu0 %v4245_v38, %s2714_s24 }
 0x24c   : > { %1836 = vrot.lane.b32.xlu1 %v4241_v16, %s2714_s24  ;;  %1908 = vrot.lane.b32.xlu0 %v4245_v38, %s2715_s25 }
 0x250   : > { %1918 = vrot.lane.b32.xlu1 %v4253_v33, %s2714_s24  ;;  %1850 = vrot.lane.b32.xlu0 %v4239_v34, %s2716_s26 }
 0x254   : > { %1910 = vrot.lane.b32.xlu1 %v4253_v33, %s2715_s25  ;;  %1956 = vrot.lane.b32.xlu0 %v4245_v38, %s2717_s27 }
 0x258   : > { %1852 = vrot.lane.b32.xlu1 %v4241_v16, %s2716_s26  ;;  %1932 = vrot.lane.b32.xlu0 %v4245_v38, %s2716_s26 }
 0x25c   : > { %1958 = vrot.lane.b32.xlu1 %v4253_v33, %s2717_s27 }
 0x260   : > { %1934 = vrot.lane.b32.xlu1 %v4253_v33, %s2716_s26 }
 0x2af   : > { %v1777_v46 = vpop.f32.mrf.mxu1 }
 0x2b0   : > { %v1778_v0 = vadd.f32 %v1777_v46, %v1496_v3 }
 0x2b1   : > { %v1779_v39 = vpop.f32.mrf.mxu1 }
 0x2b2   : > { %v4275_v63 = vmax.f32 %v1778_v0, 0.0  ;;  %v1780_v12 = vadd.f32 %v1779_v39, %v1496_v3 }
 0x2b4   : > { %v4277_v24 = vmax.f32 %v1780_v12, 0.0  ;;  %2072 = vrot.lane.b32.xlu0 %v4275_v63, %s2715_s25 }
 0x2b6   : > { %2074 = vrot.lane.b32.xlu1 %v4277_v24, %s2715_s25  ;;  %v1827_v45 = vpop.permute.xlu1 %1826  ;;  %v1835_v58 = vpop.permute.xlu0 %1834 }
 0x2b8   : > { %2080 = vrot.lane.b32.xlu0 %v4275_v63, %s2714_s24 }
 0x2ba   : > { %2082 = vrot.lane.b32.xlu1 %v4277_v24, %s2714_s24  ;;  %v1829_v13 = vpop.permute.xlu1 %1828  ;;  %v1917_v15 = vpop.permute.xlu0 %1916 }
 0x2bb   : > { %v4325_v61 = vsel %vm302_vm0, %v1829_v13, %v1827_v45  ;;  %v4331_v59 = vsel %vm302_vm0, %v1827_v45, %v1829_v13 }
 0x2bc   : > { %v1832_v19 = vsel %vm2930_vm2, %v4325_v61, 0.0  ;;  %v1833_v43 = vsel %vm2926_vm1, %v4331_v59, 0.0 }
 0x2be   : > { %v1837_v57 = vpop.permute.xlu1 %1836  ;;  %v1909_v47 = vpop.permute.xlu0 %1908 }
 0x2bf   : > { %v4340_v7 = vsel %vm311_vm3, %v1835_v58, %v1837_v57  ;;  %v4348_v11 = vsel %vm311_vm3, %v1837_v57, %v1835_v58 }
 0x2c0   : > { %v1840_v50 = vsel %vm2959_vm5, %v4340_v7, 0.0  ;;  %v1841_v14 = vsel %vm2951_vm4, %v4348_v11, 0.0 }
 0x2c2   : > { %v1919_v23 = vpop.permute.xlu1 %1918  ;;  %v1851_v18 = vpop.permute.xlu0 %1850 }
 0x2c3   : > { %v4361_v20 = vsel %vm311_vm3, %v1917_v15, %v1919_v23  ;;  %v4365_v4 = vsel %vm311_vm3, %v1919_v23, %v1917_v15 }
 0x2c4   : > { %v1706_v62 = vpop.f32.mrf.mxu0  ;;  %v1922_v5 = vsel %vm2959_vm5, %v4361_v20, 0.0  ;;  %v1923_v44 = vsel %vm2951_vm4, %v4365_v4, 0.0 }
 0x2c5   : > { %v1707_v54 = vadd.f32 %v1706_v62, %v1496_v3 }
 0x2c6   : > { %v1708_v9 = vpop.f32.mrf.mxu0  ;;  %v1911_v2 = vpop.permute.xlu1 %1910 }
 0x2c7   : > { %v4287_v25 = vmax.f32 %v1707_v54, 0.0  ;;  %v1709_v29 = vadd.f32 %v1708_v9, %v1496_v3  ;;  %v1957_v6 = vpop.permute.xlu0 %1956  ;;  %v4374_v48 = vsel %vm302_vm0, %v1911_v2, %v1909_v47  ;;  %v4381_v40 = vsel %vm302_vm0, %v1909_v47, %v1911_v2 }
 0x2c8   : > { %v1914_v1 = vsel %vm2930_vm2, %v4374_v48, 0.0  ;;  %v1915_v53 = vsel %vm2926_vm1, %v4381_v40, 0.0 }
 0x2c9   : > { %v4289_v52 = vmax.f32 %v1709_v29, 0.0  ;;  %1998 = vrot.lane.b32.xlu0 %v4287_v25, %s2714_s24 }
 0x2ca   : > { %v1853_v42 = vpop.permute.xlu1 %1852 }
 0x2cb   : > { %2000 = vrot.lane.b32.xlu1 %v4289_v52, %s2714_s24  ;;  %v4297_v55 = vsel %vm320_vm9, %v1853_v42, %v1851_v18  ;;  %v4301_v30 = vsel %vm320_vm9, %v1851_v18, %v1853_v42  ;;  %v4399_v3 = vpop.permute.xlu0 %1932 }
 0x2cd   : > { %1990 = vrot.lane.b32.xlu0 %v4287_v25, %s2715_s25 }
 0x2ce   : > { %v1959_v49 = vpop.permute.xlu1 %1958 }
 0x2cf   : > { %1992 = vrot.lane.b32.xlu1 %v4289_v52, %s2715_s25  ;;  %v4309_v31 = vsel %vm345_vm7, %v1957_v6, %v1959_v49  ;;  %v4313_v41 = vsel %vm345_vm7, %v1959_v49, %v1957_v6 }
 0x2d1   : > { %2096 = vrot.lane.b32.xlu0 %v4275_v63, %s2716_s26 }
 0x2d2   : > { %v4401_v51 = vpop.permute.xlu1 %1934 }
 0x2d3   : > { %2098 = vrot.lane.b32.xlu1 %v4277_v24, %s2716_s26 }
 0x2d5   : > { %2038 = vrot.lane.b32.xlu0 %v4287_v25, %s2717_s27 }
 0x2d7   : > { %2040 = vrot.lane.b32.xlu1 %v4289_v52, %s2717_s27 }
 0x2d9   : > { %2014 = vrot.lane.b32.xlu0 %v4287_v25, %s2716_s26 }
 0x2db   : > { %2016 = vrot.lane.b32.xlu1 %v4289_v52, %s2716_s26 }
 0x2dd   : > { %1866 = vrot.lane.b32.xlu0 %v1832_v19, %s2717_s27 }
 0x2df   : > { %1868 = vrot.lane.b32.xlu1 %v1833_v43, %s2717_s27 }
 0x2e1   : > { %1858 = vrot.lane.b32.xlu0 %v1840_v50, %s2716_s26 }
 0x2e3   : > { %1860 = vrot.lane.b32.xlu1 %v1841_v14, %s2716_s26 }
 0x2e5   : > { %1842 = vrot.lane.b32.xlu0 %v1832_v19, %s2716_s26 }
 0x2e7   : > { %1844 = vrot.lane.b32.xlu1 %v1833_v43, %s2716_s26 }
 0x2e9   : > { %1964 = vrot.lane.b32.xlu0 %v1922_v5, %s2717_s27 }
 0x2eb   : > { %1966 = vrot.lane.b32.xlu1 %v1923_v44, %s2717_s27 }
 0x2ed   : > { %1948 = vrot.lane.b32.xlu0 %v1914_v1, %s2717_s27 }
 0x2ef   : > { %1950 = vrot.lane.b32.xlu1 %v1915_v53, %s2717_s27 }
 0x2f1   : > { %1940 = vrot.lane.b32.xlu0 %v1922_v5, %s2716_s26 }
 0x2f3   : > { %1942 = vrot.lane.b32.xlu1 %v1923_v44, %s2716_s26 }
 0x2f5   : > { %1924 = vrot.lane.b32.xlu0 %v1914_v1, %s2716_s26 }
 0x2f7   : > { %1926 = vrot.lane.b32.xlu1 %v1915_v53, %s2716_s26 }
 0x2f9   : > { %1882 = vrot.lane.b32.xlu0 %v1840_v50, %s2717_s27 }
 0x2fb   : > { %1884 = vrot.lane.b32.xlu1 %v1841_v14, %s2717_s27 }
 0x326   : > { %v2073_v60 = vpop.permute.xlu0 %2072 }
 0x328   : > { %v2075_v32 = vpop.permute.xlu1 %2074 }
 0x329   : > { %v4408_v17 = vsel %vm302_vm0, %v2073_v60, %v2075_v32  ;;  %v4412_v36 = vsel %vm302_vm0, %v2075_v32, %v2073_v60 }
 0x32a   : > { %v2078_v56 = vsel %vm2930_vm2, %v4412_v36, 0.0  ;;  %v2079_v10 = vsel %vm2926_vm1, %v4408_v17, 0.0  ;;  %v2081_v0 = vpop.permute.xlu0 %2080 }
 0x32b   : > { %2112 = vrot.lane.b32.xlu0 %v2078_v56, %s2717_s27  ;;  %2114 = vrot.lane.b32.xlu1 %v2079_v10, %s2717_s27 }
 0x32c   : > { %v2083_v46 = vpop.permute.xlu1 %2082 }
 0x32d   : > { %v4424_v39 = vsel %vm311_vm3, %v2081_v0, %v2083_v46  ;;  %v4428_v12 = vsel %vm311_vm3, %v2083_v46, %v2081_v0  ;;  %v2284_v0 = vld [vmem:[%s4742_s3] sm:$0xff] }
 0x32e   : > { %v2086_v45 = vsel %vm2959_vm5, %v4424_v39, 0.0  ;;  %v2087_v58 = vsel %vm2951_vm4, %v4428_v12, 0.0 }
 0x32f   : > { %1874 = vrot.lane.b32.xlu0 %v4239_v34, %s2717_s27  ;;  %1876 = vrot.lane.b32.xlu1 %v4241_v16, %s2717_s27 }
 0x333   : > { %2106 = vrot.lane.b32.xlu1 %v2087_v58, %s2716_s26  ;;  %2104 = vrot.lane.b32.xlu0 %v2086_v45, %s2716_s26 }
 0x337   : > { %2090 = vrot.lane.b32.xlu1 %v2079_v10, %s2716_s26  ;;  %2088 = vrot.lane.b32.xlu0 %v2078_v56, %s2716_s26 }
 0x33b   : > { %v1999_v13 = vpop.permute.xlu0 %1998 }
 0x33d   : > { %v2001_v15 = vpop.permute.xlu1 %2000 }
 0x33e   : > { %v4446_v57 = vsel %vm311_vm3, %v1999_v13, %v2001_v15  ;;  %v4450_v23 = vsel %vm311_vm3, %v2001_v15, %v1999_v13 }
 0x33f   : > { %v2004_v47 = vsel %vm2959_vm5, %v4446_v57, 0.0  ;;  %v2005_v62 = vsel %vm2951_vm4, %v4450_v23, 0.0  ;;  %v1991_v54 = vpop.permute.xlu0 %1990 }
 0x340   : > { %2048 = vrot.lane.b32.xlu1 %v2005_v62, %s2717_s27  ;;  %2046 = vrot.lane.b32.xlu0 %v2004_v47, %s2717_s27 }
 0x341   : > { %v1993_v9 = vpop.permute.xlu1 %1992 }
 0x342   : > { %v4462_v2 = vsel %vm302_vm0, %v1991_v54, %v1993_v9  ;;  %v4466_v29 = vsel %vm302_vm0, %v1993_v9, %v1991_v54 }
 0x343   : > { %v1996_v18 = vsel %vm2930_vm2, %v4466_v29, 0.0  ;;  %v1997_v42 = vsel %vm2926_vm1, %v4462_v2, 0.0  ;;  %v2097_v6 = vpop.permute.xlu0 %2096 }
 0x344   : > { %2030 = vrot.lane.b32.xlu0 %v1996_v18, %s2717_s27  ;;  %2032 = vrot.lane.b32.xlu1 %v1997_v42, %s2717_s27 }
 0x345   : > { %v2099_v49 = vpop.permute.xlu1 %2098 }
 0x346   : > { %v4478_v19 = vsel %vm320_vm9, %v2099_v49, %v2097_v6  ;;  %v4482_v43 = vsel %vm320_vm9, %v2097_v6, %v2099_v49 }
 0x347   : > { %v2039_v50 = vpop.permute.xlu0 %2038 }
 0x348   : > { %2022 = vrot.lane.b32.xlu0 %v2004_v47, %s2716_s26  ;;  %2024 = vrot.lane.b32.xlu1 %v2005_v62, %s2716_s26 }
 0x349   : > { %v2041_v14 = vpop.permute.xlu1 %2040 }
 0x34a   : > { %v4488_v5 = vsel %vm345_vm7, %v2039_v50, %v2041_v14  ;;  %v4492_v44 = vsel %vm345_vm7, %v2041_v14, %v2039_v50 }
 0x34b   : > { %v2015_v1 = vpop.permute.xlu0 %2014 }
 0x34c   : > { %2006 = vrot.lane.b32.xlu0 %v1996_v18, %s2716_s26  ;;  %2008 = vrot.lane.b32.xlu1 %v1997_v42, %s2716_s26 }
 0x34d   : > { %v2017_v53 = vpop.permute.xlu1 %2016 }
 0x34e   : > { %v4498_v26 = vsel %vm320_vm9, %v2017_v53, %v2015_v1  ;;  %v4502_v60 = vsel %vm320_vm9, %v2015_v1, %v2017_v53 }
 0x34f   : > { %v1867_v32 = vpop.permute.xlu0 %1866 }
 0x350   : > { %2128 = vrot.lane.b32.xlu0 %v2086_v45, %s2717_s27  ;;  %2130 = vrot.lane.b32.xlu1 %v2087_v58, %s2717_s27 }
 0x351   : > { %v1869_v56 = vpop.permute.xlu1 %1868 }
 0x352   : > { %v1870_v10 = vsel %vm345_vm7, %v1867_v32, %v1869_v56  ;;  %v1871_v46 = vsel %vm345_vm7, %v1869_v56, %v1867_v32 }
 0x353   : > { %2638 = vmatprep.subr.msk.mxu0 %vm237_vm6, %v1871_v46  ;;  %v1859_v45 = vpop.permute.xlu0 %1858  ;;  %v4644_v46 = vld [vmem:[%s4741_s2] sm:$0xff] }
 0x354   : > { %2120 = vrot.lane.b32.xlu0 %v4275_v63, %s2717_s27  ;;  %2122 = vrot.lane.b32.xlu1 %v4277_v24, %s2717_s27 }
 0x355   : > { %2291 = vmatpush1.msra.mxu0 %v1870_v10  ;;  %v1861_v58 = vpop.permute.xlu1 %1860 }
 0x356   : > { %2639 = vmatprep.subr.msk.mxu0 %vm2951_vm4, %v4348_v11  ;;  %v1862_v13 = vsel %vm320_vm9, %v1859_v45, %v1861_v58  ;;  %v1863_v15 = vsel %vm320_vm9, %v1861_v58, %v1859_v45 }
 0x357   : > { %2640 = vmatpush1.msk.msra.mxu0 %vm2959_vm5, %v4340_v7  ;;  %v1843_v7 = vpop.permute.xlu0 %1842 }
 0x358   : > { %2294 = vmatprep.subr.mxu0 %v4241_v16  ;;  %2287 = vperm.xlu0 %2693, %v2284_v0  }
 0x359   : > { %2295 = vmatpush1.msra.mxu0 %v4239_v34  ;;  %v1845_v16 = vpop.permute.xlu1 %1844 }
 0x35a   : > { %2641 = vmatprep.subr.msk.mxu0 %vm2926_vm1, %v4331_v59  ;;  %v1846_v34 = vsel %vm320_vm9, %v1843_v7, %v1845_v16  ;;  %v1847_v11 = vsel %vm320_vm9, %v1845_v16, %v1843_v7 }
 0x35b   : > { %2642 = vmatpush1.msk.msra.mxu0 %vm2930_vm2, %v4325_v61 }
 0x35c   : > { %2298 = vmatprep.subr.mxu0 %v1862_v13 }
 0x35d   : > { %2643 = vmatpush1.msk.msra.mxu0 %vm234_vm8, %v1863_v15 }
 0x35e   : > { %2300 = vmatprep.subr.mxu0 %v4301_v30  ;;  %v1967_v30 = vpop.permute.xlu1 %1966 }
 0x35f   : > { %2644 = vmatpush1.msk.msra.mxu0 %vm234_vm8, %v4297_v55  ;;  %v1965_v55 = vpop.permute.xlu0 %1964 }
 0x360   : > { %2302 = vmatprep.subr.mxu0 %v1846_v34  ;;  %v1969_v47 = vsel %vm345_vm7, %v1967_v30, %v1965_v55  ;;  %v1968_v62 = vsel %vm345_vm7, %v1965_v55, %v1967_v30 }
 0x361   : > { %2645 = vmatpush1.msk.msra.mxu0 %vm234_vm8, %v1847_v11 }
 0x362   : > { %2304 = vmatprep.subr.mxu0 %v2718_v8  ;;  %v1951_v59 = vpop.permute.xlu1 %1950 }
 0x363   : > { %2305 = vmatpush1.msra.mxu0 %v2718_v8  ;;  %v1949_v61 = vpop.permute.xlu0 %1948 }
 0x364   : > { %2306 = vmatprep.subr.mxu0 %v2718_v8  ;;  %v1953_v54 = vsel %vm345_vm7, %v1951_v59, %v1949_v61  ;;  %v1952_v9 = vsel %vm345_vm7, %v1949_v61, %v1951_v59 }
 0x365   : > { %2307 = vmatpush1.msra.mxu0 %v2718_v8 }
 0x366   : > { %2308 = vmatprep.subr.mxu0 %v2718_v8  ;;  %v1943_v18 = vpop.permute.xlu1 %1942 }
 0x367   : > { %2309 = vmatpush1.msra.mxu0 %v2718_v8 }
 0x368   : > { %2310 = vmatprep.subr.mxu0 %v2718_v8 }
 0x369   : > { %2311 = vmatpush1.msra.mxu0 %v2718_v8 }
 0x36a   : > { %2312 = vmatprep.subr.mxu0 %v2718_v8 }
 0x36b   : > { %2313 = vmatpush1.msra.mxu0 %v2718_v8 }
 0x36c   : > { %2314 = vmatprep.subr.mxu0 %v2718_v8 }
 0x36d   : > { %2315 = vmatpush1.msra.mxu0 %v2718_v8 }
 0x36e   : > { %2316 = vmatprep.subr.mxu0 %v2718_v8 }
 0x36f   : > { %2317 = vmatpush1.msra.mxu0 %v2718_v8 }
 0x370   : > { %2318 = vmatprep.subr.mxu0 %v2718_v8 }
 0x371   : > { %2319 = vmatpush1.msra.mxu0 %v2718_v8 }
 0x372   : > { %2320 = vmatprep.subr.mxu0 %v2718_v8 }
 0x373   : > { %2321 = vmatpush1.msra.mxu0 %v2718_v8  ;;  %v1941_v8 = vpop.permute.xlu0 %1940 }
 0x374   : > { %2646 = vmatprep.subr.msk.mxu0 %vm237_vm6, %v1969_v47 }
 0x375   : > { %2333 = vmatpush2.msra.mxu0 %v1968_v62 }
 0x376   : > { %2647 = vmatprep.subr.msk.mxu0 %vm237_vm6, %v4313_v41  ;;  %v1927_v41 = vpop.permute.xlu1 %1926 }
 0x377   : > { %2335 = vmatpush2.msra.mxu0 %v4309_v31  ;;  %v1925_v31 = vpop.permute.xlu0 %1924 }
 0x378   : > { %2648 = vmatprep.subr.msk.mxu0 %vm237_vm6, %v1953_v54  ;;  %v1928_v42 = vsel %vm320_vm9, %v1925_v31, %v1927_v41  ;;  %v1929_v6 = vsel %vm320_vm9, %v1927_v41, %v1925_v31 }
 0x379   : > { %2337 = vmatpush2.msra.mxu0 %v1952_v9 }
 0x37a   : > { %2649 = vmatprep.subr.msk.mxu0 %vm2951_vm4, %v4365_v4  ;;  %v1944_v4 = vsel %vm320_vm9, %v1941_v8, %v1943_v18 }
 0x37b   : > { %2650 = vmatpush2.msk.msra.mxu0 %vm2959_vm5, %v4361_v20  ;;  %v1945_v20 = vsel %vm320_vm9, %v1943_v18, %v1941_v8 }
 0x37c   : > { %2340 = vmatprep.subr.mxu0 %v4253_v33  ;;  %v1937_v33 = vsel %vm320_vm9, %v4401_v51, %v4399_v3 }
 0x37d   : > { %2341 = vmatpush2.msra.mxu0 %v4245_v38  ;;  %v1936_v38 = vsel %vm320_vm9, %v4399_v3, %v4401_v51 }
 0x37e   : > { %2651 = vmatprep.subr.msk.mxu0 %vm2926_vm1, %v4381_v40  ;;  %v1885_v40 = vpop.permute.xlu1 %1884 }
 0x37f   : > { %2652 = vmatpush2.msk.msra.mxu0 %vm2930_vm2, %v4374_v48  ;;  %v1883_v48 = vpop.permute.xlu0 %1882 }
 0x380   : > { %2344 = vmatprep.subr.mxu0 %v1944_v4  ;;  %v1887_v49 = vsel %vm345_vm7, %v1885_v40, %v1883_v48  ;;  %v1886_v3 = vsel %vm345_vm7, %v1883_v48, %v1885_v40 }
 0x381   : > { %2653 = vmatpush2.msk.msra.mxu0 %vm234_vm8, %v1945_v20 }
 0x382   : > { %2346 = vmatprep.subr.mxu0 %v1936_v38 }
 0x383   : > { %2654 = vmatpush2.msk.msra.mxu0 %vm234_vm8, %v1937_v33 }
 0x384   : > { %2348 = vmatprep.subr.mxu0 %v1928_v42 }
 0x385   : > { %2655 = vmatpush2.msk.msra.mxu0 %vm234_vm8, %v1929_v6 }
 0x386   : > { %2656 = vmatprep.subr.msk.mxu0 %vm237_vm6, %v1887_v49 }
 0x387   : > { %2351 = vmatpush2.msra.mxu0 %v1886_v3 }
 0x39d   : > { %v2113_v51 = vpop.permute.xlu0 %2112  ;;  %v2115_v50 = vpop.permute.xlu1 %2114 }
 0x39e   : > { %v2116_v14 = vsel %vm345_vm7, %v2113_v51, %v2115_v50  ;;  %v2117_v1 = vsel %vm345_vm7, %v2115_v50, %v2113_v51 }
 0x39f   : > { %2658 = vmatprep.subr.msk.mxu1 %vm237_vm6, %v2117_v1 }
 0x3a0   : > { %2362 = vmatpush1.msra.mxu1 %v2116_v14 }
 0x3a1   : > { %v1875_v53 = vpop.permute.xlu0 %1874  ;;  %2659 = vmatprep.subr.msk.mxu1 %vm2951_vm4, %v4428_v12  ;;  %v1877_v32 = vpop.permute.xlu1 %1876 }
 0x3a2   : > { %v1878_v56 = vsel %vm345_vm7, %v1875_v53, %v1877_v32  ;;  %v1879_v10 = vsel %vm345_vm7, %v1877_v32, %v1875_v53  ;;  %2660 = vmatpush1.msk.msra.mxu1 %vm2959_vm5, %v4424_v39 }
 0x3a3   : > { %2657 = vmatprep.subr.msk.mxu0 %vm237_vm6, %v1879_v10  ;;  %2365 = vmatprep.subr.mxu1 %v4277_v24 }
 0x3a4   : > { %2353 = vmatpush2.msra.mxu0 %v1878_v56  ;;  %2366 = vmatpush1.msra.mxu1 %v4275_v63 }
 0x3a5   : > { %v2105_v12 = vpop.permute.xlu0 %2104  ;;  %2355 = vmatmul.mubr.f32.vlgmr.msra.gmra.mxu0 %v4644_v46  ;;  %2661 = vmatprep.subr.msk.mxu1 %vm2926_vm1, %v4408_v17  ;;  %v2107_v39 = vpop.permute.xlu1 %2106 }
 0x3a6   : > { %v2109_v0 = vsel %vm320_vm9, %v2107_v39, %v2105_v12  ;;  %2662 = vmatpush1.msk.msra.mxu1 %vm2930_vm2, %v4412_v36  ;;  %v2108_v24 = vsel %vm320_vm9, %v2105_v12, %v2107_v39 }
 0x3a7   : > { %2369 = vmatprep.subr.mxu1 %v2108_v24 }
 0x3a8   : > { %2663 = vmatpush1.msk.msra.mxu1 %vm234_vm8, %v2109_v0 }
 0x3a9   : > { %v2089_v63 = vpop.permute.xlu0 %2088  ;;  %2371 = vmatprep.subr.mxu1 %v4482_v43  ;;  %v2091_v45 = vpop.permute.xlu1 %2090 }
 0x3aa   : > { %v2093_v17 = vsel %vm320_vm9, %v2091_v45, %v2089_v63  ;;  %2664 = vmatpush1.msk.msra.mxu1 %vm234_vm8, %v4478_v19  ;;  %v2092_v36 = vsel %vm320_vm9, %v2089_v63, %v2091_v45 }
 0x3ab   : > { %2373 = vmatprep.subr.mxu1 %v2092_v36 }
 0x3ac   : > { %2665 = vmatpush1.msk.msra.mxu1 %vm234_vm8, %v2093_v17 }
 0x3b2   : > { %v2047_v58 = vpop.permute.xlu0 %2046  ;;  %v2049_v13 = vpop.permute.xlu1 %2048 }
 0x3b3   : > { %v2050_v43 = vsel %vm345_vm7, %v2047_v58, %v2049_v13  ;;  %v2051_v15 = vsel %vm345_vm7, %v2049_v13, %v2047_v58 }
 0x3b4   : > { %2666 = vmatprep.subr.msk.mxu1 %vm237_vm6, %v2051_v15 }
 0x3b5   : > { %2376 = vmatpush1.msra.mxu1 %v2050_v43 }
 0x3b6   : > { %v2031_v19 = vpop.permute.xlu0 %2030  ;;  %2667 = vmatprep.subr.msk.mxu1 %vm237_vm6, %v4492_v44  ;;  %v2033_v7 = vpop.permute.xlu1 %2032 }
 0x3b7   : > { %v2034_v16 = vsel %vm345_vm7, %v2031_v19, %v2033_v7  ;;  %v2035_v34 = vsel %vm345_vm7, %v2033_v7, %v2031_v19  ;;  %2378 = vmatpush1.msra.mxu1 %v4488_v5 }
 0x3b8   : > { %2668 = vmatprep.subr.msk.mxu1 %vm237_vm6, %v2035_v34 }
 0x3b9   : > { %2380 = vmatpush1.msra.mxu1 %v2034_v16 }
 0x3ba   : > { %v2023_v11 = vpop.permute.xlu0 %2022  ;;  %2669 = vmatprep.subr.msk.mxu1 %vm2951_vm4, %v4450_v23  ;;  %v2025_v55 = vpop.permute.xlu1 %2024 }
 0x3bb   : > { %2670 = vmatpush1.msk.msra.mxu1 %vm2959_vm5, %v4446_v57  ;;  %v2026_v35 = vsel %vm320_vm9, %v2023_v11, %v2025_v55  ;;  %v2027_v37 = vsel %vm320_vm9, %v2025_v55, %v2023_v11 }
 0x3bc   : > { %2383 = vmatprep.subr.mxu1 %v4289_v52 }
 0x3bd   : > { %2384 = vmatpush1.msra.mxu1 %v4287_v25 }
 0x3be   : > { %v2007_v44 = vpop.permute.xlu0 %2006  ;;  %2671 = vmatprep.subr.msk.mxu1 %vm2926_vm1, %v4462_v2  ;;  %v2009_v5 = vpop.permute.xlu1 %2008 }
 0x3bf   : > { %2672 = vmatpush1.msk.msra.mxu1 %vm2930_vm2, %v4466_v29  ;;  %v2010_v28 = vsel %vm320_vm9, %v2007_v44, %v2009_v5  ;;  %v2011_v52 = vsel %vm320_vm9, %v2009_v5, %v2007_v44 }
 0x3c0   : > { %2387 = vmatprep.subr.mxu1 %v2026_v35 }
 0x3c1   : > { %2673 = vmatpush1.msk.msra.mxu1 %vm234_vm8, %v2027_v37 }
 0x3c2   : > { %v2129_v25 = vpop.permute.xlu0 %2128  ;;  %2389 = vmatprep.subr.mxu1 %v4502_v60  ;;  %v2131_v27 = vpop.permute.xlu1 %2130 }
 0x3c3   : > { %2674 = vmatpush1.msk.msra.mxu1 %vm234_vm8, %v4498_v26  ;;  %v2133_v57 = vsel %vm345_vm7, %v2131_v27, %v2129_v25  ;;  %v2132_v23 = vsel %vm345_vm7, %v2129_v25, %v2131_v27 }
 0x3c4   : > { %2391 = vmatprep.subr.mxu1 %v2010_v28 }
 0x3c5   : > { %2675 = vmatpush1.msk.msra.mxu1 %vm234_vm8, %v2011_v52 }
 0x3c6   : > { %v2121_v2 = vpop.permute.xlu0 %2120  ;;  %2676 = vmatprep.subr.msk.mxu1 %vm237_vm6, %v2133_v57  ;;  %v2123_v29 = vpop.permute.xlu1 %2122 }
 0x3c7   : > { %v2124_v26 = vsel %vm345_vm7, %v2121_v2, %v2123_v29  ;;  %v2125_v60 = vsel %vm345_vm7, %v2123_v29, %v2121_v2  ;;  %2422 = vmatpush2.msra.mxu1 %v2132_v23 }
 0x3c8   : > { %2677 = vmatprep.subr.msk.mxu1 %vm237_vm6, %v2125_v60 }
 0x3c9   : > { %2424 = vmatpush2.msra.mxu1 %v2124_v26 }
 0x3ca   : > { %2426 = vmatmul.mubr.f32.vlgmr.msra.gmra.mxu1 %v4644_v46 }
 0x3d3   : > { %v2288_v61 = vpop.permute.xlu0 %2287 }
 0x465   : > { %v2356_v30 = vpop.f32.mrf.mxu0 }
 0x466   : > { %v2357_v47 = vadd.f32 %v2356_v30, %v2288_v61 }
 0x467   : > { %v2358_v59 = vpop.f32.mrf.mxu0 }
 0x468   : > { %v2359_v54 = vadd.f32 %v2358_v59, %v2288_v61  ;;  %v2432_v18 = vmax.f32 %v2357_v47, 0.0 }
 0x46a   : > { %v2433_v41 = vmax.f32 %v2359_v54, 0.0 }
 0x48a   : > { %v2427_v62 = vpop.f32.mrf.mxu1 }
 0x48b   : > { %v2428_v9 = vadd.f32 %v2427_v62, %v2288_v61 }
 0x48c   : > { %v2429_v8 = vpop.f32.mrf.mxu1 }
 0x48d   : > { %v2434_v31 = vmax.f32 %v2428_v9, 0.0  ;;  %v2430_v21 = vadd.f32 %v2429_v8, %v2288_v61 }
 0x48f   : > { %v2436_v4 = vadd.f32 %v2434_v31, %v2432_v18  ;;  %v2435_v20 = vmax.f32 %v2430_v21, 0.0 }
 0x491   : > { %v2438_v22 = vmul.f32 0.5, %v2436_v4  ;;  %v2437_v38 = vadd.f32 %v2435_v20, %v2433_v41 }
 0x493   : > { %2440 = vst [vmem:[%s224_s20] sm:$0xff] %v2438_v22  ;;  %v2439_v33 = vmul.f32 0.5, %v2437_v38 }
 0x495   : > { %2441 = vst [vmem:[%s224_s20 + $0x8] sm:$0xff] %v2439_v33 }
 0x496 PF: > { %s15_s18 = sadd.s32 1, %s2712_s18  }
 0x497   : > { %p12_p4 = scmp.ge.s32.totalorder %s15_s18, 4  }
 0x499   :  { %14 = sbr.rel (!%p12_p4) target bundleno = 1 (0x1), region = 80 }

</bundles_post_ra>
